<compile_context>
chip_gen: v7x
topology: tpu7x:2x2x1
jax: 0.10.0
libtpu: 0.0.40
codegen_flags: <defaults>
</compile_context>

<pallas_src>
import jax
import jax.numpy as jnp
from jax.experimental import pallas as pl
from jax.experimental.pallas import tpu as pltpu


NZ, NGF, NC = 16, 16, 3
BN_EPS = 1e-5
OH_FINAL = 16  # output spatial size of the 3-layer stack (1 -> 4 -> 8 -> 16)


# ----------------------------------------------------------------------------
# Pallas kernel: fully fused generator (3 GEMMs + bias + ReLU/ReLU/Tanh)
# ----------------------------------------------------------------------------
def _generator_kernel(z_ref, a1_ref, b1_ref, a2_ref, b2_ref, a3_ref, b3_ref,
                      o_ref):
    # Layer 1: ConvT(nz -> 2*ngf, 1x1 -> 4x4) as dense GEMM, BN1 scale folded
    # into a1, BN1 shift in b1, then ReLU.
    h = jnp.dot(z_ref[...], a1_ref[...], preferred_element_type=jnp.float32)
    h = jnp.maximum(h + b1_ref[...], 0.0)

    # Layer 2: ConvT(2*ngf -> ngf, 4x4 -> 8x8) + folded BN2 + ReLU.
    h = jnp.dot(h.astype(jnp.bfloat16), a2_ref[...],
                preferred_element_type=jnp.float32)
    h = jnp.maximum(h + b2_ref[...], 0.0)

    # Layer 3: ConvT(ngf -> nc, 8x8 -> 16x16) + conv bias + Tanh.
    h = jnp.dot(h.astype(jnp.bfloat16), a3_ref[...],
                preferred_element_type=jnp.float32)
    o_ref[...] = jnp.tanh(h + b3_ref[...]).astype(o_ref.dtype)


def dcgan_generator(z, prep):
    """z: (N, NZ, 1, 1) NCHW latent; prep: GEMM-ready params. Returns NCHW."""
    N = z.shape[0]
    zb = z.reshape(N, NZ).astype(jnp.bfloat16)
    f_out = NC * OH_FINAL * OH_FINAL

    operands = (zb, prep["A1"], prep["b1"], prep["A2"], prep["b2"],
                prep["A3"], prep["b3"])
    in_specs = [pl.BlockSpec(a.shape, lambda i: (0, 0)) for a in operands]

    out = pl.pallas_call(
        _generator_kernel,
        out_shape=jax.ShapeDtypeStruct((N, f_out), jnp.float32),
        grid=(1,),
        in_specs=in_specs,
        out_specs=pl.BlockSpec((N, f_out), lambda i: (0, 0)),
        compiler_params=pltpu.CompilerParams(
            dimension_semantics=("arbitrary",)),
    )(*operands)

    # Channel-major column ordering (co, oh, ow) -> NCHW is a pure reshape.
    return out.reshape(N, NC, OH_FINAL, OH_FINAL)


# ----------------------------------------------------------------------------
# One-time parameter preparation (runs outside the hot path)
# ----------------------------------------------------------------------------
def _fold_bn(gamma, beta, mean, var):
    scale = gamma / jnp.sqrt(var + BN_EPS)
    shift = beta - mean * scale
    return scale, shift


def _conv_transpose2d_ref(x, wt, stride, padding):
    """Reference ConvTranspose2d. x: (N, CI, H, W); wt: (CI, CO, KH, KW)."""
    kh = wt.shape[2]
    wc = jnp.flip(wt, axis=(2, 3)).transpose(1, 0, 2, 3)   # (CO, CI, KH, KW)
    pad = kh - 1 - padding
    return jax.lax.conv_general_dilated(
        x, wc, window_strides=(1, 1),
        padding=[(pad, pad), (pad, pad)],
        lhs_dilation=(stride, stride),
        dimension_numbers=("NCHW", "OIHW", "NCHW"))


def _dense_operator(wt, stride, padding, in_shape):
    """Exact (CI*IH*IW, CO*OH*OW) operator of the transposed conv at this
    fixed spatial size, built by pushing an identity basis through the
    reference conv.  Feature order is channel-major (NCHW-flattened)."""
    ci, ih, iw = in_shape
    f_in = ci * ih * iw
    basis = jnp.eye(f_in, dtype=jnp.float32).reshape(f_in, ci, ih, iw)
    out = _conv_transpose2d_ref(basis, wt, stride, padding)  # (f_in, CO, OH, OW)
    return out.reshape(f_in, -1)


def prepare_params(p):
    s1, t1 = _fold_bn(p["bn1_g"], p["bn1_b"], p["bn1_m"], p["bn1_v"])
    s2, t2 = _fold_bn(p["bn2_g"], p["bn2_b"], p["bn2_m"], p["bn2_v"])

    # Layer 1 (1x1 -> 4x4, stride 1, pad 0): operator is the reshaped weight,
    # columns ordered (co, oh, ow) channel-major.
    a1 = p["w1"].reshape(NZ, 2 * NGF * 4 * 4)
    a1 = a1 * jnp.repeat(s1, 4 * 4)[None, :]            # fold BN1 scale
    b1 = jnp.repeat(t1, 4 * 4)[None, :]

    a2 = _dense_operator(p["w2"], 2, 1, (2 * NGF, 4, 4))  # (512, 1024)
    a2 = a2 * jnp.repeat(s2, 8 * 8)[None, :]              # fold BN2 scale
    b2 = jnp.repeat(t2, 8 * 8)[None, :]

    a3 = _dense_operator(p["w3"], 2, 1, (NGF, 8, 8))       # (1024, 768)
    b3 = jnp.repeat(p["b3"], OH_FINAL * OH_FINAL)[None, :]

    return {
        "A1": a1.astype(jnp.bfloat16), "b1": b1.astype(jnp.float32),
        "A2": a2.astype(jnp.bfloat16), "b2": b2.astype(jnp.float32),
        "A3": a3.astype(jnp.bfloat16), "b3": b3.astype(jnp.float32),
    }


# ----------------------------------------------------------------------------
# Raw (PyTorch-layout) params + pure-JAX reference for validation
# ----------------------------------------------------------------------------
def init_params(key):
    ks = jax.random.split(key, 8)
    p = {}
    # Conv weights ~ N(0, 0.02) (DCGAN init), PyTorch ConvTranspose2d layout.
    p["w1"] = 0.02 * jax.random.normal(ks[0], (NZ, 2 * NGF, 4, 4), jnp.float32)
    p["w2"] = 0.02 * jax.random.normal(ks[1], (2 * NGF, NGF, 4, 4), jnp.float32)
    p["w3"] = 0.02 * jax.random.normal(ks[2], (NGF, NC, 4, 4), jnp.float32)
    p["b3"] = 0.02 * jax.random.normal(ks[3], (NC,), jnp.float32)
    # Eval-mode BatchNorm params / running stats.
    p["bn1_g"] = 1.0 + 0.02 * jax.random.normal(ks[4], (2 * NGF,), jnp.float32)
    p["bn1_b"] = 0.02 * jax.random.normal(ks[5], (2 * NGF,), jnp.float32)
    p["bn1_m"] = jnp.zeros((2 * NGF,), jnp.float32)
    p["bn1_v"] = jnp.ones((2 * NGF,), jnp.float32)
    p["bn2_g"] = 1.0 + 0.02 * jax.random.normal(ks[6], (NGF,), jnp.float32)
    p["bn2_b"] = 0.02 * jax.random.normal(ks[7], (NGF,), jnp.float32)
    p["bn2_m"] = jnp.zeros((NGF,), jnp.float32)
    p["bn2_v"] = jnp.ones((NGF,), jnp.float32)
    return p


def dcgan_generator_ref(z, p):
    """Pure-JAX reference (no Pallas), f32 weights, for validation."""
    s1, t1 = _fold_bn(p["bn1_g"], p["bn1_b"], p["bn1_m"], p["bn1_v"])
    s2, t2 = _fold_bn(p["bn2_g"], p["bn2_b"], p["bn2_m"], p["bn2_v"])
    x = _conv_transpose2d_ref(z, p["w1"], 1, 0)
    x = jnp.maximum(x * s1[None, :, None, None] + t1[None, :, None, None], 0.0)
    x = _conv_transpose2d_ref(x, p["w2"], 2, 1)
    x = jnp.maximum(x * s2[None, :, None, None] + t2[None, :, None, None], 0.0)
    x = _conv_transpose2d_ref(x, p["w3"], 2, 1) + p["b3"][None, :, None, None]
    return jnp.tanh(x)


if __name__ == "__main__":
    key = jax.random.PRNGKey(0)
    k_param, k_z = jax.random.split(key)
    params = init_params(k_param)
    prep = prepare_params(params)          # one-time GEMM-ready weights
    batch = 2
    z = jax.random.normal(k_z, (batch, NZ, 1, 1), jnp.float32)

    fwd = jax.jit(dcgan_generator)
    out = jax.block_until_ready(fwd(z, prep))

    assert out.shape == (batch, NC, OH_FINAL, OH_FINAL), out.shape
    assert out.dtype == jnp.float32
    assert bool(jnp.all(jnp.isfinite(out)))
    assert bool(jnp.all(jnp.abs(out) <= 1.0))  # tanh range

    # Validate against the pure-JAX reference (bf16 weights -> loose tol).
    ref = dcgan_generator_ref(z, params)
    err = float(jnp.max(jnp.abs(out - ref)))
    assert err < 5e-2, f"max abs diff vs reference: {err}"

    print("KERNEL_OK")
</pallas_src>

<mosaic_0001>
module attributes {stable_mosaic.version = 11 : i64} {
  func.func @_generator_kernel(%arg0: i32, %arg1: memref<2x16xbf16, #tpu.memory_space<vmem>>, %arg2: memref<16x512xbf16, #tpu.memory_space<vmem>>, %arg3: memref<1x512xf32, #tpu.memory_space<vmem>>, %arg4: memref<512x1024xbf16, #tpu.memory_space<vmem>>, %arg5: memref<1x1024xf32, #tpu.memory_space<vmem>>, %arg6: memref<1024x768xbf16, #tpu.memory_space<vmem>>, %arg7: memref<1x768xf32, #tpu.memory_space<vmem>>, %arg8: memref<2x768xf32, #tpu.memory_space<vmem>>) attributes {dimension_semantics = [#tpu.dimension_semantics<arbitrary>], iteration_bounds = array<i64: 1>, scalar_prefetch = 0 : i64, scratch_operands = 0 : i64, tpu.core_type = #tpu.core_type<tc>, window_params = [{pipeline_mode = #tpu.pipeline_mode<synchronous>, transform_indices = @transform_0, window_bounds = array<i64: 2, 16>}, {pipeline_mode = #tpu.pipeline_mode<synchronous>, transform_indices = @transform_1, window_bounds = array<i64: 16, 512>}, {pipeline_mode = #tpu.pipeline_mode<synchronous>, transform_indices = @transform_2, window_bounds = array<i64: 1, 512>}, {pipeline_mode = #tpu.pipeline_mode<synchronous>, transform_indices = @transform_3, window_bounds = array<i64: 512, 1024>}, {pipeline_mode = #tpu.pipeline_mode<synchronous>, transform_indices = @transform_4, window_bounds = array<i64: 1, 1024>}, {pipeline_mode = #tpu.pipeline_mode<synchronous>, transform_indices = @transform_5, window_bounds = array<i64: 1024, 768>}, {pipeline_mode = #tpu.pipeline_mode<synchronous>, transform_indices = @transform_6, window_bounds = array<i64: 1, 768>}, {pipeline_mode = #tpu.pipeline_mode<synchronous>, transform_indices = @transform_7, window_bounds = array<i64: 2, 768>}]} {
    %c0 = arith.constant 0 : index
    %c0_0 = arith.constant 0 : index
    %0 = vector.load %arg1[%c0, %c0_0] : memref<2x16xbf16, #tpu.memory_space<vmem>>, vector<2x16xbf16>
    %c0_1 = arith.constant 0 : index
    %c0_2 = arith.constant 0 : index
    %1 = vector.load %arg2[%c0_1, %c0_2] : memref<16x512xbf16, #tpu.memory_space<vmem>>, vector<16x512xbf16>
    %cst = arith.constant dense<0.000000e+00> : vector<2x512xf32>
    %2 = tpu.matmul %0, %1, %cst {dimension_numbers = #tpu.dot_dimension_numbers<[1], [0], [0], [1], [0, 0, 1, 1], [], []>} : vector<2x16xbf16>, vector<16x512xbf16>, vector<2x512xf32> -> vector<2x512xf32>
    %c0_3 = arith.constant 0 : index
    %c0_4 = arith.constant 0 : index
    %3 = vector.load %arg3[%c0_3, %c0_4] : memref<1x512xf32, #tpu.memory_space<vmem>>, vector<1x512xf32>
    %4 = vector.broadcast %3 : vector<1x512xf32> to vector<2x512xf32>
    %5 = arith.addf %2, %4 : vector<2x512xf32>
    %cst_5 = arith.constant 0.000000e+00 : f32
    %6 = vector.broadcast %cst_5 : f32 to vector<2x512xf32>
    %7 = arith.maximumf %5, %6 : vector<2x512xf32>
    %8 = arith.truncf %7 : vector<2x512xf32> to vector<2x512xbf16>
    %c0_6 = arith.constant 0 : index
    %c0_7 = arith.constant 0 : index
    %9 = vector.load %arg4[%c0_6, %c0_7] : memref<512x1024xbf16, #tpu.memory_space<vmem>>, vector<512x1024xbf16>
    %cst_8 = arith.constant dense<0.000000e+00> : vector<2x1024xf32>
    %10 = tpu.matmul %8, %9, %cst_8 {dimension_numbers = #tpu.dot_dimension_numbers<[1], [0], [0], [1], [0, 0, 1, 1], [], []>} : vector<2x512xbf16>, vector<512x1024xbf16>, vector<2x1024xf32> -> vector<2x1024xf32>
    %c0_9 = arith.constant 0 : index
    %c0_10 = arith.constant 0 : index
    %11 = vector.load %arg5[%c0_9, %c0_10] : memref<1x1024xf32, #tpu.memory_space<vmem>>, vector<1x1024xf32>
    %12 = vector.broadcast %11 : vector<1x1024xf32> to vector<2x1024xf32>
    %13 = arith.addf %10, %12 : vector<2x1024xf32>
    %cst_11 = arith.constant 0.000000e+00 : f32
    %14 = vector.broadcast %cst_11 : f32 to vector<2x1024xf32>
    %15 = arith.maximumf %13, %14 : vector<2x1024xf32>
    %16 = arith.truncf %15 : vector<2x1024xf32> to vector<2x1024xbf16>
    %c0_12 = arith.constant 0 : index
    %c0_13 = arith.constant 0 : index
    %17 = vector.load %arg6[%c0_12, %c0_13] : memref<1024x768xbf16, #tpu.memory_space<vmem>>, vector<1024x768xbf16>
    %cst_14 = arith.constant dense<0.000000e+00> : vector<2x768xf32>
    %18 = tpu.matmul %16, %17, %cst_14 {dimension_numbers = #tpu.dot_dimension_numbers<[1], [0], [0], [1], [0, 0, 1, 1], [], []>} : vector<2x1024xbf16>, vector<1024x768xbf16>, vector<2x768xf32> -> vector<2x768xf32>
    %c0_15 = arith.constant 0 : index
    %c0_16 = arith.constant 0 : index
    %19 = vector.load %arg7[%c0_15, %c0_16] : memref<1x768xf32, #tpu.memory_space<vmem>>, vector<1x768xf32>
    %20 = vector.broadcast %19 : vector<1x768xf32> to vector<2x768xf32>
    %21 = arith.addf %18, %20 : vector<2x768xf32>
    %22 = math.tanh %21 : vector<2x768xf32>
    %c0_17 = arith.constant 0 : index
    %c0_18 = arith.constant 0 : index
    %23 = vector.load %arg8[%c0_17, %c0_18] : memref<2x768xf32, #tpu.memory_space<vmem>>, vector<2x768xf32>
    tpu.vector_store %arg8[%c0_17, %c0_18], %22 {strides = array<i32>} : memref<2x768xf32, #tpu.memory_space<vmem>>, vector<2x768xf32>,
    return
  }
  func.func @transform_0(%arg0: i32) -> (i32, i32) {
    %c0_i32 = arith.constant 0 : i32
    %c0_i32_0 = arith.constant 0 : i32
    %c0_i32_1 = arith.constant 0 : i32
    return %c0_i32, %c0_i32_0 : i32, i32
  }
  func.func @transform_1(%arg0: i32) -> (i32, i32) {
    %c0_i32 = arith.constant 0 : i32
    %c0_i32_0 = arith.constant 0 : i32
    %c0_i32_1 = arith.constant 0 : i32
    return %c0_i32, %c0_i32_0 : i32, i32
  }
  func.func @transform_2(%arg0: i32) -> (i32, i32) {
    %c0_i32 = arith.constant 0 : i32
    %c0_i32_0 = arith.constant 0 : i32
    %c0_i32_1 = arith.constant 0 : i32
    return %c0_i32, %c0_i32_0 : i32, i32
  }
  func.func @transform_3(%arg0: i32) -> (i32, i32) {
    %c0_i32 = arith.constant 0 : i32
    %c0_i32_0 = arith.constant 0 : i32
    %c0_i32_1 = arith.constant 0 : i32
    return %c0_i32, %c0_i32_0 : i32, i32
  }
  func.func @transform_4(%arg0: i32) -> (i32, i32) {
    %c0_i32 = arith.constant 0 : i32
    %c0_i32_0 = arith.constant 0 : i32
    %c0_i32_1 = arith.constant 0 : i32
    return %c0_i32, %c0_i32_0 : i32, i32
  }
  func.func @transform_5(%arg0: i32) -> (i32, i32) {
    %c0_i32 = arith.constant 0 : i32
    %c0_i32_0 = arith.constant 0 : i32
    %c0_i32_1 = arith.constant 0 : i32
    return %c0_i32, %c0_i32_0 : i32, i32
  }
  func.func @transform_6(%arg0: i32) -> (i32, i32) {
    %c0_i32 = arith.constant 0 : i32
    %c0_i32_0 = arith.constant 0 : i32
    %c0_i32_1 = arith.constant 0 : i32
    return %c0_i32, %c0_i32_0 : i32, i32
  }
  func.func @transform_7(%arg0: i32) -> (i32, i32) {
    %c0_i32 = arith.constant 0 : i32
    %c0_i32_0 = arith.constant 0 : i32
    %c0_i32_1 = arith.constant 0 : i32
    return %c0_i32, %c0_i32_0 : i32, i32
  }
}

</mosaic_0001>

<bundles_post_ra>
// kernel: dcgan_generator.1
= control target key start
LH: loop header
LB: loop body
LE: loop exit
PB: predicated region body
PF: predicated region fallthrough
CT: control target
= control target key end

     0   :  { %12 = vsyncpa [#allocation3], 0  ;;  %s6776_s0 = inlined_call_operand.vmem [shape: bf16[2,16], index: 0, kind: input, shape index: {}]   ;;  %s6777_s1 = inlined_call_operand.hbm [shape: bf16[16,512], index: 1, kind: input, shape index: {}]   ;;  %s6778_s2 = inlined_call_operand.hbm [shape: f32[1,512], index: 2, kind: input, shape index: {}]   ;;  %s6779_s3 = inlined_call_operand.hbm [shape: bf16[512,1024], index: 3, kind: input, shape index: {}]   ;;  %s6780_s4 = inlined_call_operand.hbm [shape: f32[1,1024], index: 4, kind: input, shape index: {}]   ;;  %s6781_s5 = inlined_call_operand.hbm [shape: bf16[1024,768], index: 5, kind: input, shape index: {}]   ;;  %s6782_s6 = inlined_call_operand.hbm [shape: f32[1,768], index: 6, kind: input, shape index: {}]   ;;  %s6783_s7 = inlined_call_operand.vmem [shape: f32[2,768], index: 7, kind: output, shape index: {}]  }
   0x1   :  { %13 = vsyncpa [#allocation5], 0 }
   0x2   :  { %14 = vsyncpa [#allocation8], 0 }
   0x3   :  { %15 = vsyncpa [#allocation11], 0  ;;  %s6505_s24 = smov [#allocation4]   ;;  %s6506_s26 = smov [#allocation7]  }
   0x4   :  { %s36_s25 = sshll.u32 %s6505_s24, 4  ;;  %s58_s27 = sshll.u32 %s6506_s26, 4  ;;  %s37_s25 = int_to_ptr.vmem [resolvable:$true] %s36_s25  ;;  %s59_s27 = int_to_ptr.vmem [resolvable:$true] %s58_s27 }
   0x5   :  { %s6365_s30 = scalar_lea.hbm %s6778_s2, 64 }
   0x6   :  { %p6366_p0 = scmp.ne.s32.totalorder %s6778_s2, %s6365_s30  ;;  %p6369_p1 = scmp.lt.u32.totalorder %s6365_s30, %s6778_s2 }
   0x8   :  { %p6371_p2 = pnand %p6369_p1, %p6366_p0 }
   0xa   :  { %6374 = shalt.err (!%p6371_p2)
}
   0xb   :  { %s6375_s12 = scalar_lea.vmem %s37_s25, 64  ;;  %p6380_p4 = scmp.lt.s32.totalorder %s37_s25, %s37_s25 }
   0xc   :  { %p6376_p3 = scmp.ne.s32.totalorder %s37_s25, %s6375_s12  ;;  %p6381_p5 = scmp.lt.s32.totalorder %s6375_s12, %s6375_s12 }
   0xe   :  { %p6382_p6 = por %p6381_p5, %p6380_p4 }
  0x10   :  { %p6383_p7 = pnand %p6382_p6, %p6376_p3 }
  0x12   :  { %6386 = shalt.err (!%p6383_p7)
}
  0x13   :  { %39 = dma.hbm_to_vmem [thread:$0]  %s6778_s2, 64, %s37_s25, [#allocation5]  }
  0x14   :  { %s6387_s17 = scalar_lea.hbm %s6780_s4, 128 }
  0x15   :  { %p6388_p8 = scmp.ne.s32.totalorder %s6780_s4, %s6387_s17  ;;  %p6391_p9 = scmp.lt.u32.totalorder %s6387_s17, %s6780_s4 }
  0x17   :  { %p6393_p10 = pnand %p6391_p9, %p6388_p8 }
  0x19   :  { %6396 = shalt.err (!%p6393_p10)
}
  0x1a   :  { %s6397_s22 = scalar_lea.vmem %s59_s27, 128  ;;  %p6402_p12 = scmp.lt.s32.totalorder %s59_s27, %s59_s27 }
  0x1b   :  { %p6398_p11 = scmp.ne.s32.totalorder %s59_s27, %s6397_s22  ;;  %p6403_p13 = scmp.lt.s32.totalorder %s6397_s22, %s6397_s22 }
  0x1d   :  { %p6404_p0 = por %p6403_p13, %p6402_p12 }
  0x1f   :  { %p6405_p1 = pnand %p6404_p0, %p6398_p11 }
  0x21   :  { %6408 = shalt.err (!%p6405_p1)
}
  0x22   :  { %61 = dma.hbm_to_vmem [thread:$0]  %s6780_s4, 128, %s59_s27, [#allocation8]  }
  0x23   :  { %s6507_s24 = smov [#allocation2]   ;;  %s6409_s29 = scalar_lea.hbm %s6777_s1, 512 }
  0x24   :  { %s23_s25 = sshll.u32 %s6507_s24, 4  ;;  %p6410_p2 = scmp.ne.s32.totalorder %s6777_s1, %s6409_s29  ;;  %s24_s25 = int_to_ptr.vmem [resolvable:$true] %s23_s25 }
  0x25   :  { %p6413_p3 = scmp.lt.u32.totalorder %s6409_s29, %s6777_s1 }
  0x27   :  { %p6415_p4 = pnand %p6413_p3, %p6410_p2 }
  0x29   :  { %6418 = shalt.err (!%p6415_p4)
}
  0x2a   :  { %s6419_s11 = scalar_lea.vmem %s24_s25, 512  ;;  %p6424_p6 = scmp.lt.s32.totalorder %s24_s25, %s24_s25 }
  0x2b   :  { %p6420_p5 = scmp.ne.s32.totalorder %s24_s25, %s6419_s11  ;;  %p6425_p7 = scmp.lt.s32.totalorder %s6419_s11, %s6419_s11 }
  0x2d   :  { %p6426_p8 = por %p6425_p7, %p6424_p6 }
  0x2f   :  { %p6427_p9 = pnand %p6426_p8, %p6420_p5 }
  0x31   :  { %6430 = shalt.err (!%p6427_p9)
}
  0x32   :  { %s6508_s4 = smov 256   ;;  %s6509_s27 = smov 16  }
  0x33   :  { %29 = dma.hbm_to_vmem [thread:$0]  %s6777_s1, 512, %s24_s25, [#allocation3], %s6508_s4, %s6508_s4, %s6509_s27  }
  0x34   :  { %s6510_s14 = smov [#allocation6]   ;;  %s6431_s18 = scalar_lea.hbm %s6779_s3, 32768 }
  0x35   :  { %s45_s15 = sshll.u32 %s6510_s14, 4  ;;  %p6432_p10 = scmp.ne.s32.totalorder %s6779_s3, %s6431_s18  ;;  %s46_s15 = int_to_ptr.vmem [resolvable:$true] %s45_s15 }
  0x36   :  { %p6435_p11 = scmp.lt.u32.totalorder %s6431_s18, %s6779_s3 }
  0x38   :  { %p6437_p12 = pnand %p6435_p11, %p6432_p10 }
  0x3a   :  { %6440 = shalt.err (!%p6437_p12)
}
  0x3b   :  { %s6441_s2 = scalar_lea.vmem %s46_s15, 32768  ;;  %p6446_p0 = scmp.lt.s32.totalorder %s46_s15, %s46_s15 }
  0x3c   :  { %p6442_p13 = scmp.ne.s32.totalorder %s46_s15, %s6441_s2  ;;  %p6447_p1 = scmp.lt.s32.totalorder %s6441_s2, %s6441_s2 }
  0x3e   :  { %p6448_p2 = por %p6447_p1, %p6446_p0 }
  0x40   :  { %p6449_p3 = pnand %p6448_p2, %p6442_p13 }
  0x42   :  { %6452 = shalt.err (!%p6449_p3)
}
  0x43   :  { %s6511_s1 = smov 512   ;;  %s6512_s23 = smov 32  }
  0x44   :  { %51 = dma.hbm_to_vmem [thread:$0]  %s6779_s3, 32768, %s46_s15, [#allocation5], %s6511_s1, %s6511_s1, %s6512_s23  }
  0x45   :  { %s6513_s26 = smov [#allocation9]   ;;  %s6453_s8 = scalar_lea.hbm %s6781_s5, 49152 }
  0x46   :  { %s67_s28 = sshll.u32 %s6513_s26, 4  ;;  %p6454_p4 = scmp.ne.s32.totalorder %s6781_s5, %s6453_s8  ;;  %s68_s28 = int_to_ptr.vmem [resolvable:$true] %s67_s28 }
  0x47   :  { %p6457_p5 = scmp.lt.u32.totalorder %s6453_s8, %s6781_s5 }
  0x49   :  { %p6459_p6 = pnand %p6457_p5, %p6454_p4 }
  0x4b   :  { %6462 = shalt.err (!%p6459_p6)
}
  0x4c   :  { %s6463_s27 = scalar_lea.vmem %s68_s28, 49152  ;;  %p6468_p8 = scmp.lt.s32.totalorder %s68_s28, %s68_s28 }
  0x4d   :  { %p6464_p7 = scmp.ne.s32.totalorder %s68_s28, %s6463_s27  ;;  %p6469_p9 = scmp.lt.s32.totalorder %s6463_s27, %s6463_s27 }
  0x4f   :  { %p6470_p10 = por %p6469_p9, %p6468_p8 }
  0x51   :  { %p6471_p11 = pnand %p6470_p10, %p6464_p7 }
  0x53   :  { %6474 = shalt.err (!%p6471_p11)
}
  0x54   :  { %s6514_s3 = smov 384   ;;  %s6515_s12 = smov 24  }
  0x55   :  { %73 = dma.hbm_to_vmem [thread:$0]  %s6781_s5, 49152, %s68_s28, [#allocation8], %s6514_s3, %s6514_s3, %s6515_s12  }
  0x56   :  { %s6516_s15 = smov [#allocation10]   ;;  %s6475_s19 = scalar_lea.hbm %s6782_s6, 96 }
  0x57   :  { %s80_s16 = sshll.u32 %s6516_s15, 4  ;;  %p6476_p12 = scmp.ne.s32.totalorder %s6782_s6, %s6475_s19  ;;  %s81_s16 = int_to_ptr.vmem [resolvable:$true] %s80_s16 }
  0x58   :  { %p6479_p13 = scmp.lt.u32.totalorder %s6475_s19, %s6782_s6 }
  0x5a   :  { %p6481_p0 = pnand %p6479_p13, %p6476_p12 }
  0x5c   :  { %6484 = shalt.err (!%p6481_p0)
}
  0x5d   :  { %s6485_s1 = scalar_lea.vmem %s81_s16, 96  ;;  %p6490_p2 = scmp.lt.s32.totalorder %s81_s16, %s81_s16 }
  0x5e   :  { %p6486_p1 = scmp.ne.s32.totalorder %s81_s16, %s6485_s1  ;;  %p6491_p3 = scmp.lt.s32.totalorder %s6485_s1, %s6485_s1 }
  0x60   :  { %p6492_p4 = por %p6491_p3, %p6490_p2 }
  0x62   :  { %p6493_p5 = pnand %p6492_p4, %p6486_p1 }
  0x64   :  { %6496 = shalt.err (!%p6493_p5)
}
  0x65   :  { %83 = dma.hbm_to_vmem [thread:$0]  %s6782_s6, 96, %s81_s16, [#allocation11]  }
  0x66   :  { %6497 = dma.done.wait [#allocation3], 512  }
  0x67   :  { %6498 = vsyncadd [#allocation3], 4294966784 }
  0x68   :  { %6499 = dma.done.wait [#allocation5], 32832  }
  0x69   :  { %6500 = vsyncadd [#allocation5], 4294934464 }
  0x6a   :  { %6501 = dma.done.wait [#allocation8], 49280  }
  0x6b   :  { %6502 = vsyncadd [#allocation8], 4294918016 }
  0x6c   :  { %6503 = dma.done.wait [#allocation11], 96  }
  0x6d   :  { %6504 = vsyncadd [#allocation11], 4294967200  ;;  %v6517_v0 = vmov 0   ;;  %v5770_v1 = vld [vmem:[#allocation2 + $0x4] ss:$16 sps:$4 sm:$0xff]   ;;  %vm150_vm0 = vcmask 130048  }
  0x6e   :  { %186 = vmatprep.mubr.bf16.mxu0 %v6517_v0  ;;  %227 = vmatprep.mubr.bf16.mxu1 %v6517_v0  ;;  %v5772_v2 = vld [vmem:[#allocation2] ss:$16 sps:$4 sm:$0xff]   ;;  %v5773_v4 = vld [vmem:[#allocation2 + $0xc] ss:$16 sps:$4 sm:$0xff]   ;;  %v5775_v5 = vld [vmem:[#allocation2 + $0x8] ss:$16 sps:$4 sm:$0xff]  }
  0x6f   :  { %v103_v3 = vld [vmem:[%s6776_s0] sm:$0x1]  ;;  %154 = vmatprep.subr.bf16.mxu0 %v5770_v1  ;;  %v244_v6 = vld [vmem:[#allocation6] sm:$0xff]  ;;  %v246_v8 = vld [vmem:[#allocation6 + $0x10] sm:$0xff]  ;;  %195 = vmatprep.subr.bf16.mxu1 %v5773_v4 }
  0x70   :  { %155 = vmatpush1.bf16.msra.mxu0 %v5772_v2  ;;  %v248_v7 = vld [vmem:[#allocation6 + $0x20] sm:$0xff]  ;;  %v250_v10 = vld [vmem:[#allocation6 + $0x30] sm:$0xff]  ;;  %196 = vmatpush1.bf16.msra.mxu1 %v5775_v5 }
  0x71   :  { %v5050_v9 = vcombine.high %v244_v6, %v248_v7  ;;  %v252_v11 = vld [vmem:[#allocation6 + $0x40] sm:$0xff]  ;;  %v5049_v13 = vcombine.low %v244_v6, %v248_v7  ;;  %v5053_v14 = vcombine.low %v246_v8, %v250_v10  ;;  %v5054_v15 = vcombine.high %v246_v8, %v250_v10  ;;  %v254_v16 = vld [vmem:[#allocation6 + $0x50] sm:$0xff] }
  0x72   :  { %v256_v12 = vld [vmem:[#allocation6 + $0x60] sm:$0xff]  ;;  %v258_v17 = vld [vmem:[#allocation6 + $0x70] sm:$0xff] }
  0x73   :  { %5047 = vmatmul.mubr.msk.bf16.vlgmr.msra.gmra.mrb[0].mxu0 %vm150_vm0, %v103_v3  ;;  %1822 = vmatprep.subr.bf16.mxu1 %v5050_v9  ;;  %v5058_v18 = vcombine.high %v252_v11, %v256_v12  ;;  %v5062_v19 = vcombine.high %v254_v16, %v258_v17  ;;  %v262_v20 = vld [vmem:[#allocation6 + $0x90] sm:$0xff]  ;;  %v260_v22 = vld [vmem:[#allocation6 + $0x80] sm:$0xff]  ;;  %v5061_v24 = vcombine.low %v254_v16, %v258_v17 }
  0x74   :  { %v266_v21 = vld [vmem:[#allocation6 + $0xb0] sm:$0xff]  ;;  %1986 = vmatprep.subr.bf16.mxu0 %v5054_v15  ;;  %v264_v23 = vld [vmem:[#allocation6 + $0xa0] sm:$0xff]  ;;  %5048 = vmatmul.mubr.msk.bf16.vlgmr.msra.gmra.mrb[0].mxu1 %vm150_vm0, %v103_v3  ;;  %v5057_v25 = vcombine.low %v252_v11, %v256_v12 }
  0x75   :  { %1987 = vmatpush1.bf16.msra.mxu0 %v5053_v14  ;;  %1823 = vmatpush1.bf16.msra.mxu1 %v5049_v13  ;;  %v5070_v26 = vcombine.high %v262_v20, %v266_v21  ;;  %v5066_v27 = vcombine.high %v260_v22, %v264_v23  ;;  %v270_v28 = vld [vmem:[#allocation6 + $0xd0] sm:$0xff]  ;;  %v268_v30 = vld [vmem:[#allocation6 + $0xc0] sm:$0xff]  ;;  %v5069_v32 = vcombine.low %v262_v20, %v266_v21 }
  0x76   :  { %1988 = vmatprep.subr.bf16.mxu0 %v5062_v19  ;;  %1824 = vmatprep.subr.bf16.mxu1 %v5058_v18  ;;  %v274_v29 = vld [vmem:[#allocation6 + $0xf0] sm:$0xff]  ;;  %v272_v31 = vld [vmem:[#allocation6 + $0xe0] sm:$0xff]  ;;  %v5065_v33 = vcombine.low %v260_v22, %v264_v23 }
  0x77   :  { %v5078_v34 = vcombine.high %v270_v28, %v274_v29  ;;  %v5074_v35 = vcombine.high %v268_v30, %v272_v31  ;;  %v278_v36 = vld [vmem:[#allocation6 + $0x110] sm:$0xff]  ;;  %v276_v38 = vld [vmem:[#allocation6 + $0x100] sm:$0xff]  ;;  %v5077_v40 = vcombine.low %v270_v28, %v274_v29  ;;  %v5073_v41 = vcombine.low %v268_v30, %v272_v31 }
  0x78   :  { %v282_v37 = vld [vmem:[#allocation6 + $0x130] sm:$0xff]  ;;  %v280_v39 = vld [vmem:[#allocation6 + $0x120] sm:$0xff] }
  0x79   :  { %1989 = vmatpush1.bf16.msra.mxu0 %v5061_v24  ;;  %1825 = vmatpush1.bf16.msra.mxu1 %v5057_v25  ;;  %v5086_v42 = vcombine.high %v278_v36, %v282_v37  ;;  %v5082_v43 = vcombine.high %v276_v38, %v280_v39  ;;  %v286_v44 = vld [vmem:[#allocation6 + $0x150] sm:$0xff]  ;;  %v284_v46 = vld [vmem:[#allocation6 + $0x140] sm:$0xff]  ;;  %v5085_v48 = vcombine.low %v278_v36, %v282_v37 }
  0x7a   :  { %1990 = vmatprep.subr.bf16.mxu0 %v5070_v26  ;;  %1826 = vmatprep.subr.bf16.mxu1 %v5066_v27  ;;  %v290_v45 = vld [vmem:[#allocation6 + $0x170] sm:$0xff]  ;;  %v288_v47 = vld [vmem:[#allocation6 + $0x160] sm:$0xff]  ;;  %v5081_v49 = vcombine.low %v276_v38, %v280_v39 }
  0x7b   :  { %v5094_v50 = vcombine.high %v286_v44, %v290_v45  ;;  %v292_v51 = vld [vmem:[#allocation6 + $0x180] sm:$0xff]  ;;  %v294_v53 = vld [vmem:[#allocation6 + $0x190] sm:$0xff]  ;;  %v5090_v55 = vcombine.high %v284_v46, %v288_v47  ;;  %v5093_v56 = vcombine.low %v286_v44, %v290_v45  ;;  %v5089_v59 = vcombine.low %v284_v46, %v288_v47 }
  0x7c   :  { %v296_v52 = vld [vmem:[#allocation6 + $0x1a0] sm:$0xff]  ;;  %v298_v54 = vld [vmem:[#allocation6 + $0x1b0] sm:$0xff] }
  0x7d   :  { %1991 = vmatpush1.bf16.msra.mxu0 %v5069_v32  ;;  %1827 = vmatpush1.bf16.msra.mxu1 %v5065_v33  ;;  %v302_v57 = vld [vmem:[#allocation6 + $0x1d0] sm:$0xff]  ;;  %v5102_v60 = vcombine.high %v294_v53, %v298_v54  ;;  %v300_v61 = vld [vmem:[#allocation6 + $0x1c0] sm:$0xff]  ;;  %v5098_v63 = vcombine.high %v292_v51, %v296_v52  ;;  %v5101_v0 = vcombine.low %v294_v53, %v298_v54 }
  0x7e   :  { %1992 = vmatprep.subr.bf16.mxu0 %v5078_v34  ;;  %1828 = vmatprep.subr.bf16.mxu1 %v5074_v35  ;;  %v306_v58 = vld [vmem:[#allocation6 + $0x1f0] sm:$0xff]  ;;  %v304_v62 = vld [vmem:[#allocation6 + $0x1e0] sm:$0xff]  ;;  %v5097_v3 = vcombine.low %v292_v51, %v296_v52 }
  0x7f   :  { %v310_v1 = vld [vmem:[#allocation6 + $0x210] sm:$0xff]  ;;  %v5110_v4 = vcombine.high %v302_v57, %v306_v58  ;;  %v308_v5 = vld [vmem:[#allocation6 + $0x200] sm:$0xff]  ;;  %v5106_v7 = vcombine.high %v300_v61, %v304_v62  ;;  %v5109_v8 = vcombine.low %v302_v57, %v306_v58  ;;  %v5105_v11 = vcombine.low %v300_v61, %v304_v62 }
  0x80   :  { %v314_v2 = vld [vmem:[#allocation6 + $0x230] sm:$0xff]  ;;  %v312_v6 = vld [vmem:[#allocation6 + $0x220] sm:$0xff] }
  0x81   :  { %1993 = vmatpush1.bf16.msra.mxu0 %v5077_v40  ;;  %1829 = vmatpush1.bf16.msra.mxu1 %v5073_v41  ;;  %v318_v9 = vld [vmem:[#allocation6 + $0x250] sm:$0xff]  ;;  %v5118_v12 = vcombine.high %v310_v1, %v314_v2  ;;  %v316_v13 = vld [vmem:[#allocation6 + $0x240] sm:$0xff]  ;;  %v5114_v15 = vcombine.high %v308_v5, %v312_v6  ;;  %v5117_v16 = vcombine.low %v310_v1, %v314_v2 }
  0x82   :  { %1994 = vmatprep.subr.bf16.mxu0 %v5086_v42  ;;  %1830 = vmatprep.subr.bf16.mxu1 %v5082_v43  ;;  %v322_v10 = vld [vmem:[#allocation6 + $0x270] sm:$0xff]  ;;  %v320_v14 = vld [vmem:[#allocation6 + $0x260] sm:$0xff]  ;;  %v5113_v19 = vcombine.low %v308_v5, %v312_v6 }
  0x83   :  { %v326_v17 = vld [vmem:[#allocation6 + $0x290] sm:$0xff]  ;;  %v5126_v20 = vcombine.high %v318_v9, %v322_v10  ;;  %v324_v21 = vld [vmem:[#allocation6 + $0x280] sm:$0xff]  ;;  %v5122_v23 = vcombine.high %v316_v13, %v320_v14  ;;  %v5125_v24 = vcombine.low %v318_v9, %v322_v10  ;;  %v5121_v27 = vcombine.low %v316_v13, %v320_v14 }
  0x84   :  { %v330_v18 = vld [vmem:[#allocation6 + $0x2b0] sm:$0xff]  ;;  %v328_v22 = vld [vmem:[#allocation6 + $0x2a0] sm:$0xff]  ;;  %v110_v14 = vlaneseq }
  0x85   :  { %1995 = vmatpush1.bf16.msra.mxu0 %v5085_v48  ;;  %1831 = vmatpush1.bf16.msra.mxu1 %v5081_v49  ;;  %v334_v25 = vld [vmem:[#allocation6 + $0x2d0] sm:$0xff]  ;;  %v5134_v28 = vcombine.high %v326_v17, %v330_v18  ;;  %v332_v29 = vld [vmem:[#allocation6 + $0x2c0] sm:$0xff]  ;;  %v5130_v31 = vcombine.high %v324_v21, %v328_v22  ;;  %v5133_v32 = vcombine.low %v326_v17, %v330_v18  ;;  %v6641_v17 = vld [vmem:[#allocation4] sm:$0xf] }
  0x86   :  { %1996 = vmatprep.subr.bf16.mxu0 %v5094_v50  ;;  %1832 = vmatprep.subr.bf16.mxu1 %v5090_v55  ;;  %v338_v26 = vld [vmem:[#allocation6 + $0x2f0] sm:$0xff]  ;;  %v336_v30 = vld [vmem:[#allocation6 + $0x2e0] sm:$0xff]  ;;  %v5129_v35 = vcombine.low %v324_v21, %v328_v22 }
  0x87   :  { %v342_v33 = vld [vmem:[#allocation6 + $0x310] sm:$0xff]  ;;  %v5142_v36 = vcombine.high %v334_v25, %v338_v26  ;;  %v340_v37 = vld [vmem:[#allocation6 + $0x300] sm:$0xff]  ;;  %v5138_v39 = vcombine.high %v332_v29, %v336_v30  ;;  %v5141_v40 = vcombine.low %v334_v25, %v338_v26  ;;  %v5137_v43 = vcombine.low %v332_v29, %v336_v30 }
  0x88   :  { %v346_v34 = vld [vmem:[#allocation6 + $0x330] sm:$0xff]  ;;  %v344_v38 = vld [vmem:[#allocation6 + $0x320] sm:$0xff] }
  0x89   :  { %1997 = vmatpush1.bf16.msra.mxu0 %v5093_v56  ;;  %1833 = vmatpush1.bf16.msra.mxu1 %v5089_v59  ;;  %v350_v41 = vld [vmem:[#allocation6 + $0x350] sm:$0xff]  ;;  %v5150_v44 = vcombine.high %v342_v33, %v346_v34  ;;  %v348_v45 = vld [vmem:[#allocation6 + $0x340] sm:$0xff]  ;;  %v5146_v47 = vcombine.high %v340_v37, %v344_v38  ;;  %v5149_v48 = vcombine.low %v342_v33, %v346_v34 }
  0x8a   :  { %1998 = vmatprep.subr.bf16.mxu0 %v5102_v60  ;;  %1834 = vmatprep.subr.bf16.mxu1 %v5098_v63  ;;  %v354_v42 = vld [vmem:[#allocation6 + $0x370] sm:$0xff]  ;;  %v352_v46 = vld [vmem:[#allocation6 + $0x360] sm:$0xff]  ;;  %v5145_v49 = vcombine.low %v340_v37, %v344_v38 }
  0x8b   :  { %v5158_v50 = vcombine.high %v350_v41, %v354_v42  ;;  %v5154_v51 = vcombine.high %v348_v45, %v352_v46  ;;  %v5157_v52 = vcombine.low %v350_v41, %v354_v42  ;;  %v5153_v53 = vcombine.low %v348_v45, %v352_v46  ;;  %v356_v54 = vld [vmem:[#allocation6 + $0x380] sm:$0xff]  ;;  %v358_v56 = vld [vmem:[#allocation6 + $0x390] sm:$0xff] }
  0x8c   :  { %v360_v55 = vld [vmem:[#allocation6 + $0x3a0] sm:$0xff]  ;;  %v362_v58 = vld [vmem:[#allocation6 + $0x3b0] sm:$0xff] }
  0x8d   :  { %1999 = vmatpush1.bf16.msra.mxu0 %v5101_v0  ;;  %1835 = vmatpush1.bf16.msra.mxu1 %v5097_v3  ;;  %v5162_v57 = vcombine.high %v356_v54, %v360_v55  ;;  %v5161_v59 = vcombine.low %v356_v54, %v360_v55  ;;  %v5165_v60 = vcombine.low %v358_v56, %v362_v58  ;;  %v364_v62 = vld [vmem:[#allocation6 + $0x3c0] sm:$0xff]  ;;  %v366_v0 = vld [vmem:[#allocation6 + $0x3d0] sm:$0xff] }
  0x8e   :  { %2000 = vmatprep.subr.bf16.mxu0 %v5110_v4  ;;  %1836 = vmatprep.subr.bf16.mxu1 %v5106_v7  ;;  %v5166_v61 = vcombine.high %v358_v56, %v362_v58  ;;  %v368_v63 = vld [vmem:[#allocation6 + $0x3e0] sm:$0xff]  ;;  %v370_v2 = vld [vmem:[#allocation6 + $0x3f0] sm:$0xff] }
  0x8f   :  { %v5170_v1 = vcombine.high %v364_v62, %v368_v63  ;;  %v5169_v3 = vcombine.low %v364_v62, %v368_v63  ;;  %v5173_v4 = vcombine.low %v366_v0, %v370_v2  ;;  %v5174_v5 = vcombine.high %v366_v0, %v370_v2  ;;  %v372_v6 = vld [vmem:[#allocation6 + $0x400] sm:$0xff]  ;;  %v378_v10 = vld [vmem:[#allocation6 + $0x430] sm:$0xff] }
  0x90   :  { %v376_v7 = vld [vmem:[#allocation6 + $0x420] sm:$0xff]  ;;  %v398_v56 = vld [vmem:[#allocation6 + $0x4d0] sm:$0xff] }
  0x91   :  { %2001 = vmatpush1.bf16.msra.mxu0 %v5109_v8  ;;  %1837 = vmatpush1.bf16.msra.mxu1 %v5105_v11  ;;  %v374_v8 = vld [vmem:[#allocation6 + $0x410] sm:$0xff]  ;;  %v5178_v9 = vcombine.high %v372_v6, %v376_v7  ;;  %v5177_v11 = vcombine.low %v372_v6, %v376_v7  ;;  %v384_v34 = vld [vmem:[#allocation6 + $0x460] sm:$0xff] }
  0x92   :  { %2002 = vmatprep.subr.bf16.mxu0 %v5118_v12  ;;  %1838 = vmatprep.subr.bf16.mxu1 %v5114_v15  ;;  %v5181_v12 = vcombine.low %v374_v8, %v378_v10  ;;  %v5182_v13 = vcombine.high %v374_v8, %v378_v10  ;;  %v6636_v15 = vshrl.u32 %v110_v14, 7  ;;  %v388_v45 = vld [vmem:[#allocation6 + $0x480] sm:$0xff]  ;;  %v406_v0 = vld [vmem:[#allocation6 + $0x510] sm:$0xff] }
  0x93   :  { %v392_v46 = vld [vmem:[#allocation6 + $0x4a0] sm:$0xff]  ;;  %v414_v8 = vld [vmem:[#allocation6 + $0x550] sm:$0xff] }
  0x94   :  { %v6644_v18 = vsub.s32 1, %v6636_v15  ;;  %v396_v54 = vld [vmem:[#allocation6 + $0x4c0] sm:$0xff]  ;;  %v5193_v58 = vcombine.low %v388_v45, %v392_v46 }
  0x95   :  { %2003 = vmatpush1.bf16.msra.mxu0 %v5117_v16  ;;  %1839 = vmatpush1.bf16.msra.mxu1 %v5113_v19  ;;  %v6639_v16 = vsub.s32 0, %v6636_v15  ;;  %v6647_v19 = vsub.s32 3, %v6636_v15  ;;  %v400_v55 = vld [vmem:[#allocation6 + $0x4e0] sm:$0xff] }
  0x96   :  { %2004 = vmatprep.subr.bf16.mxu0 %v5126_v20  ;;  %1840 = vmatprep.subr.bf16.mxu1 %v5122_v23  ;;  %v117_v21 = vrot.slane %v6641_v17, %v6644_v18  ;;  %v404_v62 = vld [vmem:[#allocation6 + $0x500] sm:$0xff]  ;;  %v5201_v2 = vcombine.low %v396_v54, %v400_v55 }
  0x97   :  { %v113_v20 = vrot.slane %v6641_v17, %v6639_v16  ;;  %v125_v23 = vrot.slane %v6641_v17, %v6647_v19  ;;  %v408_v63 = vld [vmem:[#allocation6 + $0x520] sm:$0xff] }
  0x98   :  { %v412_v6 = vld [vmem:[#allocation6 + $0x540] sm:$0xff]  ;;  %v5209_v10 = vcombine.low %v404_v62, %v408_v63 }
  0x99   :  { %2005 = vmatpush1.bf16.msra.mxu0 %v5125_v24  ;;  %1841 = vmatpush1.bf16.msra.mxu1 %v5121_v27  ;;  %v416_v7 = vld [vmem:[#allocation6 + $0x560] sm:$0xff] }
  0x9a   :  { %2006 = vmatprep.subr.bf16.mxu0 %v5134_v28  ;;  %1842 = vmatprep.subr.bf16.mxu1 %v5130_v31  ;;  %v380_v31 = vld [vmem:[#allocation6 + $0x440] sm:$0xff] }
  0x9b   :  { %v420_v14 = vld [vmem:[#allocation6 + $0x580] sm:$0xff] }
  0x9d   :  { %2007 = vmatpush1.bf16.msra.mxu0 %v5133_v32  ;;  %1843 = vmatpush1.bf16.msra.mxu1 %v5129_v35  ;;  %v382_v35 = vld [vmem:[#allocation6 + $0x450] sm:$0xff] }
  0x9e   :  { %2008 = vmatprep.subr.bf16.mxu0 %v5142_v36  ;;  %1844 = vmatprep.subr.bf16.mxu1 %v5138_v39  ;;  %v386_v36 = vld [vmem:[#allocation6 + $0x470] sm:$0xff] }
  0xa1   :  { %2009 = vmatpush1.bf16.msra.mxu0 %v5141_v40  ;;  %1845 = vmatpush1.bf16.msra.mxu1 %v5137_v43  ;;  %v5186_v43 = vcombine.high %v380_v31, %v384_v34 }
  0xa2   :  { %2010 = vmatprep.subr.bf16.mxu0 %v5150_v44  ;;  %1846 = vmatprep.subr.bf16.mxu1 %v5146_v47  ;;  %v5190_v44 = vcombine.high %v382_v35, %v386_v36  ;;  %v390_v47 = vld [vmem:[#allocation6 + $0x490] sm:$0xff] }
  0xa5   :  { %2011 = vmatpush1.bf16.msra.mxu0 %v5149_v48  ;;  %1847 = vmatpush1.bf16.msra.mxu1 %v5145_v49  ;;  %v394_v48 = vld [vmem:[#allocation6 + $0x4b0] sm:$0xff] }
  0xa6   :  { %2012 = vmatprep.subr.bf16.mxu0 %v5158_v50  ;;  %1848 = vmatprep.subr.bf16.mxu1 %v5154_v51  ;;  %v5185_v50 = vcombine.low %v380_v31, %v384_v34  ;;  %v5189_v51 = vcombine.low %v382_v35, %v386_v36  ;;  %v434_v31 = vld [vmem:[#allocation6 + $0x5f0] sm:$0xff]  ;;  %v436_v36 = vld [vmem:[#allocation6 + $0x600] sm:$0xff] }
  0xa9   :  { %2013 = vmatpush1.bf16.msra.mxu0 %v5157_v52  ;;  %1849 = vmatpush1.bf16.msra.mxu1 %v5153_v53  ;;  %v5194_v52 = vcombine.high %v388_v45, %v392_v46  ;;  %v5198_v53 = vcombine.high %v390_v47, %v394_v48  ;;  %v444_v46 = vld [vmem:[#allocation6 + $0x640] sm:$0xff] }
  0xaa   :  { %1850 = vmatprep.subr.bf16.mxu1 %v5162_v57  ;;  %2014 = vmatprep.subr.bf16.mxu0 %v5166_v61  ;;  %v402_v57 = vld [vmem:[#allocation6 + $0x4f0] sm:$0xff] }
  0xab   :  { %v5206_v61 = vcombine.high %v398_v56, %v402_v57 }
  0xad   :  { %1851 = vmatpush1.bf16.msra.mxu1 %v5161_v59  ;;  %2015 = vmatpush1.bf16.msra.mxu0 %v5165_v60  ;;  %v5197_v59 = vcombine.low %v390_v47, %v394_v48  ;;  %v5202_v60 = vcombine.high %v396_v54, %v400_v55  ;;  %v448_v47 = vld [vmem:[#allocation6 + $0x660] sm:$0xff]  ;;  %v446_v48 = vld [vmem:[#allocation6 + $0x650] sm:$0xff] }
  0xae   :  { %1852 = vmatprep.subr.bf16.mxu1 %v5170_v1  ;;  %2016 = vmatprep.subr.bf16.mxu0 %v5174_v5  ;;  %v410_v1 = vld [vmem:[#allocation6 + $0x530] sm:$0xff]  ;;  %v452_v55 = vld [vmem:[#allocation6 + $0x680] sm:$0xff] }
  0xaf   :  { %v5214_v5 = vcombine.high %v406_v0, %v410_v1 }
  0xb1   :  { %1853 = vmatpush1.bf16.msra.mxu1 %v5169_v3  ;;  %2017 = vmatpush1.bf16.msra.mxu0 %v5173_v4  ;;  %v5205_v3 = vcombine.low %v398_v56, %v402_v57  ;;  %v5210_v4 = vcombine.high %v404_v62, %v408_v63  ;;  %v456_v56 = vld [vmem:[#allocation6 + $0x6a0] sm:$0xff]  ;;  %v454_v57 = vld [vmem:[#allocation6 + $0x690] sm:$0xff] }
  0xb2   :  { %1863 = vmatprep.subr.bf16.mxu1 %v5178_v9  ;;  %2027 = vmatprep.subr.bf16.mxu0 %v5182_v13  ;;  %v418_v9 = vld [vmem:[#allocation6 + $0x570] sm:$0xff]  ;;  %v460_v63 = vld [vmem:[#allocation6 + $0x6c0] sm:$0xff] }
  0xb3   :  { %v5222_v13 = vcombine.high %v414_v8, %v418_v9 }
 0x146   :  { %v188_v22 = vpop.f32.mrb[0].mxu0 }
 0x147   :  { %v189_v24 = vadd.f32 %v188_v22, %v113_v20  ;;  %v190_v25 = vpop.f32.mrb[1].mxu0  ;;  %v6655_v28 = vpop.f32.mrb[0].mxu1  ;;  %v424_v20 = vld [vmem:[#allocation6 + $0x5a0] sm:$0xff]  ;;  %v426_v22 = vld [vmem:[#allocation6 + $0x5b0] sm:$0xff] }
 0x148   :  { %v191_v26 = vadd.f32 %v190_v25, %v117_v21  ;;  %v192_v27 = vpop.f32.mrb[2].mxu0  ;;  %v231_v32 = vpop.f32.mrb[1].mxu1  ;;  %v422_v21 = vld [vmem:[#allocation6 + $0x590] sm:$0xff]  ;;  %v5226_v25 = vcombine.high %v420_v14, %v424_v20 }
 0x149   :  { %v236_v29 = vmax.f32 %v189_v24, 0.0  ;;  %v193_v30 = vpop.f32.mrb[3].mxu0  ;;  %v232_v37 = vadd.f32 %v231_v32, %v125_v23  ;;  %v233_v38 = vpop.f32.mrb[2].mxu1  ;;  %v5217_v23 = vcombine.low %v412_v6, %v416_v7  ;;  %v5221_v24 = vcombine.low %v414_v8, %v418_v9  ;;  %v428_v27 = vld [vmem:[#allocation6 + $0x5c0] sm:$0xff]  ;;  %v470_v9 = vld [vmem:[#allocation6 + $0x710] sm:$0xff] }
 0x14a   :  { %v237_v33 = vmax.f32 %v191_v26, 0.0  ;;  %v234_v39 = vpop.f32.mrb[3].mxu1  ;;  %v5230_v26 = vcombine.high %v422_v21, %v426_v22  ;;  %v430_v30 = vld [vmem:[#allocation6 + $0x5d0] sm:$0xff]  ;;  %v5225_v32 = vcombine.low %v420_v14, %v424_v20  ;;  %v472_v8 = vld [vmem:[#allocation6 + $0x720] sm:$0xff] }
 0x14b   :  { %v239_v41 = vmax.f32 %v232_v37, 0.0  ;;  %v6659_v42 = vpack.c.bf16 %v236_v29, %v236_v29  ;;  %v432_v29 = vld [vmem:[#allocation6 + $0x5e0] sm:$0xff]  ;;  %v5238_v35 = vcombine.high %v430_v30, %v434_v31  ;;  %v438_v38 = vld [vmem:[#allocation6 + $0x610] sm:$0xff] }
 0x14c   :  { %v6657_v40 = vpack.c.bf16 %v237_v33, %v237_v33  ;;  %v5229_v33 = vcombine.low %v422_v21, %v426_v22  ;;  %v5234_v34 = vcombine.high %v428_v27, %v432_v29  ;;  %v440_v37 = vld [vmem:[#allocation6 + $0x620] sm:$0xff]  ;;  %v442_v39 = vld [vmem:[#allocation6 + $0x630] sm:$0xff] }
 0x14d   :  { %v6663_v49 = vpack.c.bf16 %v239_v41, %v239_v41  ;;  %v5233_v41 = vcombine.low %v428_v27, %v432_v29  ;;  %v5246_v45 = vcombine.high %v438_v38, %v442_v39  ;;  %v476_v20 = vld [vmem:[#allocation6 + $0x740] sm:$0xff]  ;;  %v478_v22 = vld [vmem:[#allocation6 + $0x750] sm:$0xff] }
 0x14e   :  { %1854 = vmatprep.mubr.bf16.mxu1 %v6657_v40  ;;  %2018 = vmatprep.mubr.bf16.mxu0 %v6657_v40  ;;  %v480_v21 = vld [vmem:[#allocation6 + $0x760] sm:$0xff] }
 0x14f   :  { %1855 = vmatmul.mubr.bf16.vlgmr.msra.gmra.mrb[4].mxu1 %v6659_v42  ;;  %2019 = vmatmul.mubr.bf16.vlgmr.msra.gmra.mrb[4].mxu0 %v6659_v42  ;;  %v5282_v27 = vcombine.high %v476_v20, %v480_v21 }
 0x150   :  { %1864 = vmatpush1.bf16.msra.mxu1 %v5177_v11  ;;  %2028 = vmatpush1.bf16.msra.mxu0 %v5181_v12  ;;  %v5213_v11 = vcombine.low %v406_v0, %v410_v1  ;;  %v5218_v12 = vcombine.high %v412_v6, %v416_v7  ;;  %v464_v0 = vld [vmem:[#allocation6 + $0x6e0] sm:$0xff]  ;;  %v462_v1 = vld [vmem:[#allocation6 + $0x6d0] sm:$0xff] }
 0x151   :  { %1865 = vmatprep.subr.bf16.mxu1 %v5186_v43  ;;  %2029 = vmatprep.subr.bf16.mxu0 %v5190_v44  ;;  %v5237_v43 = vcombine.low %v430_v30, %v434_v31  ;;  %v5242_v44 = vcombine.high %v436_v36, %v440_v37  ;;  %v468_v7 = vld [vmem:[#allocation6 + $0x700] sm:$0xff] }
 0x152   :  { %1895 = vmatprep.mubr.bf16.mxu1 %v6663_v49  ;;  %2059 = vmatprep.mubr.bf16.mxu0 %v6663_v49  ;;  %v484_v30 = vld [vmem:[#allocation6 + $0x780] sm:$0xff] }
 0x153   :  { %v488_v31 = vld [vmem:[#allocation6 + $0x7a0] sm:$0xff] }
 0x154   :  { %1866 = vmatpush1.bf16.msra.mxu1 %v5185_v50  ;;  %2030 = vmatpush1.bf16.msra.mxu0 %v5189_v51  ;;  %v450_v50 = vld [vmem:[#allocation6 + $0x670] sm:$0xff]  ;;  %v5241_v51 = vcombine.low %v436_v36, %v440_v37  ;;  %v5290_v37 = vcombine.high %v484_v30, %v488_v31 }
 0x155   :  { %1867 = vmatprep.subr.bf16.mxu1 %v5194_v52  ;;  %2031 = vmatprep.subr.bf16.mxu0 %v5198_v53  ;;  %v5245_v52 = vcombine.low %v438_v38, %v442_v39  ;;  %v5250_v53 = vcombine.high %v444_v46, %v448_v47  ;;  %v5254_v54 = vcombine.high %v446_v48, %v450_v50  ;;  %v492_v39 = vld [vmem:[#allocation6 + $0x7c0] sm:$0xff] }
 0x158   :  { %1868 = vmatpush1.bf16.msra.mxu1 %v5193_v58  ;;  %2032 = vmatpush1.bf16.msra.mxu0 %v5197_v59  ;;  %v458_v58 = vld [vmem:[#allocation6 + $0x6b0] sm:$0xff]  ;;  %v5249_v59 = vcombine.low %v444_v46, %v448_v47  ;;  %v5289_v46 = vcombine.low %v484_v30, %v488_v31  ;;  %v5776_v31 = vld [vmem:[#allocation9] ss:$24 sps:$4 sm:$0xff]  }
 0x159   :  { %1869 = vmatprep.subr.bf16.mxu1 %v5202_v60  ;;  %2033 = vmatprep.subr.bf16.mxu0 %v5206_v61  ;;  %v5253_v60 = vcombine.low %v446_v48, %v450_v50  ;;  %v5258_v61 = vcombine.high %v452_v55, %v456_v56  ;;  %v5262_v62 = vcombine.high %v454_v57, %v458_v58  ;;  %v245_v50 = vld [vmem:[#allocation6 + $0x8] sm:$0xff] }
 0x15c   :  { %1870 = vmatpush1.bf16.msra.mxu1 %v5201_v2  ;;  %2034 = vmatpush1.bf16.msra.mxu0 %v5205_v3  ;;  %v466_v2 = vld [vmem:[#allocation6 + $0x6f0] sm:$0xff]  ;;  %v5257_v3 = vcombine.low %v452_v55, %v456_v56  ;;  %v253_v56 = vld [vmem:[#allocation6 + $0x48] sm:$0xff] }
 0x15d   :  { %1871 = vmatprep.subr.bf16.mxu1 %v5210_v4  ;;  %2035 = vmatprep.subr.bf16.mxu0 %v5214_v5  ;;  %v5261_v4 = vcombine.low %v454_v57, %v458_v58  ;;  %v5266_v5 = vcombine.high %v460_v63, %v464_v0  ;;  %v5270_v6 = vcombine.high %v462_v1, %v466_v2 }
 0x160   :  { %1872 = vmatpush1.bf16.msra.mxu1 %v5209_v10  ;;  %2036 = vmatpush1.bf16.msra.mxu0 %v5213_v11  ;;  %v474_v10 = vld [vmem:[#allocation6 + $0x730] sm:$0xff]  ;;  %v5265_v11 = vcombine.low %v460_v63, %v464_v0  ;;  %v269_v0 = vld [vmem:[#allocation6 + $0xc8] sm:$0xff] }
 0x161   :  { %1873 = vmatprep.subr.bf16.mxu1 %v5218_v12  ;;  %2037 = vmatprep.subr.bf16.mxu0 %v5222_v13  ;;  %v5269_v12 = vcombine.low %v462_v1, %v466_v2  ;;  %v5274_v13 = vcombine.high %v468_v7, %v472_v8  ;;  %v5278_v14 = vcombine.high %v470_v9, %v474_v10  ;;  %v273_v1 = vld [vmem:[#allocation6 + $0xe8] sm:$0xff] }
 0x164   :  { %1874 = vmatpush1.bf16.msra.mxu1 %v5217_v23  ;;  %2038 = vmatpush1.bf16.msra.mxu0 %v5221_v24  ;;  %v482_v23 = vld [vmem:[#allocation6 + $0x770] sm:$0xff]  ;;  %v6670_v24 = vsub.s32 2, %v6636_v15 }
 0x165   :  { %1875 = vmatprep.subr.bf16.mxu1 %v5226_v25  ;;  %2039 = vmatprep.subr.bf16.mxu0 %v5230_v26  ;;  %v5273_v25 = vcombine.low %v468_v7, %v472_v8  ;;  %v5277_v26 = vcombine.low %v470_v9, %v474_v10  ;;  %v5286_v29 = vcombine.high %v478_v22, %v482_v23  ;;  %v285_v8 = vld [vmem:[#allocation6 + $0x148] sm:$0xff] }
 0x166   :  { %v5285_v36 = vcombine.low %v478_v22, %v482_v23  ;;  %v289_v9 = vld [vmem:[#allocation6 + $0x168] sm:$0xff] }
 0x167   :  { %v305_v22 = vld [vmem:[#allocation6 + $0x1e8] sm:$0xff] }
 0x168   :  { %1876 = vmatpush1.bf16.msra.mxu1 %v5225_v32  ;;  %2040 = vmatpush1.bf16.msra.mxu0 %v5229_v33  ;;  %v486_v32 = vld [vmem:[#allocation6 + $0x790] sm:$0xff] }
 0x169   :  { %1877 = vmatprep.subr.bf16.mxu1 %v5234_v34  ;;  %2041 = vmatprep.subr.bf16.mxu0 %v5238_v35  ;;  %v490_v33 = vld [vmem:[#allocation6 + $0x7b0] sm:$0xff]  ;;  %v121_v34 = vrot.slane %v6641_v17, %v6670_v24  ;;  %v5281_v35 = vcombine.low %v476_v20, %v480_v21  ;;  %v301_v21 = vld [vmem:[#allocation6 + $0x1c8] sm:$0xff] }
 0x16a   :  { %v5294_v38 = vcombine.high %v486_v32, %v490_v33  ;;  %v5293_v47 = vcombine.low %v486_v32, %v490_v33  ;;  %v5778_v32 = vld [vmem:[#allocation9 + $0x4] ss:$24 sps:$4 sm:$0xff]  }
 0x16b   :  { %v317_v33 = vld [vmem:[#allocation6 + $0x248] sm:$0xff] }
 0x16c   :  { %1878 = vmatpush1.bf16.msra.mxu1 %v5233_v41  ;;  %2042 = vmatpush1.bf16.msra.mxu0 %v5237_v43  ;;  %v496_v41 = vld [vmem:[#allocation6 + $0x7e0] sm:$0xff]  ;;  %v494_v43 = vld [vmem:[#allocation6 + $0x7d0] sm:$0xff] }
 0x16d   :  { %1879 = vmatprep.subr.bf16.mxu1 %v5242_v44  ;;  %2043 = vmatprep.subr.bf16.mxu0 %v5246_v45  ;;  %v498_v44 = vld [vmem:[#allocation6 + $0x7f0] sm:$0xff]  ;;  %v230_v45 = vadd.f32 %v6655_v28, %v121_v34  ;;  %v5298_v17 = vcombine.high %v492_v39, %v496_v41  ;;  %v257_v28 = vld [vmem:[#allocation6 + $0x68] sm:$0xff] }
 0x16e   :  { %v5302_v48 = vcombine.high %v494_v43, %v498_v44  ;;  %v321_v34 = vld [vmem:[#allocation6 + $0x268] sm:$0xff] }
 0x170   :  { %1880 = vmatpush1.bf16.msra.mxu1 %v5241_v51  ;;  %2044 = vmatpush1.bf16.msra.mxu0 %v5245_v52  ;;  %v249_v51 = vld [vmem:[#allocation6 + $0x28] sm:$0xff]  ;;  %v238_v52 = vmax.f32 %v230_v45, 0.0 }
 0x171   :  { %1881 = vmatprep.subr.bf16.mxu1 %v5250_v53  ;;  %2045 = vmatprep.subr.bf16.mxu0 %v5254_v54  ;;  %v5297_v53 = vcombine.low %v492_v39, %v496_v41  ;;  %v5301_v54 = vcombine.low %v494_v43, %v498_v44  ;;  %v5052_v55 = vcombine.high %v245_v50, %v249_v51  ;;  %v325_v39 = vld [vmem:[#allocation6 + $0x288] sm:$0xff] }
 0x172   :  { %v6675_v57 = vpack.c.bf16 %v238_v52, %v238_v52  ;;  %v5051_v58 = vcombine.low %v245_v50, %v249_v51  ;;  %v329_v41 = vld [vmem:[#allocation6 + $0x2a8] sm:$0xff]  ;;  %v5123_v43 = vcombine.low %v317_v33, %v321_v34  ;;  %v5785_v51 = vld [vmem:[#allocation9 + $0x90] ss:$24 sps:$4 sm:$0xff]   ;;  %v5787_v52 = vld [vmem:[#allocation9 + $0x94] ss:$24 sps:$4 sm:$0xff]  }
 0x173   :  { %v5132_v44 = vcombine.high %v325_v39, %v329_v41  ;;  %v5782_v45 = vld [vmem:[#allocation9 + $0x60] ss:$24 sps:$4 sm:$0xff]  }
 0x174   :  { %1882 = vmatpush1.bf16.msra.mxu1 %v5249_v59  ;;  %2046 = vmatpush1.bf16.msra.mxu0 %v5253_v60  ;;  %v5060_v59 = vcombine.high %v253_v56, %v257_v28  ;;  %v261_v60 = vld [vmem:[#allocation6 + $0x88] sm:$0xff] }
 0x175   :  { %1883 = vmatprep.subr.bf16.mxu1 %v5258_v61  ;;  %2047 = vmatprep.subr.bf16.mxu0 %v5262_v62  ;;  %v265_v61 = vld [vmem:[#allocation6 + $0xa8] sm:$0xff]  ;;  %v5059_v62 = vcombine.low %v253_v56, %v257_v28 }
 0x176   :  { %v5068_v63 = vcombine.high %v261_v60, %v265_v61  ;;  %v5067_v2 = vcombine.low %v261_v60, %v265_v61  ;;  %v5788_v28 = vld [vmem:[#allocation9 + $0xc0] ss:$24 sps:$4 sm:$0xff]  }
 0x177   :  { %v353_v60 = vld [vmem:[#allocation6 + $0x368] sm:$0xff] }
 0x178   :  { %1884 = vmatpush1.bf16.msra.mxu1 %v5257_v3  ;;  %2048 = vmatpush1.bf16.msra.mxu0 %v5261_v4  ;;  %v5076_v3 = vcombine.high %v269_v0, %v273_v1  ;;  %v277_v4 = vld [vmem:[#allocation6 + $0x108] sm:$0xff] }
 0x179   :  { %1885 = vmatprep.subr.bf16.mxu1 %v5266_v5  ;;  %2049 = vmatprep.subr.bf16.mxu0 %v5270_v6  ;;  %v281_v5 = vld [vmem:[#allocation6 + $0x128] sm:$0xff]  ;;  %v5075_v6 = vcombine.low %v269_v0, %v273_v1  ;;  %v5793_v0 = vld [vmem:[#allocation9 + $0xf4] ss:$24 sps:$4 sm:$0xff]  }
 0x17a   :  { %v5084_v7 = vcombine.high %v277_v4, %v281_v5  ;;  %v5083_v10 = vcombine.low %v277_v4, %v281_v5  ;;  %v357_v1 = vld [vmem:[#allocation6 + $0x388] sm:$0xff] }
 0x17b   :  { %v5794_v5 = vld [vmem:[#allocation9 + $0x120] ss:$24 sps:$4 sm:$0xff]  }
 0x17c   :  { %1886 = vmatpush1.bf16.msra.mxu1 %v5265_v11  ;;  %2050 = vmatpush1.bf16.msra.mxu0 %v5269_v12  ;;  %v5092_v11 = vcombine.high %v285_v8, %v289_v9  ;;  %v293_v12 = vld [vmem:[#allocation6 + $0x188] sm:$0xff] }
 0x17d   :  { %1887 = vmatprep.subr.bf16.mxu1 %v5274_v13  ;;  %2051 = vmatprep.subr.bf16.mxu0 %v5278_v14  ;;  %v297_v13 = vld [vmem:[#allocation6 + $0x1a8] sm:$0xff]  ;;  %v5091_v14 = vcombine.low %v285_v8, %v289_v9 }
 0x17e   :  { %v5100_v20 = vcombine.high %v293_v12, %v297_v13  ;;  %v5099_v23 = vcombine.low %v293_v12, %v297_v13  ;;  %v369_v8 = vld [vmem:[#allocation6 + $0x3e8] sm:$0xff]  ;;  %v5799_v12 = vld [vmem:[#allocation9 + $0x154] ss:$24 sps:$4 sm:$0xff]  }
 0x17f   :  { %v373_v13 = vld [vmem:[#allocation6 + $0x408] sm:$0xff] }
 0x180   :  { %1888 = vmatpush1.bf16.msra.mxu1 %v5273_v25  ;;  %2052 = vmatpush1.bf16.msra.mxu0 %v5277_v26  ;;  %v5108_v25 = vcombine.high %v301_v21, %v305_v22  ;;  %v309_v26 = vld [vmem:[#allocation6 + $0x208] sm:$0xff] }
 0x181   :  { %1889 = vmatprep.subr.bf16.mxu1 %v5282_v27  ;;  %2053 = vmatprep.subr.bf16.mxu0 %v5286_v29  ;;  %v313_v27 = vld [vmem:[#allocation6 + $0x228] sm:$0xff]  ;;  %v5107_v29 = vcombine.low %v301_v21, %v305_v22 }
 0x182   :  { %v5116_v30 = vcombine.high %v309_v26, %v313_v27  ;;  %v5800_v22 = vld [vmem:[#allocation9 + $0x180] ss:$24 sps:$4 sm:$0xff]  }
 0x184   :  { %1890 = vmatpush1.bf16.msra.mxu1 %v5281_v35  ;;  %2054 = vmatpush1.bf16.msra.mxu0 %v5285_v36  ;;  %v5115_v35 = vcombine.low %v309_v26, %v313_v27  ;;  %v5124_v36 = vcombine.high %v317_v33, %v321_v34  ;;  %v385_v26 = vld [vmem:[#allocation6 + $0x468] sm:$0xff]  ;;  %v5803_v33 = vld [vmem:[#allocation9 + $0x1b0] ss:$24 sps:$4 sm:$0xff]  }
 0x185   :  { %1891 = vmatprep.subr.bf16.mxu1 %v5290_v37  ;;  %2055 = vmatprep.subr.bf16.mxu0 %v5294_v38  ;;  %v5779_v37 = vld [vmem:[#allocation9 + $0x30] ss:$24 sps:$4 sm:$0xff]   ;;  %v5781_v38 = vld [vmem:[#allocation9 + $0x34] ss:$24 sps:$4 sm:$0xff]  }
 0x188   :  { %1892 = vmatpush1.bf16.msra.mxu1 %v5289_v46  ;;  %2056 = vmatpush1.bf16.msra.mxu0 %v5293_v47  ;;  %v5784_v46 = vld [vmem:[#allocation9 + $0x64] ss:$24 sps:$4 sm:$0xff]  }
 0x189   :  { %1893 = vmatprep.subr.bf16.mxu1 %v5298_v17  ;;  %2057 = vmatprep.subr.bf16.mxu0 %v5302_v48  ;;  %v333_v47 = vld [vmem:[#allocation6 + $0x2c8] sm:$0xff]  ;;  %v5131_v48 = vcombine.low %v325_v39, %v329_v41 }
 0x18a   :  { %v337_v17 = vld [vmem:[#allocation6 + $0x2e8] sm:$0xff] }
 0x18b   :  { %v5140_v50 = vcombine.high %v333_v47, %v337_v17  ;;  %v401_v39 = vld [vmem:[#allocation6 + $0x4e8] sm:$0xff] }
 0x18c   :  { %1894 = vmatpush1.bf16.msra.mxu1 %v5297_v53  ;;  %2058 = vmatpush1.bf16.msra.mxu0 %v5301_v54  ;;  %v341_v53 = vld [vmem:[#allocation6 + $0x308] sm:$0xff] }
 0x18d   :  { %1904 = vmatprep.subr.bf16.mxu1 %v5052_v55  ;;  %4502 = vmatprep.subr.bf16.mxu0 %v5778_v32  ;;  %v345_v54 = vld [vmem:[#allocation6 + $0x328] sm:$0xff]  ;;  %v5139_v55 = vcombine.low %v333_v47, %v337_v17 }
 0x18e   :  { %v5148_v56 = vcombine.high %v341_v53, %v345_v54  ;;  %v5147_v61 = vcombine.low %v341_v53, %v345_v54  ;;  %v393_v32 = vld [vmem:[#allocation6 + $0x4a8] sm:$0xff] }
 0x18f   :  { %1896 = vmatmul.mubr.bf16.vlgmr.msra.gmra.mrb[4].mxu1 %v6675_v57  ;;  %2060 = vmatmul.mubr.bf16.vlgmr.msra.gmra.mrb[4].mxu0 %v6675_v57  ;;  %v409_v47 = vld [vmem:[#allocation6 + $0x528] sm:$0xff] }
 0x190   :  { %1905 = vmatpush1.bf16.msra.mxu1 %v5051_v58  ;;  %1936 = vmatprep.mubr.bf16.mxu1 %v6657_v40  ;;  %v5790_v58 = vld [vmem:[#allocation9 + $0xc4] ss:$24 sps:$4 sm:$0xff]  }
 0x191   :  { %1906 = vmatprep.subr.bf16.mxu1 %v5060_v59  ;;  %4503 = vmatpush1.bf16.msra.mxu0 %v5776_v31  ;;  %v349_v59 = vld [vmem:[#allocation6 + $0x348] sm:$0xff] }
 0x192   :  { %4504 = vmatprep.subr.bf16.mxu0 %v5781_v38  ;;  %v389_v31 = vld [vmem:[#allocation6 + $0x488] sm:$0xff] }
 0x193   :  { %v397_v38 = vld [vmem:[#allocation6 + $0x4c8] sm:$0xff]  ;;  %v5195_v41 = vcombine.low %v389_v31, %v393_v32 }
 0x194   :  { %1907 = vmatpush1.bf16.msra.mxu1 %v5059_v62  ;;  %v5156_v62 = vcombine.high %v349_v59, %v353_v60  ;;  %v5203_v17 = vcombine.low %v397_v38, %v401_v39  ;;  %v417_v53 = vld [vmem:[#allocation6 + $0x568] sm:$0xff] }
 0x195   :  { %1908 = vmatprep.subr.bf16.mxu1 %v5068_v63  ;;  %4505 = vmatpush1.bf16.msra.mxu0 %v5779_v37  ;;  %v5791_v63 = vld [vmem:[#allocation9 + $0xf0] ss:$24 sps:$4 sm:$0xff]   ;;  %v5808_v37 = vld [vmem:[#allocation9 + $0x1e4] ss:$24 sps:$4 sm:$0xff]  }
 0x196   :  { %4506 = vmatprep.subr.bf16.mxu0 %v5784_v46  ;;  %v405_v46 = vld [vmem:[#allocation6 + $0x508] sm:$0xff] }
 0x197   :  { %v5211_v54 = vcombine.low %v405_v46, %v409_v47 }
 0x198   :  { %1909 = vmatpush1.bf16.msra.mxu1 %v5067_v2  ;;  %v361_v2 = vld [vmem:[#allocation6 + $0x3a8] sm:$0xff] }
 0x199   :  { %1910 = vmatprep.subr.bf16.mxu1 %v5076_v3  ;;  %4507 = vmatpush1.bf16.msra.mxu0 %v5782_v45  ;;  %v5155_v3 = vcombine.low %v349_v59, %v353_v60  ;;  %v5164_v4 = vcombine.high %v357_v1, %v361_v2  ;;  %v5163_v9 = vcombine.low %v357_v1, %v361_v2  ;;  %v5811_v45 = vld [vmem:[#allocation9 + $0x214] ss:$24 sps:$4 sm:$0xff]   ;;  %v425_v59 = vld [vmem:[#allocation6 + $0x5a8] sm:$0xff] }
 0x19a   :  { %4508 = vmatprep.subr.bf16.mxu0 %v5787_v52  ;;  %v413_v52 = vld [vmem:[#allocation6 + $0x548] sm:$0xff] }
 0x19b   :  { %v5219_v60 = vcombine.low %v413_v52, %v417_v53  ;;  %v5818_v1 = vld [vmem:[#allocation9 + $0x2a0] ss:$24 sps:$4 sm:$0xff]  }
 0x19c   :  { %1911 = vmatpush1.bf16.msra.mxu1 %v5075_v6  ;;  %v5796_v6 = vld [vmem:[#allocation9 + $0x124] ss:$24 sps:$4 sm:$0xff]  }
 0x19d   :  { %1912 = vmatprep.subr.bf16.mxu1 %v5084_v7  ;;  %4509 = vmatpush1.bf16.msra.mxu0 %v5785_v51  ;;  %v365_v7 = vld [vmem:[#allocation6 + $0x3c8] sm:$0xff] }
 0x19e   :  { %4510 = vmatprep.subr.bf16.mxu0 %v5790_v58  ;;  %v5814_v51 = vld [vmem:[#allocation9 + $0x244] ss:$24 sps:$4 sm:$0xff]  }
 0x19f   :  { %v421_v58 = vld [vmem:[#allocation6 + $0x588] sm:$0xff] }
 0x1a0   :  { %1913 = vmatpush1.bf16.msra.mxu1 %v5083_v10  ;;  %v5172_v10 = vcombine.high %v365_v7, %v369_v8  ;;  %v5227_v2 = vcombine.low %v421_v58, %v425_v59 }
 0x1a1   :  { %1914 = vmatprep.subr.bf16.mxu1 %v5092_v11  ;;  %4511 = vmatpush1.bf16.msra.mxu0 %v5788_v28  ;;  %v5797_v11 = vld [vmem:[#allocation9 + $0x150] ss:$24 sps:$4 sm:$0xff]   ;;  %v5817_v28 = vld [vmem:[#allocation9 + $0x274] ss:$24 sps:$4 sm:$0xff]  }
 0x1a2   :  { %4512 = vmatprep.subr.bf16.mxu0 %v5793_v0  ;;  %v433_v0 = vld [vmem:[#allocation6 + $0x5e8] sm:$0xff] }
 0x1a4   :  { %1915 = vmatpush1.bf16.msra.mxu1 %v5091_v14  ;;  %v377_v14 = vld [vmem:[#allocation6 + $0x428] sm:$0xff] }
 0x1a5   :  { %1916 = vmatprep.subr.bf16.mxu1 %v5100_v20  ;;  %4513 = vmatpush1.bf16.msra.mxu0 %v5791_v63  ;;  %v5171_v20 = vcombine.low %v365_v7, %v369_v8  ;;  %v5180_v21 = vcombine.high %v373_v13, %v377_v14  ;;  %v5179_v27 = vcombine.low %v373_v13, %v377_v14  ;;  %v429_v63 = vld [vmem:[#allocation6 + $0x5c8] sm:$0xff]  ;;  %v5821_v7 = vld [vmem:[#allocation9 + $0x2d0] ss:$24 sps:$4 sm:$0xff]  }
 0x1a6   :  { %4514 = vmatprep.subr.bf16.mxu0 %v5796_v6  ;;  %v441_v6 = vld [vmem:[#allocation6 + $0x628] sm:$0xff]  ;;  %v5235_v8 = vcombine.low %v429_v63, %v433_v0 }
 0x1a7   :  { %v453_v14 = vld [vmem:[#allocation6 + $0x688] sm:$0xff] }
 0x1a8   :  { %1917 = vmatpush1.bf16.msra.mxu1 %v5099_v23  ;;  %v5802_v23 = vld [vmem:[#allocation9 + $0x184] ss:$24 sps:$4 sm:$0xff]  }
 0x1a9   :  { %1918 = vmatprep.subr.bf16.mxu1 %v5108_v25  ;;  %4515 = vmatpush1.bf16.msra.mxu0 %v5794_v5  ;;  %v381_v25 = vld [vmem:[#allocation6 + $0x448] sm:$0xff] }
 0x1aa   :  { %4516 = vmatprep.subr.bf16.mxu0 %v5799_v12  ;;  %v5187_v34 = vcombine.low %v381_v25, %v385_v26  ;;  %v437_v5 = vld [vmem:[#allocation6 + $0x608] sm:$0xff] }
 0x1ab   :  { %v5243_v12 = vcombine.low %v437_v5, %v441_v6 }
 0x1ac   :  { %1919 = vmatpush1.bf16.msra.mxu1 %v5107_v29  ;;  %v5188_v29 = vcombine.high %v381_v25, %v385_v26  ;;  %v465_v25 = vld [vmem:[#allocation6 + $0x6e8] sm:$0xff] }
 0x1ad   :  { %1920 = vmatprep.subr.bf16.mxu1 %v5116_v30  ;;  %4517 = vmatpush1.bf16.msra.mxu0 %v5797_v11  ;;  %v5805_v30 = vld [vmem:[#allocation9 + $0x1b4] ss:$24 sps:$4 sm:$0xff]   ;;  %v449_v11 = vld [vmem:[#allocation6 + $0x668] sm:$0xff] }
 0x1ae   :  { %4518 = vmatprep.subr.bf16.mxu0 %v5802_v23  ;;  %v461_v23 = vld [vmem:[#allocation6 + $0x6c8] sm:$0xff] }
 0x1b0   :  { %1921 = vmatpush1.bf16.msra.mxu1 %v5115_v35  ;;  %v5196_v35 = vcombine.high %v389_v31, %v393_v32  ;;  %v5267_v31 = vcombine.low %v461_v23, %v465_v25 }
 0x1b1   :  { %1922 = vmatprep.subr.bf16.mxu1 %v5124_v36  ;;  %4519 = vmatpush1.bf16.msra.mxu0 %v5800_v22  ;;  %v5806_v36 = vld [vmem:[#allocation9 + $0x1e0] ss:$24 sps:$4 sm:$0xff]  }
 0x1b2   :  { %4520 = vmatprep.subr.bf16.mxu0 %v5805_v30  ;;  %v473_v30 = vld [vmem:[#allocation6 + $0x728] sm:$0xff] }
 0x1b4   :  { %1923 = vmatpush1.bf16.msra.mxu1 %v5123_v43  ;;  %v5204_v43 = vcombine.high %v397_v38, %v401_v39  ;;  %v489_v38 = vld [vmem:[#allocation6 + $0x7a8] sm:$0xff] }
 0x1b5   :  { %1924 = vmatprep.subr.bf16.mxu1 %v5132_v44  ;;  %4521 = vmatpush1.bf16.msra.mxu0 %v5803_v33  ;;  %v5809_v44 = vld [vmem:[#allocation9 + $0x210] ss:$24 sps:$4 sm:$0xff]   ;;  %v477_v33 = vld [vmem:[#allocation6 + $0x748] sm:$0xff] }
 0x1b6   :  { %4522 = vmatprep.subr.bf16.mxu0 %v5808_v37  ;;  %v485_v37 = vld [vmem:[#allocation6 + $0x788] sm:$0xff] }
 0x1b8   :  { %1925 = vmatpush1.bf16.msra.mxu1 %v5131_v48  ;;  %v5212_v48 = vcombine.high %v405_v46, %v409_v47  ;;  %v247_v47 = vld [vmem:[#allocation6 + $0x18] sm:$0xff] }
 0x1b9   :  { %1926 = vmatprep.subr.bf16.mxu1 %v5140_v50  ;;  %4523 = vmatpush1.bf16.msra.mxu0 %v5806_v36  ;;  %v5812_v50 = vld [vmem:[#allocation9 + $0x240] ss:$24 sps:$4 sm:$0xff]  }
 0x1ba   :  { %4524 = vmatprep.subr.bf16.mxu0 %v5811_v45  ;;  %v5291_v45 = vcombine.low %v485_v37, %v489_v38 }
 0x1bc   :  { %1927 = vmatpush1.bf16.msra.mxu1 %v5139_v55  ;;  %v5220_v55 = vcombine.high %v413_v52, %v417_v53  ;;  %v259_v52 = vld [vmem:[#allocation6 + $0x78] sm:$0xff] }
 0x1bd   :  { %1928 = vmatprep.subr.bf16.mxu1 %v5148_v56  ;;  %4525 = vmatpush1.bf16.msra.mxu0 %v5809_v44  ;;  %v5815_v56 = vld [vmem:[#allocation9 + $0x270] ss:$24 sps:$4 sm:$0xff]   ;;  %v497_v44 = vld [vmem:[#allocation6 + $0x7e8] sm:$0xff] }
 0x1be   :  { %4526 = vmatprep.subr.bf16.mxu0 %v5814_v51  ;;  %v255_v51 = vld [vmem:[#allocation6 + $0x58] sm:$0xff] }
 0x1c0   :  { %1929 = vmatpush1.bf16.msra.mxu1 %v5147_v61  ;;  %v5228_v61 = vcombine.high %v421_v58, %v425_v59  ;;  %v271_v59 = vld [vmem:[#allocation6 + $0xd8] sm:$0xff] }
 0x1c1   :  { %1930 = vmatprep.subr.bf16.mxu1 %v5156_v62  ;;  %4527 = vmatpush1.bf16.msra.mxu0 %v5812_v50  ;;  %v5820_v62 = vld [vmem:[#allocation9 + $0x2a4] ss:$24 sps:$4 sm:$0xff]  }
 0x1c2   :  { %4528 = vmatprep.subr.bf16.mxu0 %v5817_v28  ;;  %v5063_v28 = vcombine.low %v255_v51, %v259_v52 }
 0x1c4   :  { %1931 = vmatpush1.bf16.msra.mxu1 %v5155_v3  ;;  %v5236_v3 = vcombine.high %v429_v63, %v433_v0  ;;  %v279_v63 = vld [vmem:[#allocation6 + $0x118] sm:$0xff] }
 0x1c5   :  { %1932 = vmatprep.subr.bf16.mxu1 %v5164_v4  ;;  %4529 = vmatpush1.bf16.msra.mxu0 %v5815_v56  ;;  %v5823_v4 = vld [vmem:[#allocation9 + $0x2d4] ss:$24 sps:$4 sm:$0xff]  }
 0x1c6   :  { %4530 = vmatprep.subr.bf16.mxu0 %v5820_v62  ;;  %v267_v56 = vld [vmem:[#allocation6 + $0xb8] sm:$0xff] }
 0x1c7   :  { %v283_v0 = vld [vmem:[#allocation6 + $0x138] sm:$0xff] }
 0x1c8   :  { %1933 = vmatpush1.bf16.msra.mxu1 %v5163_v9  ;;  %v5244_v9 = vcombine.high %v437_v5, %v441_v6  ;;  %v5087_v5 = vcombine.low %v279_v63, %v283_v0  ;;  %v295_v6 = vld [vmem:[#allocation6 + $0x198] sm:$0xff] }
 0x1c9   :  { %1934 = vmatprep.subr.bf16.mxu1 %v5172_v10  ;;  %4531 = vmatpush1.bf16.msra.mxu0 %v5818_v1  ;;  %v445_v10 = vld [vmem:[#allocation6 + $0x648] sm:$0xff] }
 0x1ca   :  { %4532 = vmatprep.subr.bf16.mxu0 %v5823_v4  ;;  %v5252_v13 = vcombine.high %v445_v10, %v449_v11  ;;  %v291_v4 = vld [vmem:[#allocation6 + $0x178] sm:$0xff] }
 0x1cc   :  { %1935 = vmatpush1.bf16.msra.mxu1 %v5171_v20  ;;  %v457_v20 = vld [vmem:[#allocation6 + $0x6a8] sm:$0xff] }
 0x1cd   :  { %1945 = vmatprep.subr.bf16.mxu1 %v5180_v21  ;;  %4533 = vmatpush1.bf16.msra.mxu0 %v5821_v7  ;;  %v5251_v21 = vcombine.low %v445_v10, %v449_v11  ;;  %v5260_v22 = vcombine.high %v453_v14, %v457_v20  ;;  %v5259_v26 = vcombine.low %v453_v14, %v457_v20  ;;  %v299_v7 = vld [vmem:[#allocation6 + $0x1b8] sm:$0xff] }
 0x1ce   :  { %v303_v10 = vld [vmem:[#allocation6 + $0x1d8] sm:$0xff] }
 0x1cf   :  { %1937 = vmatmul.mubr.bf16.vlgmr.msra.gmra.mrb[8].mxu1 %v6659_v42  ;;  %v307_v11 = vld [vmem:[#allocation6 + $0x1f8] sm:$0xff] }
 0x1d0   :  { %1946 = vmatpush1.bf16.msra.mxu1 %v5179_v27  ;;  %1977 = vmatprep.mubr.bf16.mxu1 %v6663_v49  ;;  %v5268_v27 = vcombine.high %v461_v23, %v465_v25  ;;  %v311_v14 = vld [vmem:[#allocation6 + $0x218] sm:$0xff] }
 0x1d1   :  { %1947 = vmatprep.subr.bf16.mxu1 %v5188_v29  ;;  %v469_v29 = vld [vmem:[#allocation6 + $0x708] sm:$0xff]  ;;  %v315_v20 = vld [vmem:[#allocation6 + $0x238] sm:$0xff] }
 0x1d2   :  { %v5276_v32 = vcombine.high %v469_v29, %v473_v30  ;;  %v5120_v23 = vcombine.high %v311_v14, %v315_v20  ;;  %v319_v25 = vld [vmem:[#allocation6 + $0x258] sm:$0xff] }
 0x1d4   :  { %1948 = vmatpush1.bf16.msra.mxu1 %v5187_v34  ;;  %v481_v34 = vld [vmem:[#allocation6 + $0x768] sm:$0xff] }
 0x1d5   :  { %1949 = vmatprep.subr.bf16.mxu1 %v5196_v35  ;;  %v5275_v35 = vcombine.low %v469_v29, %v473_v30  ;;  %v5284_v36 = vcombine.high %v477_v33, %v481_v34  ;;  %v5283_v39 = vcombine.low %v477_v33, %v481_v34  ;;  %v327_v30 = vld [vmem:[#allocation6 + $0x298] sm:$0xff] }
 0x1d6   :  { %v335_v34 = vld [vmem:[#allocation6 + $0x2d8] sm:$0xff] }
 0x1d8   :  { %1950 = vmatpush1.bf16.msra.mxu1 %v5195_v41  ;;  %v5292_v41 = vcombine.high %v485_v37, %v489_v38  ;;  %v343_v38 = vld [vmem:[#allocation6 + $0x318] sm:$0xff] }
 0x1d9   :  { %1951 = vmatprep.subr.bf16.mxu1 %v5204_v43  ;;  %v493_v43 = vld [vmem:[#allocation6 + $0x7c8] sm:$0xff] }
 0x1da   :  { %v5300_v46 = vcombine.high %v493_v43, %v497_v44 }
 0x1dc   :  { %1952 = vmatpush1.bf16.msra.mxu1 %v5203_v17  ;;  %v251_v17 = vld [vmem:[#allocation6 + $0x38] sm:$0xff] }
 0x1dd   :  { %1953 = vmatprep.subr.bf16.mxu1 %v5212_v48  ;;  %v5299_v48 = vcombine.low %v493_v43, %v497_v44  ;;  %v5056_v50 = vcombine.high %v247_v47, %v251_v17  ;;  %v5055_v53 = vcombine.low %v247_v47, %v251_v17  ;;  %v351_v44 = vld [vmem:[#allocation6 + $0x358] sm:$0xff] }
 0x1de   :  { %v359_v17 = vld [vmem:[#allocation6 + $0x398] sm:$0xff] }
 0x1e0   :  { %1954 = vmatpush1.bf16.msra.mxu1 %v5211_v54  ;;  %v5064_v54 = vcombine.high %v255_v51, %v259_v52  ;;  %v367_v52 = vld [vmem:[#allocation6 + $0x3d8] sm:$0xff] }
 0x1e1   :  { %1955 = vmatprep.subr.bf16.mxu1 %v5220_v55  ;;  %v263_v55 = vld [vmem:[#allocation6 + $0x98] sm:$0xff] }
 0x1e2   :  { %v5072_v58 = vcombine.high %v263_v55, %v267_v56 }
 0x1e4   :  { %1956 = vmatpush1.bf16.msra.mxu1 %v5219_v60  ;;  %v275_v60 = vld [vmem:[#allocation6 + $0xf8] sm:$0xff] }
 0x1e5   :  { %1957 = vmatprep.subr.bf16.mxu1 %v5228_v61  ;;  %v5071_v61 = vcombine.low %v263_v55, %v267_v56  ;;  %v5080_v62 = vcombine.high %v271_v59, %v275_v60  ;;  %v5079_v1 = vcombine.low %v271_v59, %v275_v60  ;;  %v375_v56 = vld [vmem:[#allocation6 + $0x418] sm:$0xff] }
 0x1e6   :  { %v383_v60 = vld [vmem:[#allocation6 + $0x458] sm:$0xff] }
 0x1e8   :  { %1958 = vmatpush1.bf16.msra.mxu1 %v5227_v2  ;;  %v5088_v2 = vcombine.high %v279_v63, %v283_v0  ;;  %v391_v0 = vld [vmem:[#allocation6 + $0x498] sm:$0xff] }
 0x1e9   :  { %1959 = vmatprep.subr.bf16.mxu1 %v5236_v3  ;;  %v287_v3 = vld [vmem:[#allocation6 + $0x158] sm:$0xff] }
 0x1ec   :  { %1960 = vmatpush1.bf16.msra.mxu1 %v5235_v8  ;;  %v5095_v8 = vcombine.low %v287_v3, %v291_v4 }
 0x1ed   :  { %1961 = vmatprep.subr.bf16.mxu1 %v5244_v9  ;;  %v5104_v9 = vcombine.high %v295_v6, %v299_v7 }
 0x1f0   :  { %1962 = vmatpush1.bf16.msra.mxu1 %v5243_v12  ;;  %v5103_v12 = vcombine.low %v295_v6, %v299_v7  ;;  %v407_v7 = vld [vmem:[#allocation6 + $0x518] sm:$0xff] }
 0x1f1   :  { %1963 = vmatprep.subr.bf16.mxu1 %v5252_v13  ;;  %v5112_v13 = vcombine.high %v303_v10, %v307_v11 }
 0x1f4   :  { %1964 = vmatpush1.bf16.msra.mxu1 %v5251_v21  ;;  %v5111_v21 = vcombine.low %v303_v10, %v307_v11  ;;  %v415_v11 = vld [vmem:[#allocation6 + $0x558] sm:$0xff] }
 0x1f5   :  { %1965 = vmatprep.subr.bf16.mxu1 %v5260_v22  ;;  %v5847_v22 = vld [vmem:[#allocation9 + $0x304] ss:$24 sps:$4 sm:$0xff]  }
 0x1f6   :  { %4543 = vmatprep.subr.bf16.mxu0 %v5847_v22 }
 0x1f8   :  { %1966 = vmatpush1.bf16.msra.mxu1 %v5259_v26  ;;  %v323_v26 = vld [vmem:[#allocation6 + $0x278] sm:$0xff] }
 0x1f9   :  { %1967 = vmatprep.subr.bf16.mxu1 %v5268_v27  ;;  %v5119_v27 = vcombine.low %v311_v14, %v315_v20  ;;  %v5128_v29 = vcombine.high %v319_v25, %v323_v26  ;;  %v423_v14 = vld [vmem:[#allocation6 + $0x598] sm:$0xff] }
 0x1fa   :  { %v427_v20 = vld [vmem:[#allocation6 + $0x5b8] sm:$0xff] }
 0x1fc   :  { %1968 = vmatpush1.bf16.msra.mxu1 %v5267_v31  ;;  %v331_v31 = vld [vmem:[#allocation6 + $0x2b8] sm:$0xff] }
 0x1fd   :  { %1969 = vmatprep.subr.bf16.mxu1 %v5276_v32  ;;  %v5127_v32 = vcombine.low %v319_v25, %v323_v26  ;;  %v5136_v33 = vcombine.high %v327_v30, %v331_v31  ;;  %v5232_v25 = vcombine.high %v423_v14, %v427_v20 }
 0x200   :  { %1970 = vmatpush1.bf16.msra.mxu1 %v5275_v35  ;;  %v339_v35 = vld [vmem:[#allocation6 + $0x2f8] sm:$0xff] }
 0x201   :  { %1971 = vmatprep.subr.bf16.mxu1 %v5284_v36  ;;  %v5135_v36 = vcombine.low %v327_v30, %v331_v31  ;;  %v5144_v37 = vcombine.high %v335_v34, %v339_v35  ;;  %v435_v30 = vld [vmem:[#allocation6 + $0x5f8] sm:$0xff] }
 0x204   :  { %1972 = vmatpush1.bf16.msra.mxu1 %v5283_v39  ;;  %v347_v39 = vld [vmem:[#allocation6 + $0x338] sm:$0xff] }
 0x205   :  { %1973 = vmatprep.subr.bf16.mxu1 %v5292_v41  ;;  %v5143_v41 = vcombine.low %v335_v34, %v339_v35  ;;  %v5152_v43 = vcombine.high %v343_v38, %v347_v39 }
 0x208   :  { %1974 = vmatpush1.bf16.msra.mxu1 %v5291_v45  ;;  %v355_v45 = vld [vmem:[#allocation6 + $0x378] sm:$0xff] }
 0x209   :  { %1975 = vmatprep.subr.bf16.mxu1 %v5300_v46  ;;  %v5151_v46 = vcombine.low %v343_v38, %v347_v39  ;;  %v5160_v47 = vcombine.high %v351_v44, %v355_v45 }
 0x20c   :  { %1976 = vmatpush1.bf16.msra.mxu1 %v5299_v48  ;;  %v363_v48 = vld [vmem:[#allocation6 + $0x3b8] sm:$0xff] }
 0x20d   :  { %2068 = vmatprep.subr.bf16.mxu1 %v5056_v50  ;;  %v5159_v50 = vcombine.low %v351_v44, %v355_v45  ;;  %v5168_v51 = vcombine.high %v359_v17, %v363_v48  ;;  %v439_v45 = vld [vmem:[#allocation6 + $0x618] sm:$0xff] }
 0x20f   :  { %1978 = vmatmul.mubr.bf16.vlgmr.msra.gmra.mrb[8].mxu1 %v6675_v57 }
 0x210   :  { %2069 = vmatpush1.bf16.msra.mxu1 %v5055_v53  ;;  %2100 = vmatprep.mubr.bf16.mxu1 %v6657_v40  ;;  %v5096_v40 = vcombine.high %v287_v3, %v291_v4  ;;  %v371_v53 = vld [vmem:[#allocation6 + $0x3f8] sm:$0xff] }
 0x211   :  { %2070 = vmatprep.subr.bf16.mxu1 %v5064_v54  ;;  %v5167_v54 = vcombine.low %v359_v17, %v363_v48  ;;  %v5176_v55 = vcombine.high %v367_v52, %v371_v53  ;;  %v399_v4 = vld [vmem:[#allocation6 + $0x4d8] sm:$0xff]  ;;  %v5845_v48 = vld [vmem:[#allocation9 + $0x300] ss:$24 sps:$4 sm:$0xff]  }
 0x214   :  { %2071 = vmatpush1.bf16.msra.mxu1 %v5063_v28  ;;  %v379_v28 = vld [vmem:[#allocation6 + $0x438] sm:$0xff] }
 0x215   :  { %2072 = vmatprep.subr.bf16.mxu1 %v5072_v58  ;;  %v5175_v58 = vcombine.low %v367_v52, %v371_v53  ;;  %v5184_v59 = vcombine.high %v375_v56, %v379_v28  ;;  %v5853_v52 = vld [vmem:[#allocation9 + $0x334] ss:$24 sps:$4 sm:$0xff]  }
 0x216   :  { %v447_v53 = vld [vmem:[#allocation6 + $0x658] sm:$0xff] }
 0x218   :  { %2073 = vmatpush1.bf16.msra.mxu1 %v5071_v61  ;;  %v387_v61 = vld [vmem:[#allocation6 + $0x478] sm:$0xff] }
 0x219   :  { %2074 = vmatprep.subr.bf16.mxu1 %v5080_v62  ;;  %v5183_v62 = vcombine.low %v375_v56, %v379_v28  ;;  %v5192_v63 = vcombine.high %v383_v60, %v387_v61  ;;  %v5851_v56 = vld [vmem:[#allocation9 + $0x330] ss:$24 sps:$4 sm:$0xff]  }
 0x21c   :  { %2075 = vmatpush1.bf16.msra.mxu1 %v5079_v1  ;;  %v395_v1 = vld [vmem:[#allocation6 + $0x4b8] sm:$0xff] }
 0x21d   :  { %2076 = vmatprep.subr.bf16.mxu1 %v5088_v2  ;;  %v5191_v2 = vcombine.low %v383_v60, %v387_v61  ;;  %v5200_v3 = vcombine.high %v391_v0, %v395_v1  ;;  %v459_v60 = vld [vmem:[#allocation6 + $0x6b8] sm:$0xff] }
 0x220   :  { %2077 = vmatpush1.bf16.msra.mxu1 %v5087_v5  ;;  %v403_v5 = vld [vmem:[#allocation6 + $0x4f8] sm:$0xff] }
 0x221   :  { %2078 = vmatprep.subr.bf16.mxu1 %v5096_v40  ;;  %v5199_v40 = vcombine.low %v391_v0, %v395_v1  ;;  %v5208_v6 = vcombine.high %v399_v4, %v403_v5  ;;  %v5865_v0 = vld [vmem:[#allocation9 + $0x394] ss:$24 sps:$4 sm:$0xff]  }
 0x222   :  { %v463_v1 = vld [vmem:[#allocation6 + $0x6d8] sm:$0xff] }
 0x224   :  { %2079 = vmatpush1.bf16.msra.mxu1 %v5095_v8  ;;  %v411_v8 = vld [vmem:[#allocation6 + $0x538] sm:$0xff] }
 0x225   :  { %2080 = vmatprep.subr.bf16.mxu1 %v5104_v9  ;;  %v5207_v9 = vcombine.low %v399_v4, %v403_v5  ;;  %v5216_v10 = vcombine.high %v407_v7, %v411_v8  ;;  %v5863_v4 = vld [vmem:[#allocation9 + $0x390] ss:$24 sps:$4 sm:$0xff]  }
 0x228   :  { %2081 = vmatpush1.bf16.msra.mxu1 %v5103_v12  ;;  %v5215_v12 = vcombine.low %v407_v7, %v411_v8  ;;  %v475_v7 = vld [vmem:[#allocation6 + $0x738] sm:$0xff] }
 0x229   :  { %2082 = vmatprep.subr.bf16.mxu1 %v5112_v13 }
 0x22c   :  { %2083 = vmatpush1.bf16.msra.mxu1 %v5111_v21 }
 0x22d   :  { %2084 = vmatprep.subr.bf16.mxu1 %v5120_v23 }
 0x230   :  { %2085 = vmatpush1.bf16.msra.mxu1 %v5119_v27 }
 0x231   :  { %2086 = vmatprep.subr.bf16.mxu1 %v5128_v29  ;;  %v431_v29 = vld [vmem:[#allocation6 + $0x5d8] sm:$0xff] }
 0x232   :  { %v5239_v17 = vcombine.low %v431_v29, %v435_v30 }
 0x234   :  { %2087 = vmatpush1.bf16.msra.mxu1 %v5127_v32 }
 0x235   :  { %2088 = vmatprep.subr.bf16.mxu1 %v5136_v33 }
 0x238   :  { %2089 = vmatpush1.bf16.msra.mxu1 %v5135_v36 }
 0x239   :  { %2090 = vmatprep.subr.bf16.mxu1 %v5144_v37  ;;  %v5231_v37 = vcombine.low %v423_v14, %v427_v20  ;;  %v5875_v14 = vld [vmem:[#allocation9 + $0x3f0] ss:$24 sps:$4 sm:$0xff]  }
 0x23c   :  { %2091 = vmatpush1.bf16.msra.mxu1 %v5143_v41 }
 0x23d   :  { %2092 = vmatprep.subr.bf16.mxu1 %v5152_v43  ;;  %v5240_v43 = vcombine.high %v431_v29, %v435_v30  ;;  %v5889_v30 = vld [vmem:[#allocation9 + $0x454] ss:$24 sps:$4 sm:$0xff]  }
 0x240   :  { %2093 = vmatpush1.bf16.msra.mxu1 %v5151_v46  ;;  %v443_v46 = vld [vmem:[#allocation6 + $0x638] sm:$0xff] }
 0x241   :  { %2094 = vmatprep.subr.bf16.mxu1 %v5160_v47 }
 0x244   :  { %2095 = vmatpush1.bf16.msra.mxu1 %v5159_v50 }
 0x245   :  { %2096 = vmatprep.subr.bf16.mxu1 %v5168_v51  ;;  %v5248_v51 = vcombine.high %v439_v45, %v443_v46 }
 0x248   :  { %2097 = vmatpush1.bf16.msra.mxu1 %v5167_v54  ;;  %v451_v54 = vld [vmem:[#allocation6 + $0x678] sm:$0xff] }
 0x249   :  { %2098 = vmatprep.subr.bf16.mxu1 %v5176_v55  ;;  %v5247_v55 = vcombine.low %v439_v45, %v443_v46  ;;  %v5256_v28 = vcombine.high %v447_v53, %v451_v54  ;;  %v5255_v61 = vcombine.low %v447_v53, %v451_v54  ;;  %v5829_v45 = vld [vmem:[#allocation9 + $0x3c] ss:$24 sps:$4 sm:$0xff]   ;;  %v5899_v46 = vld [vmem:[#allocation9 + $0x4b0] ss:$24 sps:$4 sm:$0xff]  }
 0x24a   :  { %v5913_v53 = vld [vmem:[#allocation9 + $0x514] ss:$24 sps:$4 sm:$0xff]   ;;  %v5830_v54 = vld [vmem:[#allocation9 + $0x68] ss:$24 sps:$4 sm:$0xff]  }
 0x24c   :  { %2099 = vmatpush1.bf16.msra.mxu1 %v5175_v58  ;;  %v5859_v58 = vld [vmem:[#allocation9 + $0x364] ss:$24 sps:$4 sm:$0xff]  }
 0x24d   :  { %2109 = vmatprep.subr.bf16.mxu1 %v5184_v59  ;;  %v455_v59 = vld [vmem:[#allocation6 + $0x698] sm:$0xff] }
 0x24f   :  { %2101 = vmatmul.mubr.bf16.vlgmr.msra.gmra.mrb[12].mxu1 %v6659_v42  ;;  %v419_v42 = vld [vmem:[#allocation6 + $0x578] sm:$0xff] }
 0x250   :  { %2110 = vmatpush1.bf16.msra.mxu1 %v5183_v62  ;;  %2141 = vmatprep.mubr.bf16.mxu1 %v6663_v49  ;;  %v6686_v49 = vld [vmem:[#allocation7] sm:$0xff]  ;;  %v5224_v13 = vcombine.high %v415_v11, %v419_v42  ;;  %v5223_v23 = vcombine.low %v415_v11, %v419_v42  ;;  %v5877_v11 = vld [vmem:[#allocation9 + $0x3f4] ss:$24 sps:$4 sm:$0xff]  }
 0x251   :  { %2111 = vmatprep.subr.bf16.mxu1 %v5192_v63  ;;  %v505_v21 = vrot.slane %v6686_v49, %v6639_v16  ;;  %v509_v22 = vrot.slane %v6686_v49, %v6644_v18  ;;  %v5857_v62 = vld [vmem:[#allocation9 + $0x360] ss:$24 sps:$4 sm:$0xff]   ;;  %v5264_v63 = vcombine.high %v455_v59, %v459_v60  ;;  %v479_v42 = vld [vmem:[#allocation6 + $0x758] sm:$0xff] }
 0x254   :  { %2112 = vmatpush1.bf16.msra.mxu1 %v5191_v2  ;;  %v467_v2 = vld [vmem:[#allocation6 + $0x6f8] sm:$0xff] }
 0x255   :  { %2113 = vmatprep.subr.bf16.mxu1 %v5200_v3  ;;  %v5263_v3 = vcombine.low %v455_v59, %v459_v60  ;;  %v5272_v5 = vcombine.high %v463_v1, %v467_v2  ;;  %v5271_v8 = vcombine.low %v463_v1, %v467_v2  ;;  %v5917_v59 = vld [vmem:[#allocation9 + $0x540] ss:$24 sps:$4 sm:$0xff]   ;;  %v5925_v60 = vld [vmem:[#allocation9 + $0x574] ss:$24 sps:$4 sm:$0xff]  }
 0x256   :  { %v5839_v1 = vld [vmem:[#allocation9 + $0xf8] ss:$24 sps:$4 sm:$0xff]   ;;  %v5844_v2 = vld [vmem:[#allocation9 + $0x12c] ss:$24 sps:$4 sm:$0xff]  }
 0x258   :  { %2114 = vmatpush1.bf16.msra.mxu1 %v5199_v40  ;;  %v5871_v40 = vld [vmem:[#allocation9 + $0x3c4] ss:$24 sps:$4 sm:$0xff]  }
 0x259   :  { %2115 = vmatprep.subr.bf16.mxu1 %v5208_v6  ;;  %v471_v6 = vld [vmem:[#allocation6 + $0x718] sm:$0xff] }
 0x25c   :  { %2116 = vmatpush1.bf16.msra.mxu1 %v5207_v9  ;;  %v5869_v9 = vld [vmem:[#allocation9 + $0x3c0] ss:$24 sps:$4 sm:$0xff]  }
 0x25d   :  { %2117 = vmatprep.subr.bf16.mxu1 %v5216_v10  ;;  %v5280_v10 = vcombine.high %v471_v6, %v475_v7 }
 0x260   :  { %2118 = vmatpush1.bf16.msra.mxu1 %v5215_v12  ;;  %v483_v12 = vld [vmem:[#allocation6 + $0x778] sm:$0xff] }
 0x261   :  { %2119 = vmatprep.subr.bf16.mxu1 %v5224_v13  ;;  %v5279_v13 = vcombine.low %v471_v6, %v475_v7  ;;  %v5288_v20 = vcombine.high %v479_v42, %v483_v12  ;;  %v5935_v6 = vld [vmem:[#allocation9 + $0x5d0] ss:$24 sps:$4 sm:$0xff]   ;;  %v5943_v7 = vld [vmem:[#allocation9 + $0x604] ss:$24 sps:$4 sm:$0xff]  }
 0x262   :  { %v1897_v26 = vpop.f32.mrb[4].mxu1  ;;  %v6692_v27 = vpop.f32.mrb[4].mxu0 }
 0x263   :  { %v5690_v31 = vadd.f32 %v1897_v26, %v505_v21  ;;  %v1899_v32 = vpop.f32.mrb[5].mxu1  ;;  %v6694_v33 = vpop.f32.mrb[5].mxu0  ;;  %v5883_v21 = vld [vmem:[#allocation9 + $0x424] ss:$24 sps:$4 sm:$0xff]   ;;  %v5881_v26 = vld [vmem:[#allocation9 + $0x420] ss:$24 sps:$4 sm:$0xff]  }
 0x264   :  { %v5691_v34 = vadd.f32 %v1899_v32, %v509_v22  ;;  %v1901_v35 = vpop.f32.mrb[6].mxu1  ;;  %v2065_v36 = vpop.f32.mrb[6].mxu0  ;;  %2120 = vmatpush1.bf16.msra.mxu1 %v5223_v23  ;;  %v487_v22 = vld [vmem:[#allocation6 + $0x798] sm:$0xff] }
 0x265   :  { %v2150_v38 = vmax.f32 %v5690_v31, 0.0  ;;  %v1902_v39 = vpop.f32.mrb[7].mxu1  ;;  %v2066_v41 = vpop.f32.mrb[7].mxu0  ;;  %2121 = vmatprep.subr.bf16.mxu1 %v5232_v25  ;;  %v491_v23 = vld [vmem:[#allocation6 + $0x7b8] sm:$0xff]  ;;  %v5287_v25 = vcombine.low %v479_v42, %v483_v12  ;;  %v5868_v12 = vld [vmem:[#allocation9 + $0x1ec] ss:$24 sps:$4 sm:$0xff]  }
 0x266   :  { %v2151_v44 = vmax.f32 %v5691_v34, 0.0  ;;  %v5296_v29 = vcombine.high %v487_v22, %v491_v23  ;;  %v495_v31 = vld [vmem:[#allocation6 + $0x7d8] sm:$0xff]  ;;  %v5295_v34 = vcombine.low %v487_v22, %v491_v23  ;;  %v5893_v39 = vld [vmem:[#allocation9 + $0x480] ss:$24 sps:$4 sm:$0xff]   ;;  %v5826_v41 = vld [vmem:[#allocation9 + $0xc] ss:$24 sps:$4 sm:$0xff]  }
 0x267   :  { %v6698_v50 = vpack.c.bf16 %v2150_v38, %v2150_v38  ;;  %v499_v32 = vld [vmem:[#allocation6 + $0x7f8] sm:$0xff]  ;;  %v5878_v22 = vld [vmem:[#allocation9 + $0x248] ss:$24 sps:$4 sm:$0xff]  }
 0x268   :  { %v6696_v47 = vpack.c.bf16 %v2151_v44, %v2151_v44  ;;  %2122 = vmatpush1.bf16.msra.mxu1 %v5231_v37  ;;  %v5887_v35 = vld [vmem:[#allocation9 + $0x450] ss:$24 sps:$4 sm:$0xff]   ;;  %v5304_v36 = vcombine.high %v495_v31, %v499_v32  ;;  %v5895_v37 = vld [vmem:[#allocation9 + $0x484] ss:$24 sps:$4 sm:$0xff]   ;;  %v5303_v38 = vcombine.low %v495_v31, %v499_v32 }
 0x269   :  { %2123 = vmatprep.subr.bf16.mxu1 %v5240_v43  ;;  %v5901_v43 = vld [vmem:[#allocation9 + $0x4b4] ss:$24 sps:$4 sm:$0xff]   ;;  %v5824_v44 = vld [vmem:[#allocation9 + $0x8] ss:$24 sps:$4 sm:$0xff]   ;;  %v5860_v42 = vld [vmem:[#allocation9 + $0x1b8] ss:$24 sps:$4 sm:$0xff]  }
 0x26a   :  { %4534 = vmatprep.mubr.bf16.mxu0 %v6696_v47  ;;  %v5886_v23 = vld [vmem:[#allocation9 + $0x27c] ss:$24 sps:$4 sm:$0xff]   ;;  %v5896_v31 = vld [vmem:[#allocation9 + $0x2d8] ss:$24 sps:$4 sm:$0xff]   ;;  %v5904_v32 = vld [vmem:[#allocation9 + $0x30c] ss:$24 sps:$4 sm:$0xff]  }
 0x26b   :  { %4535 = vmatmul.mubr.bf16.vlgmr.msra.gmra.mrb[8].mxu0 %v6698_v50 }
 0x26c   :  { %2124 = vmatpush1.bf16.msra.mxu1 %v5239_v17  ;;  %4544 = vmatpush1.bf16.msra.mxu0 %v5845_v48  ;;  %v5907_v17 = vld [vmem:[#allocation9 + $0x4e4] ss:$24 sps:$4 sm:$0xff]   ;;  %v5827_v48 = vld [vmem:[#allocation9 + $0x38] ss:$24 sps:$4 sm:$0xff]  }
 0x26d   :  { %2125 = vmatprep.subr.bf16.mxu1 %v5248_v51  ;;  %4545 = vmatprep.subr.bf16.mxu0 %v5853_v52  ;;  %v5832_v51 = vld [vmem:[#allocation9 + $0x6c] ss:$24 sps:$4 sm:$0xff]   ;;  %v5905_v52 = vld [vmem:[#allocation9 + $0x4e0] ss:$24 sps:$4 sm:$0xff]  }
 0x270   :  { %2126 = vmatpush1.bf16.msra.mxu1 %v5247_v55  ;;  %4546 = vmatpush1.bf16.msra.mxu0 %v5851_v56  ;;  %v5835_v55 = vld [vmem:[#allocation9 + $0x9c] ss:$24 sps:$4 sm:$0xff]   ;;  %v5911_v56 = vld [vmem:[#allocation9 + $0x510] ss:$24 sps:$4 sm:$0xff]  }
 0x271   :  { %2127 = vmatprep.subr.bf16.mxu1 %v5256_v28  ;;  %4547 = vmatprep.subr.bf16.mxu0 %v5859_v58  ;;  %v5919_v28 = vld [vmem:[#allocation9 + $0x544] ss:$24 sps:$4 sm:$0xff]  }
 0x272   :  { %v5838_v58 = vld [vmem:[#allocation9 + $0xcc] ss:$24 sps:$4 sm:$0xff]  }
 0x274   :  { %2128 = vmatpush1.bf16.msra.mxu1 %v5255_v61  ;;  %4548 = vmatpush1.bf16.msra.mxu0 %v5857_v62  ;;  %v5836_v61 = vld [vmem:[#allocation9 + $0xc8] ss:$24 sps:$4 sm:$0xff]   ;;  %v5841_v62 = vld [vmem:[#allocation9 + $0xfc] ss:$24 sps:$4 sm:$0xff]  }
 0x275   :  { %2129 = vmatprep.subr.bf16.mxu1 %v5264_v63  ;;  %4549 = vmatprep.subr.bf16.mxu0 %v5865_v0  ;;  %v5923_v63 = vld [vmem:[#allocation9 + $0x570] ss:$24 sps:$4 sm:$0xff]   ;;  %v5931_v0 = vld [vmem:[#allocation9 + $0x5a4] ss:$24 sps:$4 sm:$0xff]  }
 0x278   :  { %2130 = vmatpush1.bf16.msra.mxu1 %v5263_v3  ;;  %4550 = vmatpush1.bf16.msra.mxu0 %v5863_v4  ;;  %v5929_v3 = vld [vmem:[#allocation9 + $0x5a0] ss:$24 sps:$4 sm:$0xff]   ;;  %v5937_v4 = vld [vmem:[#allocation9 + $0x5d4] ss:$24 sps:$4 sm:$0xff]  }
 0x279   :  { %2131 = vmatprep.subr.bf16.mxu1 %v5272_v5  ;;  %4551 = vmatprep.subr.bf16.mxu0 %v5871_v40  ;;  %v5842_v5 = vld [vmem:[#allocation9 + $0x128] ss:$24 sps:$4 sm:$0xff]   ;;  %v5850_v40 = vld [vmem:[#allocation9 + $0x15c] ss:$24 sps:$4 sm:$0xff]  }
 0x27c   :  { %2132 = vmatpush1.bf16.msra.mxu1 %v5271_v8  ;;  %4552 = vmatpush1.bf16.msra.mxu0 %v5869_v9  ;;  %v5848_v8 = vld [vmem:[#allocation9 + $0x158] ss:$24 sps:$4 sm:$0xff]   ;;  %v5856_v9 = vld [vmem:[#allocation9 + $0x18c] ss:$24 sps:$4 sm:$0xff]  }
 0x27d   :  { %2133 = vmatprep.subr.bf16.mxu1 %v5280_v10  ;;  %4553 = vmatprep.subr.bf16.mxu0 %v5877_v11  ;;  %v5854_v10 = vld [vmem:[#allocation9 + $0x188] ss:$24 sps:$4 sm:$0xff]   ;;  %v5862_v11 = vld [vmem:[#allocation9 + $0x1bc] ss:$24 sps:$4 sm:$0xff]  }
 0x280   :  { %2134 = vmatpush1.bf16.msra.mxu1 %v5279_v13  ;;  %4554 = vmatpush1.bf16.msra.mxu0 %v5875_v14  ;;  %v5866_v13 = vld [vmem:[#allocation9 + $0x1e8] ss:$24 sps:$4 sm:$0xff]   ;;  %v5874_v14 = vld [vmem:[#allocation9 + $0x21c] ss:$24 sps:$4 sm:$0xff]  }
 0x281   :  { %2135 = vmatprep.subr.bf16.mxu1 %v5288_v20  ;;  %4555 = vmatprep.subr.bf16.mxu0 %v5883_v21  ;;  %v5872_v20 = vld [vmem:[#allocation9 + $0x218] ss:$24 sps:$4 sm:$0xff]   ;;  %v5880_v21 = vld [vmem:[#allocation9 + $0x24c] ss:$24 sps:$4 sm:$0xff]  }
 0x284   :  { %2136 = vmatpush1.bf16.msra.mxu1 %v5287_v25  ;;  %4556 = vmatpush1.bf16.msra.mxu0 %v5881_v26  ;;  %v5884_v25 = vld [vmem:[#allocation9 + $0x278] ss:$24 sps:$4 sm:$0xff]   ;;  %v5892_v26 = vld [vmem:[#allocation9 + $0x2ac] ss:$24 sps:$4 sm:$0xff]  }
 0x285   :  { %2137 = vmatprep.subr.bf16.mxu1 %v5296_v29  ;;  %4557 = vmatprep.subr.bf16.mxu0 %v5889_v30  ;;  %v5890_v29 = vld [vmem:[#allocation9 + $0x2a8] ss:$24 sps:$4 sm:$0xff]   ;;  %v5898_v30 = vld [vmem:[#allocation9 + $0x2dc] ss:$24 sps:$4 sm:$0xff]  }
 0x288   :  { %2138 = vmatpush1.bf16.msra.mxu1 %v5295_v34  ;;  %4558 = vmatpush1.bf16.msra.mxu0 %v5887_v35  ;;  %v5902_v34 = vld [vmem:[#allocation9 + $0x308] ss:$24 sps:$4 sm:$0xff]   ;;  %v5910_v35 = vld [vmem:[#allocation9 + $0x33c] ss:$24 sps:$4 sm:$0xff]  }
 0x289   :  { %2139 = vmatprep.subr.bf16.mxu1 %v5304_v36  ;;  %4559 = vmatprep.subr.bf16.mxu0 %v5895_v37  ;;  %v5908_v36 = vld [vmem:[#allocation9 + $0x338] ss:$24 sps:$4 sm:$0xff]   ;;  %v5916_v37 = vld [vmem:[#allocation9 + $0x36c] ss:$24 sps:$4 sm:$0xff]  }
 0x28c   :  { %2140 = vmatpush1.bf16.msra.mxu1 %v5303_v38  ;;  %4560 = vmatpush1.bf16.msra.mxu0 %v5893_v39  ;;  %v5914_v38 = vld [vmem:[#allocation9 + $0x368] ss:$24 sps:$4 sm:$0xff]   ;;  %v5922_v39 = vld [vmem:[#allocation9 + $0x39c] ss:$24 sps:$4 sm:$0xff]  }
 0x28d   :  { %4666 = vmatprep.subr.bf16.mxu1 %v5826_v41  ;;  %4561 = vmatprep.subr.bf16.mxu0 %v5901_v43  ;;  %v5920_v41 = vld [vmem:[#allocation9 + $0x398] ss:$24 sps:$4 sm:$0xff]   ;;  %v5928_v43 = vld [vmem:[#allocation9 + $0x3cc] ss:$24 sps:$4 sm:$0xff]  }
 0x28f   :  { %2142 = vmatmul.mubr.bf16.vlgmr.msra.gmra.mrb[12].mxu1 %v6675_v57  ;;  %v5833_v57 = vld [vmem:[#allocation9 + $0x98] ss:$24 sps:$4 sm:$0xff]  }
 0x290   :  { %4667 = vmatpush1.bf16.msra.mxu1 %v5824_v44  ;;  %4698 = vmatprep.mubr.bf16.mxu1 %v6696_v47  ;;  %v524_v44 = vsub.s32 5, %v6636_v15 }
 0x291   :  { %4668 = vmatprep.subr.bf16.mxu1 %v5829_v45  ;;  %4562 = vmatpush1.bf16.msra.mxu0 %v5899_v46  ;;  %v5926_v45 = vld [vmem:[#allocation9 + $0x3c8] ss:$24 sps:$4 sm:$0xff]   ;;  %v5934_v46 = vld [vmem:[#allocation9 + $0x3fc] ss:$24 sps:$4 sm:$0xff]  }
 0x292   :  { %4563 = vmatprep.subr.bf16.mxu0 %v5907_v17  ;;  %v525_v17 = vrot.slane %v6686_v49, %v524_v44 }
 0x294   :  { %4669 = vmatpush1.bf16.msra.mxu1 %v5827_v48  ;;  %v513_v48 = vrot.slane %v6686_v49, %v6670_v24 }
 0x295   :  { %4670 = vmatprep.subr.bf16.mxu1 %v5832_v51  ;;  %4564 = vmatpush1.bf16.msra.mxu0 %v5905_v52  ;;  %v517_v51 = vrot.slane %v6686_v49, %v6647_v19  ;;  %v5932_v52 = vld [vmem:[#allocation9 + $0x3f8] ss:$24 sps:$4 sm:$0xff]  }
 0x296   :  { %4565 = vmatprep.subr.bf16.mxu0 %v5913_v53  ;;  %v5940_v53 = vld [vmem:[#allocation9 + $0x42c] ss:$24 sps:$4 sm:$0xff]  }
 0x298   :  { %4671 = vmatpush1.bf16.msra.mxu1 %v5830_v54  ;;  %v5695_v54 = vadd.f32 %v6694_v33, %v525_v17  ;;  %v5944_v33 = vld [vmem:[#allocation9 + $0x458] ss:$24 sps:$4 sm:$0xff]   ;;  %v5997_v17 = vld [vmem:[#allocation9 + $0x7b4] ss:$24 sps:$4 sm:$0xff]  }
 0x299   :  { %4672 = vmatprep.subr.bf16.mxu1 %v5835_v55  ;;  %4566 = vmatpush1.bf16.msra.mxu0 %v5911_v56 }
 0x29a   :  { %4567 = vmatprep.subr.bf16.mxu0 %v5919_v28 }
 0x29c   :  { %4673 = vmatpush1.bf16.msra.mxu1 %v5833_v57 }
 0x29d   :  { %4674 = vmatprep.subr.bf16.mxu1 %v5838_v58  ;;  %4568 = vmatpush1.bf16.msra.mxu0 %v5917_v59  ;;  %v5938_v59 = vld [vmem:[#allocation9 + $0x428] ss:$24 sps:$4 sm:$0xff]  }
 0x29e   :  { %4569 = vmatprep.subr.bf16.mxu0 %v5925_v60 }
 0x2a0   :  { %4675 = vmatpush1.bf16.msra.mxu1 %v5836_v61 }
 0x2a1   :  { %4676 = vmatprep.subr.bf16.mxu1 %v5841_v62  ;;  %4570 = vmatpush1.bf16.msra.mxu0 %v5923_v63  ;;  %v5946_v62 = vld [vmem:[#allocation9 + $0x45c] ss:$24 sps:$4 sm:$0xff]   ;;  %v2155_v63 = vmax.f32 %v5695_v54, 0.0 }
 0x2a2   :  { %4571 = vmatprep.subr.bf16.mxu0 %v5931_v0  ;;  %v6006_v54 = vld [vmem:[#allocation9 + $0x63c] ss:$24 sps:$4 sm:$0xff]  }
 0x2a4   :  { %4677 = vmatpush1.bf16.msra.mxu1 %v5839_v1 }
 0x2a5   :  { %4678 = vmatprep.subr.bf16.mxu1 %v5844_v2  ;;  %4572 = vmatpush1.bf16.msra.mxu0 %v5929_v3  ;;  %v5941_v2 = vld [vmem:[#allocation9 + $0x600] ss:$24 sps:$4 sm:$0xff]  }
 0x2a6   :  { %4573 = vmatprep.subr.bf16.mxu0 %v5937_v4  ;;  %v5949_v4 = vld [vmem:[#allocation9 + $0x634] ss:$24 sps:$4 sm:$0xff]  }
 0x2a8   :  { %4679 = vmatpush1.bf16.msra.mxu1 %v5842_v5  ;;  %v6718_v5 = vpack.c.bf16 %v2155_v63, %v2155_v63  ;;  %v520_v63 = vsub.s32 4, %v6636_v15 }
 0x2a9   :  { %4680 = vmatprep.subr.bf16.mxu1 %v5850_v40  ;;  %4574 = vmatpush1.bf16.msra.mxu0 %v5935_v6  ;;  %v5952_v40 = vld [vmem:[#allocation9 + $0x48c] ss:$24 sps:$4 sm:$0xff]   ;;  %v5947_v6 = vld [vmem:[#allocation9 + $0x630] ss:$24 sps:$4 sm:$0xff]  }
 0x2aa   :  { %4584 = vmatprep.subr.bf16.mxu0 %v5943_v7  ;;  %v5950_v7 = vld [vmem:[#allocation9 + $0x488] ss:$24 sps:$4 sm:$0xff]  }
 0x2ac   :  { %4681 = vmatpush1.bf16.msra.mxu1 %v5848_v8  ;;  %v5955_v8 = vld [vmem:[#allocation9 + $0x664] ss:$24 sps:$4 sm:$0xff]  }
 0x2ad   :  { %4682 = vmatprep.subr.bf16.mxu1 %v5856_v9  ;;  %v5958_v9 = vld [vmem:[#allocation9 + $0x4bc] ss:$24 sps:$4 sm:$0xff]  }
 0x2b0   :  { %4683 = vmatpush1.bf16.msra.mxu1 %v5854_v10  ;;  %v5953_v10 = vld [vmem:[#allocation9 + $0x660] ss:$24 sps:$4 sm:$0xff]  }
 0x2b1   :  { %4684 = vmatprep.subr.bf16.mxu1 %v5862_v11  ;;  %v5956_v11 = vld [vmem:[#allocation9 + $0x4b8] ss:$24 sps:$4 sm:$0xff]  }
 0x2b4   :  { %4685 = vmatpush1.bf16.msra.mxu1 %v5860_v42  ;;  %v5961_v42 = vld [vmem:[#allocation9 + $0x694] ss:$24 sps:$4 sm:$0xff]  }
 0x2b5   :  { %4686 = vmatprep.subr.bf16.mxu1 %v5868_v12  ;;  %v5964_v12 = vld [vmem:[#allocation9 + $0x4ec] ss:$24 sps:$4 sm:$0xff]  }
 0x2b8   :  { %4687 = vmatpush1.bf16.msra.mxu1 %v5866_v13  ;;  %v5959_v13 = vld [vmem:[#allocation9 + $0x690] ss:$24 sps:$4 sm:$0xff]  }
 0x2b9   :  { %4688 = vmatprep.subr.bf16.mxu1 %v5874_v14  ;;  %v5962_v14 = vld [vmem:[#allocation9 + $0x4e8] ss:$24 sps:$4 sm:$0xff]  }
 0x2bc   :  { %4689 = vmatpush1.bf16.msra.mxu1 %v5872_v20  ;;  %v5967_v20 = vld [vmem:[#allocation9 + $0x6c4] ss:$24 sps:$4 sm:$0xff]  }
 0x2bd   :  { %4690 = vmatprep.subr.bf16.mxu1 %v5880_v21  ;;  %v5970_v21 = vld [vmem:[#allocation9 + $0x51c] ss:$24 sps:$4 sm:$0xff]  }
 0x2c0   :  { %4691 = vmatpush1.bf16.msra.mxu1 %v5878_v22  ;;  %v5965_v22 = vld [vmem:[#allocation9 + $0x6c0] ss:$24 sps:$4 sm:$0xff]  }
 0x2c1   :  { %4692 = vmatprep.subr.bf16.mxu1 %v5886_v23  ;;  %v5968_v23 = vld [vmem:[#allocation9 + $0x518] ss:$24 sps:$4 sm:$0xff]  }
 0x2c4   :  { %4693 = vmatpush1.bf16.msra.mxu1 %v5884_v25  ;;  %v5973_v25 = vld [vmem:[#allocation9 + $0x6f4] ss:$24 sps:$4 sm:$0xff]  }
 0x2c5   :  { %4694 = vmatprep.subr.bf16.mxu1 %v5892_v26  ;;  %v5976_v26 = vld [vmem:[#allocation9 + $0x54c] ss:$24 sps:$4 sm:$0xff]  }
 0x2c8   :  { %4695 = vmatpush1.bf16.msra.mxu1 %v5890_v29  ;;  %v5971_v29 = vld [vmem:[#allocation9 + $0x6f0] ss:$24 sps:$4 sm:$0xff]  }
 0x2c9   :  { %4696 = vmatprep.subr.bf16.mxu1 %v5898_v30  ;;  %v5974_v30 = vld [vmem:[#allocation9 + $0x548] ss:$24 sps:$4 sm:$0xff]  }
 0x2cc   :  { %4697 = vmatpush1.bf16.msra.mxu1 %v5896_v31  ;;  %v5979_v31 = vld [vmem:[#allocation9 + $0x724] ss:$24 sps:$4 sm:$0xff]  }
 0x2cd   :  { %4707 = vmatprep.subr.bf16.mxu1 %v5904_v32  ;;  %v5982_v32 = vld [vmem:[#allocation9 + $0x57c] ss:$24 sps:$4 sm:$0xff]  }
 0x2cf   :  { %4699 = vmatmul.mubr.bf16.vlgmr.msra.gmra.mrb[16].mxu1 %v6698_v50 }
 0x2d0   :  { %4708 = vmatpush1.bf16.msra.mxu1 %v5902_v34  ;;  %v5977_v34 = vld [vmem:[#allocation9 + $0x720] ss:$24 sps:$4 sm:$0xff]  }
 0x2d1   :  { %4709 = vmatprep.subr.bf16.mxu1 %v5910_v35  ;;  %v5980_v35 = vld [vmem:[#allocation9 + $0x578] ss:$24 sps:$4 sm:$0xff]  }
 0x2d4   :  { %4710 = vmatpush1.bf16.msra.mxu1 %v5908_v36  ;;  %v5985_v36 = vld [vmem:[#allocation9 + $0x754] ss:$24 sps:$4 sm:$0xff]  }
 0x2d5   :  { %4711 = vmatprep.subr.bf16.mxu1 %v5916_v37  ;;  %v5988_v37 = vld [vmem:[#allocation9 + $0x5ac] ss:$24 sps:$4 sm:$0xff]  }
 0x2d8   :  { %4712 = vmatpush1.bf16.msra.mxu1 %v5914_v38  ;;  %v5983_v38 = vld [vmem:[#allocation9 + $0x750] ss:$24 sps:$4 sm:$0xff]  }
 0x2d9   :  { %4713 = vmatprep.subr.bf16.mxu1 %v5922_v39  ;;  %v5986_v39 = vld [vmem:[#allocation9 + $0x5a8] ss:$24 sps:$4 sm:$0xff]  }
 0x2dc   :  { %4714 = vmatpush1.bf16.msra.mxu1 %v5920_v41  ;;  %v5991_v41 = vld [vmem:[#allocation9 + $0x784] ss:$24 sps:$4 sm:$0xff]  }
 0x2dd   :  { %4715 = vmatprep.subr.bf16.mxu1 %v5928_v43  ;;  %v5994_v43 = vld [vmem:[#allocation9 + $0x5dc] ss:$24 sps:$4 sm:$0xff]  }
 0x2e0   :  { %4716 = vmatpush1.bf16.msra.mxu1 %v5926_v45  ;;  %v5989_v45 = vld [vmem:[#allocation9 + $0x780] ss:$24 sps:$4 sm:$0xff]  }
 0x2e1   :  { %4717 = vmatprep.subr.bf16.mxu1 %v5934_v46  ;;  %v5992_v46 = vld [vmem:[#allocation9 + $0x5d8] ss:$24 sps:$4 sm:$0xff]  }
 0x2e2   :  { %v1979_v55 = vpop.f32.mrb[8].mxu1 }
 0x2e3   :  { %v5692_v56 = vadd.f32 %v1979_v55, %v513_v48  ;;  %v1981_v28 = vpop.f32.mrb[9].mxu1  ;;  %v6000_v48 = vld [vmem:[#allocation9 + $0x60c] ss:$24 sps:$4 sm:$0xff]   ;;  %v6001_v55 = vld [vmem:[#allocation9 + $0x7e0] ss:$24 sps:$4 sm:$0xff]  }
 0x2e4   :  { %v5693_v57 = vadd.f32 %v1981_v28, %v517_v51  ;;  %v1983_v58 = vpop.f32.mrb[10].mxu1  ;;  %4718 = vmatpush1.bf16.msra.mxu1 %v5932_v52  ;;  %v5995_v51 = vld [vmem:[#allocation9 + $0x7b0] ss:$24 sps:$4 sm:$0xff]   ;;  %v6009_v28 = vld [vmem:[#allocation9 + $0x814] ss:$24 sps:$4 sm:$0xff]  }
 0x2e5   :  { %v2152_v60 = vmax.f32 %v5692_v56, 0.0  ;;  %v1984_v61 = vpop.f32.mrb[11].mxu1  ;;  %4719 = vmatprep.subr.bf16.mxu1 %v5940_v53  ;;  %v5998_v52 = vld [vmem:[#allocation9 + $0x608] ss:$24 sps:$4 sm:$0xff]   ;;  %v6003_v53 = vld [vmem:[#allocation9 + $0x7e4] ss:$24 sps:$4 sm:$0xff]  }
 0x2e6   :  { %v2153_v0 = vmax.f32 %v5693_v57, 0.0  ;;  %v6004_v56 = vld [vmem:[#allocation9 + $0x638] ss:$24 sps:$4 sm:$0xff]   ;;  %v6012_v57 = vld [vmem:[#allocation9 + $0x66c] ss:$24 sps:$4 sm:$0xff]  }
 0x2e7   :  { %v6716_v3 = vpack.c.bf16 %v2152_v60, %v2152_v60  ;;  %v6007_v58 = vld [vmem:[#allocation9 + $0x810] ss:$24 sps:$4 sm:$0xff]   ;;  %v6015_v60 = vld [vmem:[#allocation9 + $0x844] ss:$24 sps:$4 sm:$0xff]  }
 0x2e8   :  { %v6714_v1 = vpack.c.bf16 %v2153_v0, %v2153_v0  ;;  %4720 = vmatpush1.bf16.msra.mxu1 %v5938_v59  ;;  %v6010_v59 = vld [vmem:[#allocation9 + $0x668] ss:$24 sps:$4 sm:$0xff]   ;;  %v6018_v61 = vld [vmem:[#allocation9 + $0x69c] ss:$24 sps:$4 sm:$0xff]   ;;  %v6016_v0 = vld [vmem:[#allocation9 + $0x698] ss:$24 sps:$4 sm:$0xff]  }
 0x2e9   :  { %4721 = vmatprep.subr.bf16.mxu1 %v5946_v62  ;;  %v6013_v62 = vld [vmem:[#allocation9 + $0x840] ss:$24 sps:$4 sm:$0xff]  }
 0x2ea   :  { %4575 = vmatprep.mubr.bf16.mxu0 %v6714_v1  ;;  %4739 = vmatprep.mubr.bf16.mxu1 %v6714_v1 }
 0x2eb   :  { %4576 = vmatmul.mubr.bf16.vlgmr.msra.gmra.mrb[8].mxu0 %v6716_v3 }
 0x2ec   :  { %4585 = vmatpush1.bf16.msra.mxu0 %v5941_v2  ;;  %4616 = vmatprep.mubr.bf16.mxu0 %v6718_v5  ;;  %v6021_v2 = vld [vmem:[#allocation9 + $0x874] ss:$24 sps:$4 sm:$0xff]  }
 0x2ed   :  { %4722 = vmatpush1.bf16.msra.mxu1 %v5944_v33  ;;  %4586 = vmatprep.subr.bf16.mxu0 %v5949_v4  ;;  %v6024_v33 = vld [vmem:[#allocation9 + $0x6cc] ss:$24 sps:$4 sm:$0xff]   ;;  %v6019_v4 = vld [vmem:[#allocation9 + $0x870] ss:$24 sps:$4 sm:$0xff]  }
 0x2ee   :  { %4723 = vmatprep.subr.bf16.mxu1 %v5952_v40  ;;  %v521_v40 = vrot.slane %v6686_v49, %v520_v63  ;;  %v6034_v49 = vld [vmem:[#allocation9 + $0x728] ss:$24 sps:$4 sm:$0xff]  }
 0x2f0   :  { %4587 = vmatpush1.bf16.msra.mxu0 %v5947_v6  ;;  %v6022_v6 = vld [vmem:[#allocation9 + $0x6c8] ss:$24 sps:$4 sm:$0xff]  }
 0x2f1   :  { %4724 = vmatpush1.bf16.msra.mxu1 %v5950_v7  ;;  %4588 = vmatprep.subr.bf16.mxu0 %v5955_v8  ;;  %v6027_v7 = vld [vmem:[#allocation9 + $0x8a4] ss:$24 sps:$4 sm:$0xff]  }
 0x2f2   :  { %4725 = vmatprep.subr.bf16.mxu1 %v5958_v9  ;;  %v6030_v8 = vld [vmem:[#allocation9 + $0x6fc] ss:$24 sps:$4 sm:$0xff]   ;;  %v6025_v9 = vld [vmem:[#allocation9 + $0x8a0] ss:$24 sps:$4 sm:$0xff]  }
 0x2f4   :  { %4589 = vmatpush1.bf16.msra.mxu0 %v5953_v10  ;;  %v5694_v10 = vadd.f32 %v6692_v27, %v521_v40  ;;  %v6040_v27 = vld [vmem:[#allocation9 + $0x758] ss:$24 sps:$4 sm:$0xff]   ;;  %v6094_v40 = vld [vmem:[#allocation9 + $0x908] ss:$24 sps:$4 sm:$0xff]  }
 0x2f5   :  { %4726 = vmatpush1.bf16.msra.mxu1 %v5956_v11  ;;  %4590 = vmatprep.subr.bf16.mxu0 %v5961_v42  ;;  %v6028_v11 = vld [vmem:[#allocation9 + $0x6f8] ss:$24 sps:$4 sm:$0xff]   ;;  %v6033_v42 = vld [vmem:[#allocation9 + $0x8d4] ss:$24 sps:$4 sm:$0xff]  }
 0x2f6   :  { %4727 = vmatprep.subr.bf16.mxu1 %v5964_v12  ;;  %v6036_v12 = vld [vmem:[#allocation9 + $0x72c] ss:$24 sps:$4 sm:$0xff]  }
 0x2f8   :  { %4591 = vmatpush1.bf16.msra.mxu0 %v5959_v13  ;;  %v6031_v13 = vld [vmem:[#allocation9 + $0x8d0] ss:$24 sps:$4 sm:$0xff]  }
 0x2f9   :  { %4728 = vmatpush1.bf16.msra.mxu1 %v5962_v14  ;;  %4592 = vmatprep.subr.bf16.mxu0 %v5967_v20  ;;  %v2154_v14 = vmax.f32 %v5694_v10, 0.0  ;;  %v6039_v20 = vld [vmem:[#allocation9 + $0x904] ss:$24 sps:$4 sm:$0xff]   ;;  %v6105_v10 = vld [vmem:[#allocation9 + $0xb14] ss:$24 sps:$4 sm:$0xff]  }
 0x2fa   :  { %4729 = vmatprep.subr.bf16.mxu1 %v5970_v21  ;;  %v6042_v21 = vld [vmem:[#allocation9 + $0x75c] ss:$24 sps:$4 sm:$0xff]  }
 0x2fc   :  { %4593 = vmatpush1.bf16.msra.mxu0 %v5965_v22  ;;  %v6037_v22 = vld [vmem:[#allocation9 + $0x900] ss:$24 sps:$4 sm:$0xff]  }
 0x2fd   :  { %4730 = vmatpush1.bf16.msra.mxu1 %v5968_v23  ;;  %4594 = vmatprep.subr.bf16.mxu0 %v5973_v25  ;;  %v6731_v23 = vpack.c.bf16 %v2154_v14, %v2154_v14  ;;  %v6045_v25 = vld [vmem:[#allocation9 + $0x934] ss:$24 sps:$4 sm:$0xff]  }
 0x2fe   :  { %4731 = vmatprep.subr.bf16.mxu1 %v5976_v26  ;;  %v6048_v26 = vld [vmem:[#allocation9 + $0x78c] ss:$24 sps:$4 sm:$0xff]   ;;  %v6114_v14 = vld [vmem:[#allocation9 + $0x99c] ss:$24 sps:$4 sm:$0xff]  }
 0x300   :  { %4595 = vmatpush1.bf16.msra.mxu0 %v5971_v29  ;;  %v6043_v29 = vld [vmem:[#allocation9 + $0x930] ss:$24 sps:$4 sm:$0xff]  }
 0x301   :  { %4732 = vmatpush1.bf16.msra.mxu1 %v5974_v30  ;;  %4596 = vmatprep.subr.bf16.mxu0 %v5979_v31  ;;  %v6046_v30 = vld [vmem:[#allocation9 + $0x788] ss:$24 sps:$4 sm:$0xff]   ;;  %v6051_v31 = vld [vmem:[#allocation9 + $0x964] ss:$24 sps:$4 sm:$0xff]  }
 0x302   :  { %4733 = vmatprep.subr.bf16.mxu1 %v5982_v32  ;;  %v6054_v32 = vld [vmem:[#allocation9 + $0x7bc] ss:$24 sps:$4 sm:$0xff]  }
 0x304   :  { %4597 = vmatpush1.bf16.msra.mxu0 %v5977_v34  ;;  %v6049_v34 = vld [vmem:[#allocation9 + $0x960] ss:$24 sps:$4 sm:$0xff]  }
 0x305   :  { %4734 = vmatpush1.bf16.msra.mxu1 %v5980_v35  ;;  %4598 = vmatprep.subr.bf16.mxu0 %v5985_v36  ;;  %v6052_v35 = vld [vmem:[#allocation9 + $0x7b8] ss:$24 sps:$4 sm:$0xff]   ;;  %v6057_v36 = vld [vmem:[#allocation9 + $0x994] ss:$24 sps:$4 sm:$0xff]  }
 0x306   :  { %4735 = vmatprep.subr.bf16.mxu1 %v5988_v37  ;;  %v6060_v37 = vld [vmem:[#allocation9 + $0x7ec] ss:$24 sps:$4 sm:$0xff]  }
 0x308   :  { %4599 = vmatpush1.bf16.msra.mxu0 %v5983_v38  ;;  %v6055_v38 = vld [vmem:[#allocation9 + $0x990] ss:$24 sps:$4 sm:$0xff]  }
 0x309   :  { %4736 = vmatpush1.bf16.msra.mxu1 %v5986_v39  ;;  %4600 = vmatprep.subr.bf16.mxu0 %v5991_v41  ;;  %v6058_v39 = vld [vmem:[#allocation9 + $0x7e8] ss:$24 sps:$4 sm:$0xff]   ;;  %v6063_v41 = vld [vmem:[#allocation9 + $0x9c4] ss:$24 sps:$4 sm:$0xff]  }
 0x30a   :  { %4737 = vmatprep.subr.bf16.mxu1 %v5994_v43  ;;  %v6066_v43 = vld [vmem:[#allocation9 + $0x81c] ss:$24 sps:$4 sm:$0xff]  }
 0x30c   :  { %4601 = vmatpush1.bf16.msra.mxu0 %v5989_v45  ;;  %v6061_v45 = vld [vmem:[#allocation9 + $0x9c0] ss:$24 sps:$4 sm:$0xff]  }
 0x30d   :  { %4738 = vmatpush1.bf16.msra.mxu1 %v5992_v46  ;;  %4602 = vmatprep.subr.bf16.mxu0 %v5997_v17  ;;  %v6064_v46 = vld [vmem:[#allocation9 + $0x818] ss:$24 sps:$4 sm:$0xff]   ;;  %v6069_v17 = vld [vmem:[#allocation9 + $0x9f4] ss:$24 sps:$4 sm:$0xff]  }
 0x30e   :  { %4748 = vmatprep.subr.bf16.mxu1 %v6000_v48  ;;  %v6072_v48 = vld [vmem:[#allocation9 + $0x84c] ss:$24 sps:$4 sm:$0xff]  }
 0x310   :  { %4603 = vmatpush1.bf16.msra.mxu0 %v5995_v51  ;;  %4740 = vmatmul.mubr.bf16.vlgmr.msra.gmra.mrb[16].mxu1 %v6716_v3  ;;  %v6067_v51 = vld [vmem:[#allocation9 + $0x9f0] ss:$24 sps:$4 sm:$0xff]  }
 0x311   :  { %4749 = vmatpush1.bf16.msra.mxu1 %v5998_v52  ;;  %4780 = vmatprep.mubr.bf16.mxu1 %v6718_v5  ;;  %v6070_v52 = vld [vmem:[#allocation9 + $0x848] ss:$24 sps:$4 sm:$0xff]  }
 0x312   :  { %4604 = vmatprep.subr.bf16.mxu0 %v6003_v53  ;;  %4750 = vmatprep.subr.bf16.mxu1 %v6006_v54  ;;  %v6075_v53 = vld [vmem:[#allocation9 + $0xa24] ss:$24 sps:$4 sm:$0xff]  }
 0x313   :  { %v6078_v54 = vld [vmem:[#allocation9 + $0x87c] ss:$24 sps:$4 sm:$0xff]  }
 0x314   :  { %4605 = vmatpush1.bf16.msra.mxu0 %v6001_v55  ;;  %v6073_v55 = vld [vmem:[#allocation9 + $0xa20] ss:$24 sps:$4 sm:$0xff]  }
 0x315   :  { %4751 = vmatpush1.bf16.msra.mxu1 %v6004_v56  ;;  %4606 = vmatprep.subr.bf16.mxu0 %v6009_v28  ;;  %v6076_v56 = vld [vmem:[#allocation9 + $0x878] ss:$24 sps:$4 sm:$0xff]   ;;  %v6081_v28 = vld [vmem:[#allocation9 + $0xa54] ss:$24 sps:$4 sm:$0xff]  }
 0x316   :  { %4752 = vmatprep.subr.bf16.mxu1 %v6012_v57  ;;  %v6084_v57 = vld [vmem:[#allocation9 + $0x8ac] ss:$24 sps:$4 sm:$0xff]  }
 0x318   :  { %4607 = vmatpush1.bf16.msra.mxu0 %v6007_v58  ;;  %v6079_v58 = vld [vmem:[#allocation9 + $0xa50] ss:$24 sps:$4 sm:$0xff]  }
 0x319   :  { %4753 = vmatpush1.bf16.msra.mxu1 %v6010_v59  ;;  %4608 = vmatprep.subr.bf16.mxu0 %v6015_v60  ;;  %v6082_v59 = vld [vmem:[#allocation9 + $0x8a8] ss:$24 sps:$4 sm:$0xff]   ;;  %v6087_v60 = vld [vmem:[#allocation9 + $0xa84] ss:$24 sps:$4 sm:$0xff]  }
 0x31a   :  { %4754 = vmatprep.subr.bf16.mxu1 %v6018_v61  ;;  %v6090_v61 = vld [vmem:[#allocation9 + $0x8dc] ss:$24 sps:$4 sm:$0xff]  }
 0x31c   :  { %4609 = vmatpush1.bf16.msra.mxu0 %v6013_v62  ;;  %v6085_v62 = vld [vmem:[#allocation9 + $0xa80] ss:$24 sps:$4 sm:$0xff]  }
 0x31d   :  { %4755 = vmatpush1.bf16.msra.mxu1 %v6016_v0  ;;  %4610 = vmatprep.subr.bf16.mxu0 %v6021_v2  ;;  %v6088_v0 = vld [vmem:[#allocation9 + $0x8d8] ss:$24 sps:$4 sm:$0xff]   ;;  %v6093_v2 = vld [vmem:[#allocation9 + $0xab4] ss:$24 sps:$4 sm:$0xff]  }
 0x31e   :  { %4756 = vmatprep.subr.bf16.mxu1 %v6024_v33  ;;  %v6096_v33 = vld [vmem:[#allocation9 + $0x90c] ss:$24 sps:$4 sm:$0xff]  }
 0x320   :  { %4611 = vmatpush1.bf16.msra.mxu0 %v6019_v4  ;;  %v6091_v4 = vld [vmem:[#allocation9 + $0xab0] ss:$24 sps:$4 sm:$0xff]  }
 0x321   :  { %4757 = vmatpush1.bf16.msra.mxu1 %v6022_v6  ;;  %4612 = vmatprep.subr.bf16.mxu0 %v6027_v7  ;;  %v6099_v6 = vld [vmem:[#allocation9 + $0xae4] ss:$24 sps:$4 sm:$0xff]  }
 0x322   :  { %4758 = vmatprep.subr.bf16.mxu1 %v6030_v8  ;;  %v6102_v7 = vld [vmem:[#allocation9 + $0x93c] ss:$24 sps:$4 sm:$0xff]   ;;  %v6097_v8 = vld [vmem:[#allocation9 + $0xae0] ss:$24 sps:$4 sm:$0xff]  }
 0x324   :  { %4613 = vmatpush1.bf16.msra.mxu0 %v6025_v9  ;;  %v6100_v9 = vld [vmem:[#allocation9 + $0x938] ss:$24 sps:$4 sm:$0xff]  }
 0x325   :  { %4759 = vmatpush1.bf16.msra.mxu1 %v6028_v11  ;;  %4614 = vmatprep.subr.bf16.mxu0 %v6033_v42  ;;  %v6108_v11 = vld [vmem:[#allocation9 + $0x96c] ss:$24 sps:$4 sm:$0xff]   ;;  %v6103_v42 = vld [vmem:[#allocation9 + $0xb10] ss:$24 sps:$4 sm:$0xff]  }
 0x326   :  { %4760 = vmatprep.subr.bf16.mxu1 %v6036_v12  ;;  %v6106_v12 = vld [vmem:[#allocation9 + $0x968] ss:$24 sps:$4 sm:$0xff]  }
 0x328   :  { %4615 = vmatpush1.bf16.msra.mxu0 %v6031_v13  ;;  %v6111_v13 = vld [vmem:[#allocation9 + $0xb44] ss:$24 sps:$4 sm:$0xff]  }
 0x329   :  { %4761 = vmatpush1.bf16.msra.mxu1 %v6034_v49  ;;  %4625 = vmatprep.subr.bf16.mxu0 %v6039_v20  ;;  %v6109_v49 = vld [vmem:[#allocation9 + $0xb40] ss:$24 sps:$4 sm:$0xff]  }
 0x32a   :  { %4762 = vmatprep.subr.bf16.mxu1 %v6042_v21  ;;  %v6112_v20 = vld [vmem:[#allocation9 + $0x998] ss:$24 sps:$4 sm:$0xff]   ;;  %v6117_v21 = vld [vmem:[#allocation9 + $0xb74] ss:$24 sps:$4 sm:$0xff]  }
 0x32b   :  { %4617 = vmatmul.mubr.bf16.vlgmr.msra.gmra.mrb[8].mxu0 %v6731_v23 }
 0x32c   :  { %4626 = vmatpush1.bf16.msra.mxu0 %v6037_v22  ;;  %v6120_v22 = vld [vmem:[#allocation9 + $0x9cc] ss:$24 sps:$4 sm:$0xff]  }
 0x32d   :  { %4763 = vmatpush1.bf16.msra.mxu1 %v6040_v27  ;;  %4627 = vmatprep.subr.bf16.mxu0 %v6045_v25  ;;  %v528_v27 = vsub.s32 6, %v6636_v15  ;;  %v6115_v25 = vld [vmem:[#allocation9 + $0xb70] ss:$24 sps:$4 sm:$0xff]  }
 0x32e   :  { %4764 = vmatprep.subr.bf16.mxu1 %v6048_v26  ;;  %v532_v26 = vsub.s32 7, %v6636_v15 }
 0x330   :  { %4628 = vmatpush1.bf16.msra.mxu0 %v6043_v29  ;;  %v6118_v29 = vld [vmem:[#allocation9 + $0x9c8] ss:$24 sps:$4 sm:$0xff]  }
 0x331   :  { %4765 = vmatpush1.bf16.msra.mxu1 %v6046_v30  ;;  %4629 = vmatprep.subr.bf16.mxu0 %v6051_v31  ;;  %v6123_v30 = vld [vmem:[#allocation9 + $0xba4] ss:$24 sps:$4 sm:$0xff]  }
 0x332   :  { %4766 = vmatprep.subr.bf16.mxu1 %v6054_v32  ;;  %v6126_v31 = vld [vmem:[#allocation9 + $0x9fc] ss:$24 sps:$4 sm:$0xff]  }
 0x333   :  { %v6364_v32 = vld [vmem:[#allocation7] sm:$0xff] }
 0x334   :  { %4630 = vmatpush1.bf16.msra.mxu0 %v6049_v34  ;;  %v529_v34 = vrot.slane %v6364_v32, %v528_v27  ;;  %v6172_v27 = vld [vmem:[#allocation9 + $0xb78] ss:$24 sps:$4 sm:$0xff]  }
 0x335   :  { %4767 = vmatpush1.bf16.msra.mxu1 %v6052_v35  ;;  %4631 = vmatprep.subr.bf16.mxu0 %v6057_v36  ;;  %v6121_v35 = vld [vmem:[#allocation9 + $0xba0] ss:$24 sps:$4 sm:$0xff]   ;;  %v533_v36 = vrot.slane %v6364_v32, %v532_v26  ;;  %v6180_v26 = vld [vmem:[#allocation9 + $0xbac] ss:$24 sps:$4 sm:$0xff]   ;;  %v6186_v32 = vld [vmem:[#allocation9 + $0xbdc] ss:$24 sps:$4 sm:$0xff]  }
 0x336   :  { %4768 = vmatprep.subr.bf16.mxu1 %v6060_v37  ;;  %v6124_v37 = vld [vmem:[#allocation9 + $0x9f8] ss:$24 sps:$4 sm:$0xff]  }
 0x338   :  { %4632 = vmatpush1.bf16.msra.mxu0 %v6055_v38  ;;  %v6129_v38 = vld [vmem:[#allocation9 + $0xbd4] ss:$24 sps:$4 sm:$0xff]  }
 0x339   :  { %4769 = vmatpush1.bf16.msra.mxu1 %v6058_v39  ;;  %4633 = vmatprep.subr.bf16.mxu0 %v6063_v41  ;;  %v6132_v41 = vld [vmem:[#allocation9 + $0xa2c] ss:$24 sps:$4 sm:$0xff]  }
 0x33a   :  { %4770 = vmatprep.subr.bf16.mxu1 %v6066_v43 }
 0x33c   :  { %4634 = vmatpush1.bf16.msra.mxu0 %v6061_v45 }
 0x33d   :  { %4771 = vmatpush1.bf16.msra.mxu1 %v6064_v46  ;;  %4635 = vmatprep.subr.bf16.mxu0 %v6069_v17 }
 0x33e   :  { %4772 = vmatprep.subr.bf16.mxu1 %v6072_v48  ;;  %v6127_v48 = vld [vmem:[#allocation9 + $0xbd0] ss:$24 sps:$4 sm:$0xff]  }
 0x340   :  { %4636 = vmatpush1.bf16.msra.mxu0 %v6067_v51 }
 0x341   :  { %4773 = vmatpush1.bf16.msra.mxu1 %v6070_v52  ;;  %4637 = vmatprep.subr.bf16.mxu0 %v6075_v53  ;;  %v6130_v53 = vld [vmem:[#allocation9 + $0xa28] ss:$24 sps:$4 sm:$0xff]  }
 0x342   :  { %4774 = vmatprep.subr.bf16.mxu1 %v6078_v54  ;;  %v6135_v54 = vld [vmem:[#allocation9 + $0x14] ss:$24 sps:$4 sm:$0xff]  }
 0x344   :  { %4638 = vmatpush1.bf16.msra.mxu0 %v6073_v55 }
 0x345   :  { %4775 = vmatpush1.bf16.msra.mxu1 %v6076_v56  ;;  %4639 = vmatprep.subr.bf16.mxu0 %v6081_v28  ;;  %v6138_v56 = vld [vmem:[#allocation9 + $0xa5c] ss:$24 sps:$4 sm:$0xff]  }
 0x346   :  { %4776 = vmatprep.subr.bf16.mxu1 %v6084_v57  ;;  %v6133_v57 = vld [vmem:[#allocation9 + $0x10] ss:$24 sps:$4 sm:$0xff]  }
 0x348   :  { %4640 = vmatpush1.bf16.msra.mxu0 %v6079_v58 }
 0x349   :  { %4777 = vmatpush1.bf16.msra.mxu1 %v6082_v59  ;;  %4641 = vmatprep.subr.bf16.mxu0 %v6087_v60  ;;  %v6136_v59 = vld [vmem:[#allocation9 + $0xa58] ss:$24 sps:$4 sm:$0xff]   ;;  %v6141_v60 = vld [vmem:[#allocation9 + $0x44] ss:$24 sps:$4 sm:$0xff]  }
 0x34a   :  { %4778 = vmatprep.subr.bf16.mxu1 %v6090_v61  ;;  %v6144_v61 = vld [vmem:[#allocation9 + $0xa8c] ss:$24 sps:$4 sm:$0xff]  }
 0x34c   :  { %4642 = vmatpush1.bf16.msra.mxu0 %v6085_v62  ;;  %v6139_v62 = vld [vmem:[#allocation9 + $0x40] ss:$24 sps:$4 sm:$0xff]  }
 0x34d   :  { %4779 = vmatpush1.bf16.msra.mxu1 %v6088_v0  ;;  %4643 = vmatprep.subr.bf16.mxu0 %v6093_v2  ;;  %v6142_v0 = vld [vmem:[#allocation9 + $0xa88] ss:$24 sps:$4 sm:$0xff]   ;;  %v6147_v2 = vld [vmem:[#allocation9 + $0x74] ss:$24 sps:$4 sm:$0xff]  }
 0x34e   :  { %4789 = vmatprep.subr.bf16.mxu1 %v6096_v33  ;;  %v6150_v33 = vld [vmem:[#allocation9 + $0xabc] ss:$24 sps:$4 sm:$0xff]  }
 0x350   :  { %4644 = vmatpush1.bf16.msra.mxu0 %v6091_v4  ;;  %4781 = vmatmul.mubr.bf16.vlgmr.msra.gmra.mrb[16].mxu1 %v6731_v23  ;;  %v6145_v4 = vld [vmem:[#allocation9 + $0x70] ss:$24 sps:$4 sm:$0xff]  }
 0x351   :  { %4790 = vmatpush1.bf16.msra.mxu1 %v6094_v40  ;;  %4645 = vmatprep.subr.bf16.mxu0 %v6099_v6  ;;  %v6148_v40 = vld [vmem:[#allocation9 + $0xab8] ss:$24 sps:$4 sm:$0xff]   ;;  %v6153_v6 = vld [vmem:[#allocation9 + $0xa4] ss:$24 sps:$4 sm:$0xff]  }
 0x352   :  { %4791 = vmatprep.subr.bf16.mxu1 %v6102_v7  ;;  %v6156_v7 = vld [vmem:[#allocation9 + $0xaec] ss:$24 sps:$4 sm:$0xff]  }
 0x354   :  { %4646 = vmatpush1.bf16.msra.mxu0 %v6097_v8  ;;  %v6151_v8 = vld [vmem:[#allocation9 + $0xa0] ss:$24 sps:$4 sm:$0xff]  }
 0x355   :  { %4792 = vmatpush1.bf16.msra.mxu1 %v6100_v9  ;;  %4647 = vmatprep.subr.bf16.mxu0 %v6105_v10  ;;  %v6159_v9 = vld [vmem:[#allocation9 + $0xd4] ss:$24 sps:$4 sm:$0xff]  }
 0x356   :  { %4793 = vmatprep.subr.bf16.mxu1 %v6108_v11  ;;  %v6162_v10 = vld [vmem:[#allocation9 + $0xb1c] ss:$24 sps:$4 sm:$0xff]   ;;  %v6157_v11 = vld [vmem:[#allocation9 + $0xd0] ss:$24 sps:$4 sm:$0xff]  }
 0x358   :  { %4648 = vmatpush1.bf16.msra.mxu0 %v6103_v42  ;;  %v6160_v42 = vld [vmem:[#allocation9 + $0xb18] ss:$24 sps:$4 sm:$0xff]  }
 0x359   :  { %4794 = vmatpush1.bf16.msra.mxu1 %v6106_v12  ;;  %4649 = vmatprep.subr.bf16.mxu0 %v6111_v13  ;;  %v6165_v12 = vld [vmem:[#allocation9 + $0x104] ss:$24 sps:$4 sm:$0xff]  }
 0x35a   :  { %4795 = vmatprep.subr.bf16.mxu1 %v6114_v14  ;;  %v6168_v13 = vld [vmem:[#allocation9 + $0xb4c] ss:$24 sps:$4 sm:$0xff]   ;;  %v6163_v14 = vld [vmem:[#allocation9 + $0x100] ss:$24 sps:$4 sm:$0xff]  }
 0x35c   :  { %4650 = vmatpush1.bf16.msra.mxu0 %v6109_v49  ;;  %v6166_v49 = vld [vmem:[#allocation9 + $0xb48] ss:$24 sps:$4 sm:$0xff]  }
 0x35d   :  { %4796 = vmatpush1.bf16.msra.mxu1 %v6112_v20  ;;  %4651 = vmatprep.subr.bf16.mxu0 %v6117_v21  ;;  %v6171_v20 = vld [vmem:[#allocation9 + $0x134] ss:$24 sps:$4 sm:$0xff]  }
 0x35e   :  { %4797 = vmatprep.subr.bf16.mxu1 %v6120_v22  ;;  %v6174_v21 = vld [vmem:[#allocation9 + $0xb7c] ss:$24 sps:$4 sm:$0xff]   ;;  %v6169_v22 = vld [vmem:[#allocation9 + $0x130] ss:$24 sps:$4 sm:$0xff]  }
 0x360   :  { %4652 = vmatpush1.bf16.msra.mxu0 %v6115_v25  ;;  %v6177_v25 = vld [vmem:[#allocation9 + $0x164] ss:$24 sps:$4 sm:$0xff]  }
 0x361   :  { %4798 = vmatpush1.bf16.msra.mxu1 %v6118_v29  ;;  %4653 = vmatprep.subr.bf16.mxu0 %v6123_v30  ;;  %v6175_v29 = vld [vmem:[#allocation9 + $0x160] ss:$24 sps:$4 sm:$0xff]  }
 0x362   :  { %v2143_v39 = vpop.f32.mrb[12].mxu1  ;;  %4799 = vmatprep.subr.bf16.mxu1 %v6126_v31  ;;  %v6178_v30 = vld [vmem:[#allocation9 + $0xba8] ss:$24 sps:$4 sm:$0xff]   ;;  %v6183_v31 = vld [vmem:[#allocation9 + $0x194] ss:$24 sps:$4 sm:$0xff]  }
 0x363   :  { %v5696_v43 = vadd.f32 %v2143_v39, %v529_v34  ;;  %v2145_v45 = vpop.f32.mrb[13].mxu1  ;;  %v6181_v34 = vld [vmem:[#allocation9 + $0x190] ss:$24 sps:$4 sm:$0xff]  }
 0x364   :  { %v5697_v46 = vadd.f32 %v2145_v45, %v533_v36  ;;  %4654 = vmatpush1.bf16.msra.mxu0 %v6121_v35  ;;  %v2147_v17 = vpop.f32.mrb[14].mxu1  ;;  %v6184_v35 = vld [vmem:[#allocation9 + $0xbd8] ss:$24 sps:$4 sm:$0xff]   ;;  %v6189_v36 = vld [vmem:[#allocation9 + $0x1c4] ss:$24 sps:$4 sm:$0xff]  }
 0x365   :  { %v2156_v51 = vmax.f32 %v5696_v43, 0.0  ;;  %4800 = vmatpush1.bf16.msra.mxu1 %v6124_v37  ;;  %v2148_v52 = vpop.f32.mrb[15].mxu1  ;;  %4655 = vmatprep.subr.bf16.mxu0 %v6129_v38  ;;  %v6187_v37 = vld [vmem:[#allocation9 + $0x1c0] ss:$24 sps:$4 sm:$0xff]   ;;  %v6192_v38 = vld [vmem:[#allocation9 + $0x1f4] ss:$24 sps:$4 sm:$0xff]  }
 0x366   :  { %v2157_v55 = vmax.f32 %v5697_v46, 0.0  ;;  %4801 = vmatprep.subr.bf16.mxu1 %v6132_v41  ;;  %v6190_v39 = vld [vmem:[#allocation9 + $0x1f0] ss:$24 sps:$4 sm:$0xff]   ;;  %v6195_v41 = vld [vmem:[#allocation9 + $0x224] ss:$24 sps:$4 sm:$0xff]  }
 0x367   :  { %v6739_v58 = vpack.c.bf16 %v2156_v51, %v2156_v51  ;;  %v6193_v43 = vld [vmem:[#allocation9 + $0x220] ss:$24 sps:$4 sm:$0xff]   ;;  %v6198_v45 = vld [vmem:[#allocation9 + $0x254] ss:$24 sps:$4 sm:$0xff]   ;;  %v6196_v46 = vld [vmem:[#allocation9 + $0x250] ss:$24 sps:$4 sm:$0xff]  }
 0x368   :  { %v6737_v28 = vpack.c.bf16 %v2157_v55, %v2157_v55  ;;  %4656 = vmatpush1.bf16.msra.mxu0 %v6127_v48  ;;  %v6201_v17 = vld [vmem:[#allocation9 + $0x284] ss:$24 sps:$4 sm:$0xff]   ;;  %v6199_v48 = vld [vmem:[#allocation9 + $0x280] ss:$24 sps:$4 sm:$0xff]   ;;  %v6204_v51 = vld [vmem:[#allocation9 + $0x2b4] ss:$24 sps:$4 sm:$0xff]  }
 0x369   :  { %4802 = vmatpush1.bf16.msra.mxu1 %v6130_v53  ;;  %4830 = vmatprep.subr.bf16.mxu0 %v6135_v54  ;;  %v6202_v52 = vld [vmem:[#allocation9 + $0x2b0] ss:$24 sps:$4 sm:$0xff]   ;;  %v6207_v53 = vld [vmem:[#allocation9 + $0x2e4] ss:$24 sps:$4 sm:$0xff]   ;;  %v6205_v54 = vld [vmem:[#allocation9 + $0x2e0] ss:$24 sps:$4 sm:$0xff]  }
 0x36a   :  { %4657 = vmatprep.mubr.bf16.mxu0 %v6737_v28  ;;  %4821 = vmatprep.mubr.bf16.mxu1 %v6737_v28  ;;  %v6210_v55 = vld [vmem:[#allocation9 + $0x314] ss:$24 sps:$4 sm:$0xff]  }
 0x36b   :  { %4658 = vmatmul.mubr.bf16.vlgmr.msra.gmra.mrb[8].mxu0 %v6739_v58  ;;  %4803 = vmatprep.subr.bf16.mxu1 %v6138_v56  ;;  %v6208_v56 = vld [vmem:[#allocation9 + $0x310] ss:$24 sps:$4 sm:$0xff]  }
 0x36c   :  { %4831 = vmatpush1.bf16.msra.mxu0 %v6133_v57  ;;  %4862 = vmatprep.mubr.bf16.mxu0 %v6696_v47  ;;  %v6154_v47 = vld [vmem:[#allocation9 + $0xae8] ss:$24 sps:$4 sm:$0xff]   ;;  %v6213_v57 = vld [vmem:[#allocation9 + $0x344] ss:$24 sps:$4 sm:$0xff]  }
 0x36d   :  { %4804 = vmatpush1.bf16.msra.mxu1 %v6136_v59  ;;  %4832 = vmatprep.subr.bf16.mxu0 %v6141_v60  ;;  %v6211_v59 = vld [vmem:[#allocation9 + $0x340] ss:$24 sps:$4 sm:$0xff]   ;;  %v6216_v60 = vld [vmem:[#allocation9 + $0x374] ss:$24 sps:$4 sm:$0xff]  }
 0x36e   :  { %4805 = vmatprep.subr.bf16.mxu1 %v6144_v61  ;;  %v6214_v61 = vld [vmem:[#allocation9 + $0x370] ss:$24 sps:$4 sm:$0xff]  }
 0x370   :  { %4833 = vmatpush1.bf16.msra.mxu0 %v6139_v62  ;;  %v6219_v62 = vld [vmem:[#allocation9 + $0x3a4] ss:$24 sps:$4 sm:$0xff]  }
 0x371   :  { %4806 = vmatpush1.bf16.msra.mxu1 %v6142_v0  ;;  %4834 = vmatprep.subr.bf16.mxu0 %v6147_v2  ;;  %v6217_v0 = vld [vmem:[#allocation9 + $0x3a0] ss:$24 sps:$4 sm:$0xff]   ;;  %v6222_v2 = vld [vmem:[#allocation9 + $0x3d4] ss:$24 sps:$4 sm:$0xff]  }
 0x372   :  { %4807 = vmatprep.subr.bf16.mxu1 %v6150_v33  ;;  %v6220_v33 = vld [vmem:[#allocation9 + $0x3d0] ss:$24 sps:$4 sm:$0xff]  }
 0x374   :  { %4835 = vmatpush1.bf16.msra.mxu0 %v6145_v4  ;;  %v6225_v4 = vld [vmem:[#allocation9 + $0x404] ss:$24 sps:$4 sm:$0xff]  }
 0x375   :  { %4808 = vmatpush1.bf16.msra.mxu1 %v6148_v40  ;;  %4836 = vmatprep.subr.bf16.mxu0 %v6153_v6  ;;  %v6228_v40 = vld [vmem:[#allocation9 + $0x434] ss:$24 sps:$4 sm:$0xff]   ;;  %v6231_v6 = vld [vmem:[#allocation9 + $0x464] ss:$24 sps:$4 sm:$0xff]  }
 0x376   :  { %4809 = vmatprep.subr.bf16.mxu1 %v6156_v7  ;;  %v6229_v7 = vld [vmem:[#allocation9 + $0x460] ss:$24 sps:$4 sm:$0xff]  }
 0x378   :  { %4837 = vmatpush1.bf16.msra.mxu0 %v6151_v8  ;;  %v6234_v8 = vld [vmem:[#allocation9 + $0x494] ss:$24 sps:$4 sm:$0xff]  }
 0x379   :  { %4810 = vmatpush1.bf16.msra.mxu1 %v6154_v47  ;;  %4838 = vmatprep.subr.bf16.mxu0 %v6159_v9  ;;  %v6232_v47 = vld [vmem:[#allocation9 + $0x490] ss:$24 sps:$4 sm:$0xff]   ;;  %v6237_v9 = vld [vmem:[#allocation9 + $0x4c4] ss:$24 sps:$4 sm:$0xff]  }
 0x37a   :  { %4811 = vmatprep.subr.bf16.mxu1 %v6162_v10  ;;  %v6235_v10 = vld [vmem:[#allocation9 + $0x4c0] ss:$24 sps:$4 sm:$0xff]  }
 0x37c   :  { %4839 = vmatpush1.bf16.msra.mxu0 %v6157_v11  ;;  %v6240_v11 = vld [vmem:[#allocation9 + $0x4f4] ss:$24 sps:$4 sm:$0xff]  }
 0x37d   :  { %4812 = vmatpush1.bf16.msra.mxu1 %v6160_v42  ;;  %4840 = vmatprep.subr.bf16.mxu0 %v6165_v12  ;;  %v6238_v42 = vld [vmem:[#allocation9 + $0x4f0] ss:$24 sps:$4 sm:$0xff]   ;;  %v6243_v12 = vld [vmem:[#allocation9 + $0x524] ss:$24 sps:$4 sm:$0xff]  }
 0x37e   :  { %4813 = vmatprep.subr.bf16.mxu1 %v6168_v13  ;;  %v6241_v13 = vld [vmem:[#allocation9 + $0x520] ss:$24 sps:$4 sm:$0xff]  }
 0x380   :  { %4841 = vmatpush1.bf16.msra.mxu0 %v6163_v14  ;;  %v6246_v14 = vld [vmem:[#allocation9 + $0x554] ss:$24 sps:$4 sm:$0xff]  }
 0x381   :  { %4814 = vmatpush1.bf16.msra.mxu1 %v6166_v49  ;;  %4842 = vmatprep.subr.bf16.mxu0 %v6171_v20  ;;  %v6244_v49 = vld [vmem:[#allocation9 + $0x550] ss:$24 sps:$4 sm:$0xff]   ;;  %v6249_v20 = vld [vmem:[#allocation9 + $0x584] ss:$24 sps:$4 sm:$0xff]  }
 0x382   :  { %4815 = vmatprep.subr.bf16.mxu1 %v6174_v21  ;;  %v6247_v21 = vld [vmem:[#allocation9 + $0x580] ss:$24 sps:$4 sm:$0xff]  }
 0x384   :  { %4843 = vmatpush1.bf16.msra.mxu0 %v6169_v22  ;;  %v6252_v22 = vld [vmem:[#allocation9 + $0x5b4] ss:$24 sps:$4 sm:$0xff]  }
 0x385   :  { %4816 = vmatpush1.bf16.msra.mxu1 %v6172_v27  ;;  %4844 = vmatprep.subr.bf16.mxu0 %v6177_v25  ;;  %v6250_v27 = vld [vmem:[#allocation9 + $0x5b0] ss:$24 sps:$4 sm:$0xff]   ;;  %v6255_v25 = vld [vmem:[#allocation9 + $0x5e4] ss:$24 sps:$4 sm:$0xff]  }
 0x386   :  { %4817 = vmatprep.subr.bf16.mxu1 %v6180_v26  ;;  %v6253_v26 = vld [vmem:[#allocation9 + $0x5e0] ss:$24 sps:$4 sm:$0xff]  }
 0x388   :  { %4845 = vmatpush1.bf16.msra.mxu0 %v6175_v29  ;;  %v6258_v29 = vld [vmem:[#allocation9 + $0x614] ss:$24 sps:$4 sm:$0xff]  }
 0x389   :  { %4818 = vmatpush1.bf16.msra.mxu1 %v6178_v30  ;;  %4846 = vmatprep.subr.bf16.mxu0 %v6183_v31  ;;  %v6256_v30 = vld [vmem:[#allocation9 + $0x610] ss:$24 sps:$4 sm:$0xff]   ;;  %v6261_v31 = vld [vmem:[#allocation9 + $0x644] ss:$24 sps:$4 sm:$0xff]  }
 0x38a   :  { %4819 = vmatprep.subr.bf16.mxu1 %v6186_v32  ;;  %v6259_v32 = vld [vmem:[#allocation9 + $0x640] ss:$24 sps:$4 sm:$0xff]  }
 0x38c   :  { %4847 = vmatpush1.bf16.msra.mxu0 %v6181_v34  ;;  %v6264_v34 = vld [vmem:[#allocation9 + $0x674] ss:$24 sps:$4 sm:$0xff]  }
 0x38d   :  { %4820 = vmatpush1.bf16.msra.mxu1 %v6184_v35  ;;  %4848 = vmatprep.subr.bf16.mxu0 %v6189_v36  ;;  %v6262_v35 = vld [vmem:[#allocation9 + $0x670] ss:$24 sps:$4 sm:$0xff]   ;;  %v6267_v36 = vld [vmem:[#allocation9 + $0x6a4] ss:$24 sps:$4 sm:$0xff]  }
 0x390   :  { %4822 = vmatmul.mubr.bf16.vlgmr.msra.gmra.mrb[16].mxu1 %v6739_v58  ;;  %4849 = vmatpush1.bf16.msra.mxu0 %v6187_v37  ;;  %v6265_v37 = vld [vmem:[#allocation9 + $0x6a0] ss:$24 sps:$4 sm:$0xff]  }
 0x391   :  { %4850 = vmatprep.subr.bf16.mxu0 %v6192_v38  ;;  %v6270_v38 = vld [vmem:[#allocation9 + $0x6d4] ss:$24 sps:$4 sm:$0xff]  }
 0x394   :  { %4851 = vmatpush1.bf16.msra.mxu0 %v6190_v39  ;;  %v6268_v39 = vld [vmem:[#allocation9 + $0x6d0] ss:$24 sps:$4 sm:$0xff]  }
 0x395   :  { %4852 = vmatprep.subr.bf16.mxu0 %v6195_v41  ;;  %v6273_v41 = vld [vmem:[#allocation9 + $0x704] ss:$24 sps:$4 sm:$0xff]  }
 0x398   :  { %4853 = vmatpush1.bf16.msra.mxu0 %v6193_v43  ;;  %v6276_v43 = vld [vmem:[#allocation9 + $0x734] ss:$24 sps:$4 sm:$0xff]  }
 0x399   :  { %4854 = vmatprep.subr.bf16.mxu0 %v6198_v45  ;;  %v6279_v45 = vld [vmem:[#allocation9 + $0x764] ss:$24 sps:$4 sm:$0xff]  }
 0x39c   :  { %4855 = vmatpush1.bf16.msra.mxu0 %v6196_v46  ;;  %v6277_v46 = vld [vmem:[#allocation9 + $0x760] ss:$24 sps:$4 sm:$0xff]  }
 0x39d   :  { %4856 = vmatprep.subr.bf16.mxu0 %v6201_v17  ;;  %v6282_v17 = vld [vmem:[#allocation9 + $0x794] ss:$24 sps:$4 sm:$0xff]  }
 0x3a0   :  { %4857 = vmatpush1.bf16.msra.mxu0 %v6199_v48  ;;  %v6280_v48 = vld [vmem:[#allocation9 + $0x790] ss:$24 sps:$4 sm:$0xff]  }
 0x3a1   :  { %4858 = vmatprep.subr.bf16.mxu0 %v6204_v51  ;;  %v6285_v51 = vld [vmem:[#allocation9 + $0x7c4] ss:$24 sps:$4 sm:$0xff]  }
 0x3a4   :  { %4859 = vmatpush1.bf16.msra.mxu0 %v6202_v52  ;;  %v6283_v52 = vld [vmem:[#allocation9 + $0x7c0] ss:$24 sps:$4 sm:$0xff]  }
 0x3a5   :  { %4860 = vmatprep.subr.bf16.mxu0 %v6207_v53  ;;  %v6288_v53 = vld [vmem:[#allocation9 + $0x7f4] ss:$24 sps:$4 sm:$0xff]  }
 0x3a8   :  { %4861 = vmatpush1.bf16.msra.mxu0 %v6205_v54  ;;  %v6286_v54 = vld [vmem:[#allocation9 + $0x7f0] ss:$24 sps:$4 sm:$0xff]  }
 0x3a9   :  { %4871 = vmatprep.subr.bf16.mxu0 %v6210_v55  ;;  %v6291_v55 = vld [vmem:[#allocation9 + $0x824] ss:$24 sps:$4 sm:$0xff]  }
 0x3ab   :  { %4863 = vmatmul.mubr.bf16.vlgmr.msra.gmra.mrb[12].mxu0 %v6698_v50  ;;  %v6223_v50 = vld [vmem:[#allocation9 + $0x400] ss:$24 sps:$4 sm:$0xff]  }
 0x3ac   :  { %4872 = vmatpush1.bf16.msra.mxu0 %v6208_v56  ;;  %4903 = vmatprep.mubr.bf16.mxu0 %v6714_v1  ;;  %v6226_v1 = vld [vmem:[#allocation9 + $0x430] ss:$24 sps:$4 sm:$0xff]   ;;  %v6289_v56 = vld [vmem:[#allocation9 + $0x820] ss:$24 sps:$4 sm:$0xff]  }
 0x3ad   :  { %4873 = vmatprep.subr.bf16.mxu0 %v6213_v57  ;;  %v6294_v57 = vld [vmem:[#allocation9 + $0x854] ss:$24 sps:$4 sm:$0xff]  }
 0x3b0   :  { %4874 = vmatpush1.bf16.msra.mxu0 %v6211_v59  ;;  %v6292_v59 = vld [vmem:[#allocation9 + $0x850] ss:$24 sps:$4 sm:$0xff]  }
 0x3b1   :  { %4875 = vmatprep.subr.bf16.mxu0 %v6216_v60  ;;  %v6297_v60 = vld [vmem:[#allocation9 + $0x884] ss:$24 sps:$4 sm:$0xff]  }
 0x3b4   :  { %4876 = vmatpush1.bf16.msra.mxu0 %v6214_v61  ;;  %v6295_v61 = vld [vmem:[#allocation9 + $0x880] ss:$24 sps:$4 sm:$0xff]  }
 0x3b5   :  { %4877 = vmatprep.subr.bf16.mxu0 %v6219_v62  ;;  %v6300_v62 = vld [vmem:[#allocation9 + $0x8b4] ss:$24 sps:$4 sm:$0xff]  }
 0x3b8   :  { %4878 = vmatpush1.bf16.msra.mxu0 %v6217_v0  ;;  %v6298_v0 = vld [vmem:[#allocation9 + $0x8b0] ss:$24 sps:$4 sm:$0xff]  }
 0x3b9   :  { %4879 = vmatprep.subr.bf16.mxu0 %v6222_v2  ;;  %v6303_v2 = vld [vmem:[#allocation9 + $0x8e4] ss:$24 sps:$4 sm:$0xff]  }
 0x3bc   :  { %4880 = vmatpush1.bf16.msra.mxu0 %v6220_v33  ;;  %v6301_v33 = vld [vmem:[#allocation9 + $0x8e0] ss:$24 sps:$4 sm:$0xff]  }
 0x3bd   :  { %4881 = vmatprep.subr.bf16.mxu0 %v6225_v4  ;;  %v6306_v4 = vld [vmem:[#allocation9 + $0x914] ss:$24 sps:$4 sm:$0xff]  }
 0x3c0   :  { %4882 = vmatpush1.bf16.msra.mxu0 %v6223_v50  ;;  %v6304_v50 = vld [vmem:[#allocation9 + $0x910] ss:$24 sps:$4 sm:$0xff]  }
 0x3c1   :  { %4883 = vmatprep.subr.bf16.mxu0 %v6228_v40  ;;  %v6309_v40 = vld [vmem:[#allocation9 + $0x944] ss:$24 sps:$4 sm:$0xff]  }
 0x3c4   :  { %4884 = vmatpush1.bf16.msra.mxu0 %v6226_v1  ;;  %v6307_v1 = vld [vmem:[#allocation9 + $0x940] ss:$24 sps:$4 sm:$0xff]  }
 0x3c5   :  { %4885 = vmatprep.subr.bf16.mxu0 %v6231_v6  ;;  %v6312_v6 = vld [vmem:[#allocation9 + $0x974] ss:$24 sps:$4 sm:$0xff]  }
 0x3c8   :  { %4886 = vmatpush1.bf16.msra.mxu0 %v6229_v7  ;;  %v6310_v7 = vld [vmem:[#allocation9 + $0x970] ss:$24 sps:$4 sm:$0xff]  }
 0x3c9   :  { %4887 = vmatprep.subr.bf16.mxu0 %v6234_v8  ;;  %v6315_v8 = vld [vmem:[#allocation9 + $0x9a4] ss:$24 sps:$4 sm:$0xff]  }
 0x3cc   :  { %4888 = vmatpush1.bf16.msra.mxu0 %v6232_v47  ;;  %v6313_v47 = vld [vmem:[#allocation9 + $0x9a0] ss:$24 sps:$4 sm:$0xff]  }
 0x3cd   :  { %4889 = vmatprep.subr.bf16.mxu0 %v6237_v9  ;;  %v6318_v9 = vld [vmem:[#allocation9 + $0x9d4] ss:$24 sps:$4 sm:$0xff]  }
 0x3d0   :  { %4890 = vmatpush1.bf16.msra.mxu0 %v6235_v10  ;;  %v6316_v10 = vld [vmem:[#allocation9 + $0x9d0] ss:$24 sps:$4 sm:$0xff]  }
 0x3d1   :  { %4891 = vmatprep.subr.bf16.mxu0 %v6240_v11  ;;  %v6752_v11 = vld [vmem:[#allocation10] sm:$0x3f] }
 0x3d4   :  { %4892 = vmatpush1.bf16.msra.mxu0 %v6238_v42  ;;  %v6319_v42 = vld [vmem:[#allocation9 + $0xa00] ss:$24 sps:$4 sm:$0xff]  }
 0x3d5   :  { %4893 = vmatprep.subr.bf16.mxu0 %v6243_v12  ;;  %v2559_v12 = vrot.slane %v6752_v11, %v6644_v18  ;;  %v6328_v18 = vld [vmem:[#allocation9 + $0xa90] ss:$24 sps:$4 sm:$0xff]  }
 0x3d8   :  { %4894 = vmatpush1.bf16.msra.mxu0 %v6241_v13  ;;  %v6324_v13 = vld [vmem:[#allocation9 + $0xa34] ss:$24 sps:$4 sm:$0xff]  }
 0x3d9   :  { %4895 = vmatprep.subr.bf16.mxu0 %v6246_v14 }
 0x3dc   :  { %4896 = vmatpush1.bf16.msra.mxu0 %v6244_v49 }
 0x3dd   :  { %4897 = vmatprep.subr.bf16.mxu0 %v6249_v20 }
 0x3e0   :  { %4898 = vmatpush1.bf16.msra.mxu0 %v6247_v21 }
 0x3e1   :  { %4899 = vmatprep.subr.bf16.mxu0 %v6252_v22 }
 0x3e4   :  { %4900 = vmatpush1.bf16.msra.mxu0 %v6250_v27  ;;  %v6322_v27 = vld [vmem:[#allocation9 + $0xa30] ss:$24 sps:$4 sm:$0xff]  }
 0x3e5   :  { %4901 = vmatprep.subr.bf16.mxu0 %v6255_v25 }
 0x3e8   :  { %4902 = vmatpush1.bf16.msra.mxu0 %v6253_v26  ;;  %v6327_v26 = vld [vmem:[#allocation9 + $0xa64] ss:$24 sps:$4 sm:$0xff]  }
 0x3e9   :  { %4912 = vmatprep.subr.bf16.mxu0 %v6258_v29  ;;  %v6330_v29 = vld [vmem:[#allocation9 + $0xa94] ss:$24 sps:$4 sm:$0xff]  }
 0x3eb   :  { %4904 = vmatmul.mubr.bf16.vlgmr.msra.gmra.mrb[12].mxu0 %v6716_v3  ;;  %v6271_v3 = vld [vmem:[#allocation9 + $0x700] ss:$24 sps:$4 sm:$0xff]  }
 0x3ec   :  { %4913 = vmatpush1.bf16.msra.mxu0 %v6256_v30  ;;  %4944 = vmatprep.mubr.bf16.mxu0 %v6718_v5  ;;  %v6274_v5 = vld [vmem:[#allocation9 + $0x730] ss:$24 sps:$4 sm:$0xff]   ;;  %v6333_v30 = vld [vmem:[#allocation9 + $0xac4] ss:$24 sps:$4 sm:$0xff]  }
 0x3ed   :  { %4914 = vmatprep.subr.bf16.mxu0 %v6261_v31 }
 0x3f0   :  { %4915 = vmatpush1.bf16.msra.mxu0 %v6259_v32 }
 0x3f1   :  { %4916 = vmatprep.subr.bf16.mxu0 %v6264_v34  ;;  %v6331_v34 = vld [vmem:[#allocation9 + $0xac0] ss:$24 sps:$4 sm:$0xff]  }
 0x3f4   :  { %4917 = vmatpush1.bf16.msra.mxu0 %v6262_v35 }
 0x3f5   :  { %4918 = vmatprep.subr.bf16.mxu0 %v6267_v36  ;;  %v6336_v36 = vld [vmem:[#allocation9 + $0xaf4] ss:$24 sps:$4 sm:$0xff]  }
 0x3f8   :  { %4919 = vmatpush1.bf16.msra.mxu0 %v6265_v37  ;;  %v6334_v37 = vld [vmem:[#allocation9 + $0xaf0] ss:$24 sps:$4 sm:$0xff]  }
 0x3f9   :  { %4920 = vmatprep.subr.bf16.mxu0 %v6270_v38  ;;  %v6339_v38 = vld [vmem:[#allocation9 + $0xb24] ss:$24 sps:$4 sm:$0xff]  }
 0x3fc   :  { %4921 = vmatpush1.bf16.msra.mxu0 %v6268_v39  ;;  %v6337_v39 = vld [vmem:[#allocation9 + $0xb20] ss:$24 sps:$4 sm:$0xff]  }
 0x3fd   :  { %4922 = vmatprep.subr.bf16.mxu0 %v6273_v41  ;;  %v6342_v41 = vld [vmem:[#allocation9 + $0xb54] ss:$24 sps:$4 sm:$0xff]  }
 0x400   :  { %4923 = vmatpush1.bf16.msra.mxu0 %v6271_v3  ;;  %v6340_v3 = vld [vmem:[#allocation9 + $0xb50] ss:$24 sps:$4 sm:$0xff]  }
 0x401   :  { %4924 = vmatprep.subr.bf16.mxu0 %v6276_v43  ;;  %v6345_v43 = vld [vmem:[#allocation9 + $0xb84] ss:$24 sps:$4 sm:$0xff]  }
 0x404   :  { %4925 = vmatpush1.bf16.msra.mxu0 %v6274_v5  ;;  %v6343_v5 = vld [vmem:[#allocation9 + $0xb80] ss:$24 sps:$4 sm:$0xff]  }
 0x405   :  { %4926 = vmatprep.subr.bf16.mxu0 %v6279_v45  ;;  %v6348_v45 = vld [vmem:[#allocation9 + $0xbb4] ss:$24 sps:$4 sm:$0xff]  }
 0x408   :  { %4927 = vmatpush1.bf16.msra.mxu0 %v6277_v46  ;;  %v2563_v46 = vrot.slane %v6752_v11, %v6670_v24 }
 0x409   :  { %4928 = vmatprep.subr.bf16.mxu0 %v6282_v17  ;;  %v6346_v17 = vld [vmem:[#allocation9 + $0xbb0] ss:$24 sps:$4 sm:$0xff]  }
 0x40c   :  { %4929 = vmatpush1.bf16.msra.mxu0 %v6280_v48  ;;  %v2567_v48 = vrot.slane %v6752_v11, %v6647_v19 }
 0x40d   :  { %4930 = vmatprep.subr.bf16.mxu0 %v6285_v51  ;;  %v6351_v51 = vld [vmem:[#allocation9 + $0xbe4] ss:$24 sps:$4 sm:$0xff]  }
 0x410   :  { %4931 = vmatpush1.bf16.msra.mxu0 %v6283_v52 }
 0x411   :  { %4932 = vmatprep.subr.bf16.mxu0 %v6288_v53 }
 0x414   :  { %4933 = vmatpush1.bf16.msra.mxu0 %v6286_v54 }
 0x415   :  { %4934 = vmatprep.subr.bf16.mxu0 %v6291_v55  ;;  %v6349_v55 = vld [vmem:[#allocation9 + $0xbe0] ss:$24 sps:$4 sm:$0xff]  }
 0x418   :  { %4935 = vmatpush1.bf16.msra.mxu0 %v6289_v56 }
 0x419   :  { %4936 = vmatprep.subr.bf16.mxu0 %v6294_v57 }
 0x41c   :  { %4937 = vmatpush1.bf16.msra.mxu0 %v6292_v59 }
 0x41d   :  { %4938 = vmatprep.subr.bf16.mxu0 %v6297_v60  ;;  %v6518_v60 = vmov 1983009808  }
 0x420   :  { %4939 = vmatpush1.bf16.msra.mxu0 %v6295_v61  ;;  %v5009_v61 = vunpack.c.l.s4 %v6518_v60 }
 0x421   :  { %4940 = vmatprep.subr.bf16.mxu0 %v6300_v62 }
 0x422   :  { %v5010_v24 = vunpack.c.0.s8 %v5009_v61 }
 0x424   :  { %4941 = vmatpush1.bf16.msra.mxu0 %v6298_v0  ;;  %v5013_v19 = vsub.s32 %v5010_v24, %v6636_v15 }
 0x425   :  { %4942 = vmatprep.subr.bf16.mxu0 %v6303_v2 }
 0x428   :  { %4943 = vmatpush1.bf16.msra.mxu0 %v6301_v33 }
 0x429   :  { %4953 = vmatprep.subr.bf16.mxu0 %v6306_v4 }
 0x42b   :  { %4945 = vmatmul.mubr.bf16.vlgmr.msra.gmra.mrb[12].mxu0 %v6731_v23  ;;  %v6321_v23 = vld [vmem:[#allocation9 + $0xa04] ss:$24 sps:$4 sm:$0xff]  }
 0x42c   :  { %4954 = vmatpush1.bf16.msra.mxu0 %v6304_v50  ;;  %4985 = vmatprep.mubr.bf16.mxu0 %v6737_v28  ;;  %v2555_v28 = vrot.slane %v6752_v11, %v6639_v16  ;;  %v6325_v16 = vld [vmem:[#allocation9 + $0xa60] ss:$24 sps:$4 sm:$0xff]  }
 0x42d   :  { %4955 = vmatprep.subr.bf16.mxu0 %v6309_v40  ;;  %v2571_v40 = vrot.slane %v6752_v11, %v520_v63 }
 0x430   :  { %4956 = vmatpush1.bf16.msra.mxu0 %v6307_v1 }
 0x431   :  { %4957 = vmatprep.subr.bf16.mxu0 %v6312_v6 }
 0x434   :  { %4958 = vmatpush1.bf16.msra.mxu0 %v6310_v7 }
 0x435   :  { %4959 = vmatprep.subr.bf16.mxu0 %v6315_v8 }
 0x438   :  { %4960 = vmatpush1.bf16.msra.mxu0 %v6313_v47 }
 0x439   :  { %4961 = vmatprep.subr.bf16.mxu0 %v6318_v9 }
 0x43c   :  { %4962 = vmatpush1.bf16.msra.mxu0 %v6316_v10 }
 0x43d   :  { %4963 = vmatprep.subr.bf16.mxu0 %v6321_v23 }
 0x43e   :  { %v4659_v14 = vpop.f32.mrb[8].mxu0 }
 0x43f   :  { %v5698_v49 = vadd.f32 %v4659_v14, %v2555_v28  ;;  %v4661_v20 = vpop.f32.mrb[9].mxu0 }
 0x440   :  { %v5699_v21 = vadd.f32 %v4661_v20, %v2559_v12  ;;  %4964 = vmatpush1.bf16.msra.mxu0 %v6319_v42  ;;  %v4663_v22 = vpop.f32.mrb[10].mxu0 }
 0x441   :  { %6352 = vtanh.f32 %v5698_v49  ;;  %v4664_v25 = vpop.f32.mrb[11].mxu0  ;;  %4965 = vmatprep.subr.bf16.mxu0 %v6324_v13 }
 0x442   :  { %6354 = vtanh.f32 %v5699_v21 }
 0x444   :  { %4966 = vmatpush1.bf16.msra.mxu0 %v6322_v27 }
 0x445   :  { %4967 = vmatprep.subr.bf16.mxu0 %v6327_v26 }
 0x448   :  { %4968 = vmatpush1.bf16.msra.mxu0 %v6325_v16 }
 0x449   :  { %4969 = vmatprep.subr.bf16.mxu0 %v6330_v29 }
 0x44b   :  { %v6353_v31 = vpop.eup %6352 }
 0x44c   :  { %v6355_v32 = vpop.eup %6354  ;;  %4970 = vmatpush1.bf16.msra.mxu0 %v6328_v18 }
 0x44d   :  { %v5006_v35 = vcombine.low %v6353_v31, %v6355_v32  ;;  %4971 = vmatprep.subr.bf16.mxu0 %v6333_v30 }
 0x44f   :  { %v5014_v33 = vrot.slane %v5006_v35, %v5013_v19 }
 0x450   :  { %4972 = vmatpush1.bf16.msra.mxu0 %v6331_v34 }
 0x451   :  { %4973 = vmatprep.subr.bf16.mxu0 %v6336_v36 }
 0x454   :  { %4974 = vmatpush1.bf16.msra.mxu0 %v6334_v37 }
 0x455   :  { %4975 = vmatprep.subr.bf16.mxu0 %v6339_v38 }
 0x458   :  { %4976 = vmatpush1.bf16.msra.mxu0 %v6337_v39 }
 0x459   :  { %4977 = vmatprep.subr.bf16.mxu0 %v6342_v41 }
 0x45c   :  { %4978 = vmatpush1.bf16.msra.mxu0 %v6340_v3 }
 0x45d   :  { %4979 = vmatprep.subr.bf16.mxu0 %v6345_v43 }
 0x460   :  { %4980 = vmatpush1.bf16.msra.mxu0 %v6343_v5 }
 0x461   :  { %4981 = vmatprep.subr.bf16.mxu0 %v6348_v45 }
 0x463   :  { %v4823_v52 = vpop.f32.mrb[16].mxu1 }
 0x464   :  { %v5700_v53 = vadd.f32 %v4823_v52, %v2563_v46  ;;  %v4825_v54 = vpop.f32.mrb[17].mxu1  ;;  %4982 = vmatpush1.bf16.msra.mxu0 %v6346_v17 }
 0x465   :  { %v5701_v56 = vadd.f32 %v4825_v54, %v2567_v48  ;;  %v4827_v57 = vpop.f32.mrb[18].mxu1  ;;  %4983 = vmatprep.subr.bf16.mxu0 %v6351_v51 }
 0x466   :  { %6356 = vtanh.f32 %v5700_v53  ;;  %v4828_v59 = vpop.f32.mrb[19].mxu1 }
 0x467   :  { %6358 = vtanh.f32 %v5701_v56 }
 0x468   :  { %4984 = vmatpush1.bf16.msra.mxu0 %v6349_v55 }
 0x46b   :  { %4986 = vmatmul.mubr.bf16.vlgmr.msra.gmra.mrb[12].mxu0 %v6739_v58  ;;  %v2575_v58 = vrot.slane %v6752_v11, %v524_v44 }
 0x470   :  { %v6357_v62 = vpop.eup %6356 }
 0x471   :  { %v6359_v0 = vpop.eup %6358 }
 0x472   :  { %v5007_v2 = vcombine.low %v6357_v62, %v6359_v0 }
 0x474   :  { %v5021_v4 = vrot.slane %v5007_v2, %v5013_v19 }
 0x476   :  { %v5022_v50 = vcombine.low %v5014_v33, %v5021_v4 }
 0x478   :  { %5033 = vst [vmem:[%s6783_s7] sm:$0xff] %v5022_v50 }
 0x53e   :  { %v4987_v1 = vpop.f32.mrb[12].mxu0 }
 0x53f   :  { %v5702_v6 = vadd.f32 %v4987_v1, %v2571_v40  ;;  %v4989_v7 = vpop.f32.mrb[13].mxu0 }
 0x540   :  { %v5703_v8 = vadd.f32 %v4989_v7, %v2575_v58  ;;  %v4991_v47 = vpop.f32.mrb[14].mxu0 }
 0x541   :  { %6360 = vtanh.f32 %v5702_v6  ;;  %v4992_v9 = vpop.f32.mrb[15].mxu0 }
 0x542   :  { %6362 = vtanh.f32 %v5703_v8 }
 0x54b   :  { %v6361_v10 = vpop.eup %6360 }
 0x54c   :  { %v6363_v23 = vpop.eup %6362 }
 0x54d   :  { %v5023_v28 = vcombine.low %v6361_v10, %v6363_v23 }
 0x54f   :  { %5689 = vst.sshfl [vmem:[%s6783_s7 + $0x8] sm:$0x33 pattern:$0x76325410] %v5023_v28 }
 0x550   :  { %5039 = vsyncpa [#allocation3], 1 }
 0x551   :  { %5040 = vsyncpa [#allocation5], 1 }
 0x552   :  { %5041 = vsyncpa [#allocation8], 1 }
 0x553   :  { %5042 = vsyncpa [#allocation11], 1 }

</bundles_post_ra>
